<compile_context>
chip_gen: v7x
topology: tpu7x:2x2x1
jax: 0.10.0
libtpu: 0.0.40
codegen_flags: <defaults>
</compile_context>

<pallas_src>
import jax
import jax.numpy as jnp
from jax.experimental import pallas as pl
from jax.experimental.pallas import tpu as pltpu


# ---------------------------------------------------------------------------
# Static network geometry (28x28x1 input is required by x.view(-1, 320))
# ---------------------------------------------------------------------------
KH = KW = 5
H0 = W0 = 28
C1 = 10
OH1 = OW1 = 24        # conv1 output spatial
PH1 = PW1 = 12        # after pool1
C2 = 20
OH2 = OW2 = 8         # conv2 output spatial
PH2 = PW2 = 4         # after pool2
NFC1 = 50
NOUT = 10

LC1 = OW1 * C1        # 240 lanes: conv1 activation, lane = ow*C1 + co
LP1 = PW1 * C1        # 120 lanes: pooled1 activation
LC2 = OW2 * C2        # 160 lanes: conv2 activation, lane = ow*C2 + co
LP2 = PW2 * C2        #  80 lanes: pooled2 activation


# ---------------------------------------------------------------------------
# Fully fused forward kernel
# ---------------------------------------------------------------------------
def _net_kernel(x_ref, t1_ref, b1_ref, s1e_ref, s1o_ref,
                t2_ref, b2_ref, s2e_ref, s2o_ref,
                wfc1_ref, bfc1_ref, wfc2_ref, bfc2_ref,
                out_ref,
                w1p_ref, p1_ref, w2p_ref):
    f32 = jnp.float32
    B = x_ref.shape[0]

    for b in range(B):                      # small static batch, fully unrolled
        # ---- conv1 + bias + ReLU: rows = oh, lanes = ow*C1 + co -------------
        a1 = jnp.zeros((OH1, LC1), f32)
        for ki in range(KH):
            xk = x_ref[b, pl.ds(ki, OH1), :]                       # (24, 28)
            a1 = a1 + jnp.dot(xk, t1_ref[ki], preferred_element_type=f32)
        a1 = jnp.maximum(a1 + b1_ref[...], 0.0)

        # ---- pool1 along W: lane downsample-by-2 via 0/1 selection matmuls --
        w1 = jnp.maximum(jnp.dot(a1, s1e_ref[...], preferred_element_type=f32),
                         jnp.dot(a1, s1o_ref[...], preferred_element_type=f32))
        w1p_ref[b] = w1                                            # (24, 120)

        # ---- pool1 along H: max over adjacent row pairs ----------------------
        for ph in range(PH1):
            p1_ref[b, pl.ds(ph, 1), :] = jnp.maximum(
                w1p_ref[b, pl.ds(2 * ph, 1), :],
                w1p_ref[b, pl.ds(2 * ph + 1, 1), :])

        # ---- conv2 + bias + ReLU: rows = oh2, lanes = ow*C2 + co -------------
        a2 = jnp.zeros((OH2, LC2), f32)
        for ki in range(KH):
            pk = p1_ref[b, pl.ds(ki, OH2), :]                      # (8, 120)
            a2 = a2 + jnp.dot(pk, t2_ref[ki], preferred_element_type=f32)
        a2 = jnp.maximum(a2 + b2_ref[...], 0.0)

        # ---- pool2 along W ----------------------------------------------------
        w2 = jnp.maximum(jnp.dot(a2, s2e_ref[...], preferred_element_type=f32),
                         jnp.dot(a2, s2o_ref[...], preferred_element_type=f32))
        w2p_ref[b] = w2                                            # (8, 80)

        # ---- pool2 along H fused with fc1 (pre-permuted per-row weights) -----
        acc = jnp.zeros((1, NFC1), f32)
        for ph in range(PH2):
            p2h = jnp.maximum(w2p_ref[b, pl.ds(2 * ph, 1), :],
                              w2p_ref[b, pl.ds(2 * ph + 1, 1), :])  # (1, 80)
            acc = acc + jnp.dot(p2h, wfc1_ref[ph], preferred_element_type=f32)
        h1 = jnp.maximum(acc + bfc1_ref[...], 0.0)                  # (1, 50)

        # ---- fc2 --------------------------------------------------------------
        out_ref[pl.ds(b, 1), :] = (
            jnp.dot(h1, wfc2_ref[...], preferred_element_type=f32)
            + bfc2_ref[...]).astype(out_ref.dtype)


# ---------------------------------------------------------------------------
# One-time host-side weight repacking (preserves nn.Module semantics exactly)
# ---------------------------------------------------------------------------
def _banded_conv1_weights(w1):
    # T1[ki, iw, ow*C1 + co] = w1[co, 0, ki, iw - ow]  for 0 <= iw-ow < KW
    iw = jnp.arange(W0)[:, None, None]
    ow = jnp.arange(OW1)[None, :, None]
    co = jnp.arange(C1)[None, None, :]
    kj = iw - ow
    valid = (kj >= 0) & (kj < KW)
    kj_c = jnp.clip(kj, 0, KW - 1)
    mats = []
    for ki in range(KH):
        wk = w1[:, 0, ki, :]                         # (C1, KW)
        vals = wk[co, kj_c]                          # (W0, OW1, C1)
        mats.append(jnp.where(valid, vals, 0.0).reshape(W0, LC1))
    return jnp.stack(mats).astype(jnp.float32)       # (KH, 28, 240)


def _banded_conv2_weights(w2):
    # T2[ki, iw*C1 + ci, ow*C2 + co] = w2[co, ci, ki, iw - ow]
    iw = jnp.arange(PW1)[:, None, None, None]
    ci = jnp.arange(C1)[None, :, None, None]
    ow = jnp.arange(OW2)[None, None, :, None]
    co = jnp.arange(C2)[None, None, None, :]
    kj = iw - ow
    valid = (kj >= 0) & (kj < KW)
    kj_c = jnp.clip(kj, 0, KW - 1)
    mats = []
    for ki in range(KH):
        wk = w2[:, :, ki, :]                         # (C2, C1, KW)
        vals = wk[co, ci, kj_c]                      # (PW1, C1, OW2, C2)
        mats.append(jnp.where(valid, vals, 0.0).reshape(PW1 * C1, LC2))
    return jnp.stack(mats).astype(jnp.float32)       # (KH, 120, 160)


def _pool_select(W, C):
    # S_even[w*C+c, pw*C+c'] = (w == 2*pw) & (c == c'); S_odd uses w == 2*pw+1
    w = jnp.arange(W)[:, None, None, None]
    c = jnp.arange(C)[None, :, None, None]
    pw = jnp.arange(W // 2)[None, None, :, None]
    c2 = jnp.arange(C)[None, None, None, :]
    even = ((w == 2 * pw) & (c == c2)).astype(jnp.float32)
    odd = ((w == 2 * pw + 1) & (c == c2)).astype(jnp.float32)
    return even.reshape(W * C, (W // 2) * C), odd.reshape(W * C, (W // 2) * C)


def prepare_params(params):
    """Repack PyTorch-layout weights into the fused kernel's operands (once)."""
    s1e, s1o = _pool_select(OW1, C1)                 # (240, 120)
    s2e, s2o = _pool_select(OW2, C2)                 # (160, 80)
    # fc1 consumes pooled2 rows directly.  PyTorch NCHW flatten index is
    # c*PH2*PW2 + h*PW2 + w; our pooled2 row-h lane index is w*C2 + c.
    wfc1 = params["wfc1"].reshape(NFC1, C2, PH2, PW2)               # (n, c, h, w)
    wfc1 = jnp.transpose(wfc1, (2, 3, 1, 0)).reshape(PH2, LP2, NFC1)  # (4, 80, 50)
    return {
        "t1": _banded_conv1_weights(params["w1"]),
        "b1": jnp.tile(params["b1"], OW1).reshape(1, LC1),
        "s1e": s1e, "s1o": s1o,
        "t2": _banded_conv2_weights(params["w2"]),
        "b2": jnp.tile(params["b2"], OW2).reshape(1, LC2),
        "s2e": s2e, "s2o": s2o,
        "wfc1": wfc1.astype(jnp.float32),
        "bfc1": params["bfc1"].reshape(1, NFC1),
        "wfc2": params["wfc2"].T.astype(jnp.float32),               # (50, 10)
        "bfc2": params["bfc2"].reshape(1, NOUT),
    }


# ---------------------------------------------------------------------------
# Forward pass: a single fused pallas_call
# ---------------------------------------------------------------------------
@jax.jit
def net_forward(x_nchw, packed):
    B, Cin, H, W = x_nchw.shape
    assert (Cin, H, W) == (1, H0, W0), "Net requires (B, 1, 28, 28) inputs"
    x = x_nchw[:, 0]                                  # (B, 28, 28)

    flops = 2 * B * (KH * OH1 * W0 * LC1 + 2 * OH1 * LC1 * LP1
                     + KH * OH2 * LP1 * LC2 + 2 * OH2 * LC2 * LP2
                     + PH2 * LP2 * NFC1 + NFC1 * NOUT)
    bytes_accessed = 4 * (B * H0 * W0 + KH * W0 * LC1 + LC1 + 2 * LC1 * LP1
                          + KH * LP1 * LC2 + LC2 + 2 * LC2 * LP2
                          + PH2 * LP2 * NFC1 + NFC1 + NFC1 * NOUT + NOUT
                          + B * NOUT)

    vmem = pl.BlockSpec(memory_space=pltpu.MemorySpace.VMEM)
    return pl.pallas_call(
        _net_kernel,
        out_shape=jax.ShapeDtypeStruct((B, NOUT), jnp.float32),
        in_specs=[vmem] * 13,
        out_specs=vmem,
        scratch_shapes=[
            pltpu.VMEM((B, OH1, LP1), jnp.float32),   # conv1 act, W-pooled
            pltpu.VMEM((B, PH1, LP1), jnp.float32),   # pool1 output
            pltpu.VMEM((B, OH2, LP2), jnp.float32),   # conv2 act, W-pooled
        ],
        cost_estimate=pl.CostEstimate(flops=flops, transcendentals=0,
                                      bytes_accessed=bytes_accessed),
    )(x, packed["t1"], packed["b1"], packed["s1e"], packed["s1o"],
      packed["t2"], packed["b2"], packed["s2e"], packed["s2o"],
      packed["wfc1"], packed["bfc1"], packed["wfc2"], packed["bfc2"])


# ---------------------------------------------------------------------------
# Pure-JAX reference (for correctness check against the Pallas path)
# ---------------------------------------------------------------------------
def ref_forward(x, params):
    hp = jax.lax.Precision.HIGHEST
    dn = ("NCHW", "OIHW", "NCHW")
    y = jax.lax.conv_general_dilated(x, params["w1"], (1, 1), "VALID",
                                     dimension_numbers=dn, precision=hp)
    y = jnp.maximum(y + params["b1"].reshape(1, -1, 1, 1), 0.0)
    y = jax.lax.reduce_window(y, -jnp.inf, jax.lax.max,
                              (1, 1, 2, 2), (1, 1, 2, 2), "VALID")
    y = jax.lax.conv_general_dilated(y, params["w2"], (1, 1), "VALID",
                                     dimension_numbers=dn, precision=hp)
    y = jnp.maximum(y + params["b2"].reshape(1, -1, 1, 1), 0.0)
    y = jax.lax.reduce_window(y, -jnp.inf, jax.lax.max,
                              (1, 1, 2, 2), (1, 1, 2, 2), "VALID")
    y = y.reshape(y.shape[0], -1)                     # (B, 320), NCHW order
    y = jnp.maximum(jnp.dot(y, params["wfc1"].T, precision=hp) + params["bfc1"], 0.0)
    y = jnp.dot(y, params["wfc2"].T, precision=hp) + params["bfc2"]
    return y


if __name__ == "__main__":
    key = jax.random.PRNGKey(0)
    ks = jax.random.split(key, 9)

    # Deterministic synthetic parameters (PyTorch shapes: OIHW / (out, in)).
    params = {
        "w1":   0.10 * jax.random.normal(ks[1], (10, 1, 5, 5), jnp.float32),
        "b1":   0.10 * jax.random.normal(ks[2], (10,), jnp.float32),
        "w2":   0.05 * jax.random.normal(ks[3], (20, 10, 5, 5), jnp.float32),
        "b2":   0.05 * jax.random.normal(ks[4], (20,), jnp.float32),
        "wfc1": 0.05 * jax.random.normal(ks[5], (50, 320), jnp.float32),
        "bfc1": 0.05 * jax.random.normal(ks[6], (50,), jnp.float32),
        "wfc2": 0.10 * jax.random.normal(ks[7], (10, 50), jnp.float32),
        "bfc2": 0.10 * jax.random.normal(ks[8], (10,), jnp.float32),
    }

    # MNIST-shaped input (NCHW): batch=2, 1 channel, 28x28 (required for the
    # view(-1, 320) flatten to be valid).
    x = jax.random.normal(ks[0], (2, 1, 28, 28), jnp.float32)

    packed = prepare_params(params)                   # one-time weight repack
    out = net_forward(x, packed)
    out = jax.block_until_ready(out)
    assert out.shape == (2, 10) and out.dtype == jnp.float32

    ref = ref_forward(x, params)
    assert jnp.allclose(out, ref, rtol=1e-3, atol=1e-3), (
        f"mismatch: max abs err {jnp.max(jnp.abs(out - ref))}")

    print("KERNEL_OK")
</pallas_src>

<mosaic_0001>
module attributes {stable_mosaic.version = 11 : i64} {
  func.func @_net_kernel(%arg0: memref<2x28x28xf32, #tpu.memory_space<vmem>>, %arg1: memref<5x28x240xf32, #tpu.memory_space<vmem>>, %arg2: memref<1x240xf32, #tpu.memory_space<vmem>>, %arg3: memref<240x120xf32, #tpu.memory_space<vmem>>, %arg4: memref<240x120xf32, #tpu.memory_space<vmem>>, %arg5: memref<5x120x160xf32, #tpu.memory_space<vmem>>, %arg6: memref<1x160xf32, #tpu.memory_space<vmem>>, %arg7: memref<160x80xf32, #tpu.memory_space<vmem>>, %arg8: memref<160x80xf32, #tpu.memory_space<vmem>>, %arg9: memref<4x80x50xf32, #tpu.memory_space<vmem>>, %arg10: memref<1x50xf32, #tpu.memory_space<vmem>>, %arg11: memref<50x10xf32, #tpu.memory_space<vmem>>, %arg12: memref<1x10xf32, #tpu.memory_space<vmem>>, %arg13: memref<2x10xf32, #tpu.memory_space<vmem>>, %arg14: memref<2x24x120xf32, #tpu.memory_space<vmem>>, %arg15: memref<2x12x120xf32, #tpu.memory_space<vmem>>, %arg16: memref<2x8x80xf32, #tpu.memory_space<vmem>>) attributes {dimension_semantics = [], scalar_prefetch = 0 : i64, scratch_operands = 3 : i64, tpu.core_type = #tpu.core_type<tc>} {
    %cst = arith.constant 0.000000e+00 : f32
    %0 = vector.broadcast %cst : f32 to vector<24x240xf32>
    %c0 = arith.constant 0 : index
    %c0_0 = arith.constant 0 : index
    %c0_1 = arith.constant 0 : index
    %1 = vector.load %arg0[%c0, %c0_0, %c0_1] : memref<2x28x28xf32, #tpu.memory_space<vmem>>, vector<1x24x28xf32>
    %2 = vector.shape_cast %1 : vector<1x24x28xf32> to vector<24x28xf32>
    %c0_2 = arith.constant 0 : index
    %c0_3 = arith.constant 0 : index
    %c0_4 = arith.constant 0 : index
    %3 = vector.load %arg1[%c0_2, %c0_3, %c0_4] : memref<5x28x240xf32, #tpu.memory_space<vmem>>, vector<1x28x240xf32>
    %4 = vector.shape_cast %3 : vector<1x28x240xf32> to vector<28x240xf32>
    %cst_5 = arith.constant dense<0.000000e+00> : vector<24x240xf32>
    %5 = tpu.matmul %2, %4, %cst_5 {dimension_numbers = #tpu.dot_dimension_numbers<[1], [0], [0], [1], [0, 0, 1, 1], [], []>} : vector<24x28xf32>, vector<28x240xf32>, vector<24x240xf32> -> vector<24x240xf32>
    %6 = arith.addf %0, %5 : vector<24x240xf32>
    %c0_6 = arith.constant 0 : index
    %c1 = arith.constant 1 : index
    %c0_7 = arith.constant 0 : index
    %7 = vector.load %arg0[%c0_6, %c1, %c0_7] : memref<2x28x28xf32, #tpu.memory_space<vmem>>, vector<1x24x28xf32>
    %8 = vector.shape_cast %7 : vector<1x24x28xf32> to vector<24x28xf32>
    %c1_8 = arith.constant 1 : index
    %c0_9 = arith.constant 0 : index
    %c0_10 = arith.constant 0 : index
    %9 = vector.load %arg1[%c1_8, %c0_9, %c0_10] : memref<5x28x240xf32, #tpu.memory_space<vmem>>, vector<1x28x240xf32>
    %10 = vector.shape_cast %9 : vector<1x28x240xf32> to vector<28x240xf32>
    %cst_11 = arith.constant dense<0.000000e+00> : vector<24x240xf32>
    %11 = tpu.matmul %8, %10, %cst_11 {dimension_numbers = #tpu.dot_dimension_numbers<[1], [0], [0], [1], [0, 0, 1, 1], [], []>} : vector<24x28xf32>, vector<28x240xf32>, vector<24x240xf32> -> vector<24x240xf32>
    %12 = arith.addf %6, %11 : vector<24x240xf32>
    %c0_12 = arith.constant 0 : index
    %c2 = arith.constant 2 : index
    %c0_13 = arith.constant 0 : index
    %13 = vector.load %arg0[%c0_12, %c2, %c0_13] : memref<2x28x28xf32, #tpu.memory_space<vmem>>, vector<1x24x28xf32>
    %14 = vector.shape_cast %13 : vector<1x24x28xf32> to vector<24x28xf32>
    %c2_14 = arith.constant 2 : index
    %c0_15 = arith.constant 0 : index
    %c0_16 = arith.constant 0 : index
    %15 = vector.load %arg1[%c2_14, %c0_15, %c0_16] : memref<5x28x240xf32, #tpu.memory_space<vmem>>, vector<1x28x240xf32>
    %16 = vector.shape_cast %15 : vector<1x28x240xf32> to vector<28x240xf32>
    %cst_17 = arith.constant dense<0.000000e+00> : vector<24x240xf32>
    %17 = tpu.matmul %14, %16, %cst_17 {dimension_numbers = #tpu.dot_dimension_numbers<[1], [0], [0], [1], [0, 0, 1, 1], [], []>} : vector<24x28xf32>, vector<28x240xf32>, vector<24x240xf32> -> vector<24x240xf32>
    %18 = arith.addf %12, %17 : vector<24x240xf32>
    %c0_18 = arith.constant 0 : index
    %c3 = arith.constant 3 : index
    %c0_19 = arith.constant 0 : index
    %19 = vector.load %arg0[%c0_18, %c3, %c0_19] : memref<2x28x28xf32, #tpu.memory_space<vmem>>, vector<1x24x28xf32>
    %20 = vector.shape_cast %19 : vector<1x24x28xf32> to vector<24x28xf32>
    %c3_20 = arith.constant 3 : index
    %c0_21 = arith.constant 0 : index
    %c0_22 = arith.constant 0 : index
    %21 = vector.load %arg1[%c3_20, %c0_21, %c0_22] : memref<5x28x240xf32, #tpu.memory_space<vmem>>, vector<1x28x240xf32>
    %22 = vector.shape_cast %21 : vector<1x28x240xf32> to vector<28x240xf32>
    %cst_23 = arith.constant dense<0.000000e+00> : vector<24x240xf32>
    %23 = tpu.matmul %20, %22, %cst_23 {dimension_numbers = #tpu.dot_dimension_numbers<[1], [0], [0], [1], [0, 0, 1, 1], [], []>} : vector<24x28xf32>, vector<28x240xf32>, vector<24x240xf32> -> vector<24x240xf32>
    %24 = arith.addf %18, %23 : vector<24x240xf32>
    %c0_24 = arith.constant 0 : index
    %c4 = arith.constant 4 : index
    %c0_25 = arith.constant 0 : index
    %25 = vector.load %arg0[%c0_24, %c4, %c0_25] : memref<2x28x28xf32, #tpu.memory_space<vmem>>, vector<1x24x28xf32>
    %26 = vector.shape_cast %25 : vector<1x24x28xf32> to vector<24x28xf32>
    %c4_26 = arith.constant 4 : index
    %c0_27 = arith.constant 0 : index
    %c0_28 = arith.constant 0 : index
    %27 = vector.load %arg1[%c4_26, %c0_27, %c0_28] : memref<5x28x240xf32, #tpu.memory_space<vmem>>, vector<1x28x240xf32>
    %28 = vector.shape_cast %27 : vector<1x28x240xf32> to vector<28x240xf32>
    %cst_29 = arith.constant dense<0.000000e+00> : vector<24x240xf32>
    %29 = tpu.matmul %26, %28, %cst_29 {dimension_numbers = #tpu.dot_dimension_numbers<[1], [0], [0], [1], [0, 0, 1, 1], [], []>} : vector<24x28xf32>, vector<28x240xf32>, vector<24x240xf32> -> vector<24x240xf32>
    %30 = arith.addf %24, %29 : vector<24x240xf32>
    %c0_30 = arith.constant 0 : index
    %c0_31 = arith.constant 0 : index
    %31 = vector.load %arg2[%c0_30, %c0_31] : memref<1x240xf32, #tpu.memory_space<vmem>>, vector<1x240xf32>
    %32 = vector.broadcast %31 : vector<1x240xf32> to vector<24x240xf32>
    %33 = arith.addf %30, %32 : vector<24x240xf32>
    %cst_32 = arith.constant 0.000000e+00 : f32
    %34 = vector.broadcast %cst_32 : f32 to vector<24x240xf32>
    %35 = arith.maximumf %33, %34 : vector<24x240xf32>
    %c0_33 = arith.constant 0 : index
    %c0_34 = arith.constant 0 : index
    %36 = vector.load %arg3[%c0_33, %c0_34] : memref<240x120xf32, #tpu.memory_space<vmem>>, vector<240x120xf32>
    %cst_35 = arith.constant dense<0.000000e+00> : vector<24x120xf32>
    %37 = tpu.matmul %35, %36, %cst_35 {dimension_numbers = #tpu.dot_dimension_numbers<[1], [0], [0], [1], [0, 0, 1, 1], [], []>} : vector<24x240xf32>, vector<240x120xf32>, vector<24x120xf32> -> vector<24x120xf32>
    %c0_36 = arith.constant 0 : index
    %c0_37 = arith.constant 0 : index
    %38 = vector.load %arg4[%c0_36, %c0_37] : memref<240x120xf32, #tpu.memory_space<vmem>>, vector<240x120xf32>
    %cst_38 = arith.constant dense<0.000000e+00> : vector<24x120xf32>
    %39 = tpu.matmul %35, %38, %cst_38 {dimension_numbers = #tpu.dot_dimension_numbers<[1], [0], [0], [1], [0, 0, 1, 1], [], []>} : vector<24x240xf32>, vector<240x120xf32>, vector<24x120xf32> -> vector<24x120xf32>
    %40 = arith.maximumf %37, %39 : vector<24x120xf32>
    %c0_39 = arith.constant 0 : index
    %c0_40 = arith.constant 0 : index
    %c0_41 = arith.constant 0 : index
    %41 = vector.load %arg14[%c0_39, %c0_40, %c0_41] : memref<2x24x120xf32, #tpu.memory_space<vmem>>, vector<1x24x120xf32>
    %42 = vector.shape_cast %41 : vector<1x24x120xf32> to vector<24x120xf32>
    %43 = vector.shape_cast %40 : vector<24x120xf32> to vector<1x24x120xf32>
    tpu.vector_store %arg14[%c0_39, %c0_40, %c0_41], %43 {strides = array<i32>} : memref<2x24x120xf32, #tpu.memory_space<vmem>>, vector<1x24x120xf32>,
    %c0_42 = arith.constant 0 : index
    %c0_43 = arith.constant 0 : index
    %c0_44 = arith.constant 0 : index
    %44 = vector.load %arg14[%c0_42, %c0_43, %c0_44] : memref<2x24x120xf32, #tpu.memory_space<vmem>>, vector<1x1x120xf32>
    %45 = vector.shape_cast %44 : vector<1x1x120xf32> to vector<1x120xf32>
    %c0_45 = arith.constant 0 : index
    %c1_46 = arith.constant 1 : index
    %c0_47 = arith.constant 0 : index
    %46 = vector.load %arg14[%c0_45, %c1_46, %c0_47] : memref<2x24x120xf32, #tpu.memory_space<vmem>>, vector<1x1x120xf32>
    %47 = vector.shape_cast %46 : vector<1x1x120xf32> to vector<1x120xf32>
    %48 = arith.maximumf %45, %47 : vector<1x120xf32>
    %c0_48 = arith.constant 0 : index
    %c0_49 = arith.constant 0 : index
    %c0_50 = arith.constant 0 : index
    %49 = vector.load %arg15[%c0_48, %c0_49, %c0_50] : memref<2x12x120xf32, #tpu.memory_space<vmem>>, vector<1x1x120xf32>
    %50 = vector.shape_cast %49 : vector<1x1x120xf32> to vector<1x120xf32>
    %51 = vector.shape_cast %48 : vector<1x120xf32> to vector<1x1x120xf32>
    tpu.vector_store %arg15[%c0_48, %c0_49, %c0_50], %51 {strides = array<i32>} : memref<2x12x120xf32, #tpu.memory_space<vmem>>, vector<1x1x120xf32>,
    %c0_51 = arith.constant 0 : index
    %c2_52 = arith.constant 2 : index
    %c0_53 = arith.constant 0 : index
    %52 = vector.load %arg14[%c0_51, %c2_52, %c0_53] : memref<2x24x120xf32, #tpu.memory_space<vmem>>, vector<1x1x120xf32>
    %53 = vector.shape_cast %52 : vector<1x1x120xf32> to vector<1x120xf32>
    %c0_54 = arith.constant 0 : index
    %c3_55 = arith.constant 3 : index
    %c0_56 = arith.constant 0 : index
    %54 = vector.load %arg14[%c0_54, %c3_55, %c0_56] : memref<2x24x120xf32, #tpu.memory_space<vmem>>, vector<1x1x120xf32>
    %55 = vector.shape_cast %54 : vector<1x1x120xf32> to vector<1x120xf32>
    %56 = arith.maximumf %53, %55 : vector<1x120xf32>
    %c0_57 = arith.constant 0 : index
    %c1_58 = arith.constant 1 : index
    %c0_59 = arith.constant 0 : index
    %57 = vector.load %arg15[%c0_57, %c1_58, %c0_59] : memref<2x12x120xf32, #tpu.memory_space<vmem>>, vector<1x1x120xf32>
    %58 = vector.shape_cast %57 : vector<1x1x120xf32> to vector<1x120xf32>
    %59 = vector.shape_cast %56 : vector<1x120xf32> to vector<1x1x120xf32>
    tpu.vector_store %arg15[%c0_57, %c1_58, %c0_59], %59 {strides = array<i32>} : memref<2x12x120xf32, #tpu.memory_space<vmem>>, vector<1x1x120xf32>,
    %c0_60 = arith.constant 0 : index
    %c4_61 = arith.constant 4 : index
    %c0_62 = arith.constant 0 : index
    %60 = vector.load %arg14[%c0_60, %c4_61, %c0_62] : memref<2x24x120xf32, #tpu.memory_space<vmem>>, vector<1x1x120xf32>
    %61 = vector.shape_cast %60 : vector<1x1x120xf32> to vector<1x120xf32>
    %c0_63 = arith.constant 0 : index
    %c5 = arith.constant 5 : index
    %c0_64 = arith.constant 0 : index
    %62 = vector.load %arg14[%c0_63, %c5, %c0_64] : memref<2x24x120xf32, #tpu.memory_space<vmem>>, vector<1x1x120xf32>
    %63 = vector.shape_cast %62 : vector<1x1x120xf32> to vector<1x120xf32>
    %64 = arith.maximumf %61, %63 : vector<1x120xf32>
    %c0_65 = arith.constant 0 : index
    %c2_66 = arith.constant 2 : index
    %c0_67 = arith.constant 0 : index
    %65 = vector.load %arg15[%c0_65, %c2_66, %c0_67] : memref<2x12x120xf32, #tpu.memory_space<vmem>>, vector<1x1x120xf32>
    %66 = vector.shape_cast %65 : vector<1x1x120xf32> to vector<1x120xf32>
    %67 = vector.shape_cast %64 : vector<1x120xf32> to vector<1x1x120xf32>
    tpu.vector_store %arg15[%c0_65, %c2_66, %c0_67], %67 {strides = array<i32>} : memref<2x12x120xf32, #tpu.memory_space<vmem>>, vector<1x1x120xf32>,
    %c0_68 = arith.constant 0 : index
    %c6 = arith.constant 6 : index
    %c0_69 = arith.constant 0 : index
    %68 = vector.load %arg14[%c0_68, %c6, %c0_69] : memref<2x24x120xf32, #tpu.memory_space<vmem>>, vector<1x1x120xf32>
    %69 = vector.shape_cast %68 : vector<1x1x120xf32> to vector<1x120xf32>
    %c0_70 = arith.constant 0 : index
    %c7 = arith.constant 7 : index
    %c0_71 = arith.constant 0 : index
    %70 = vector.load %arg14[%c0_70, %c7, %c0_71] : memref<2x24x120xf32, #tpu.memory_space<vmem>>, vector<1x1x120xf32>
    %71 = vector.shape_cast %70 : vector<1x1x120xf32> to vector<1x120xf32>
    %72 = arith.maximumf %69, %71 : vector<1x120xf32>
    %c0_72 = arith.constant 0 : index
    %c3_73 = arith.constant 3 : index
    %c0_74 = arith.constant 0 : index
    %73 = vector.load %arg15[%c0_72, %c3_73, %c0_74] : memref<2x12x120xf32, #tpu.memory_space<vmem>>, vector<1x1x120xf32>
    %74 = vector.shape_cast %73 : vector<1x1x120xf32> to vector<1x120xf32>
    %75 = vector.shape_cast %72 : vector<1x120xf32> to vector<1x1x120xf32>
    tpu.vector_store %arg15[%c0_72, %c3_73, %c0_74], %75 {strides = array<i32>} : memref<2x12x120xf32, #tpu.memory_space<vmem>>, vector<1x1x120xf32>,
    %c0_75 = arith.constant 0 : index
    %c8 = arith.constant 8 : index
    %c0_76 = arith.constant 0 : index
    %76 = vector.load %arg14[%c0_75, %c8, %c0_76] : memref<2x24x120xf32, #tpu.memory_space<vmem>>, vector<1x1x120xf32>
    %77 = vector.shape_cast %76 : vector<1x1x120xf32> to vector<1x120xf32>
    %c0_77 = arith.constant 0 : index
    %c9 = arith.constant 9 : index
    %c0_78 = arith.constant 0 : index
    %78 = vector.load %arg14[%c0_77, %c9, %c0_78] : memref<2x24x120xf32, #tpu.memory_space<vmem>>, vector<1x1x120xf32>
    %79 = vector.shape_cast %78 : vector<1x1x120xf32> to vector<1x120xf32>
    %80 = arith.maximumf %77, %79 : vector<1x120xf32>
    %c0_79 = arith.constant 0 : index
    %c4_80 = arith.constant 4 : index
    %c0_81 = arith.constant 0 : index
    %81 = vector.load %arg15[%c0_79, %c4_80, %c0_81] : memref<2x12x120xf32, #tpu.memory_space<vmem>>, vector<1x1x120xf32>
    %82 = vector.shape_cast %81 : vector<1x1x120xf32> to vector<1x120xf32>
    %83 = vector.shape_cast %80 : vector<1x120xf32> to vector<1x1x120xf32>
    tpu.vector_store %arg15[%c0_79, %c4_80, %c0_81], %83 {strides = array<i32>} : memref<2x12x120xf32, #tpu.memory_space<vmem>>, vector<1x1x120xf32>,
    %c0_82 = arith.constant 0 : index
    %c10 = arith.constant 10 : index
    %c0_83 = arith.constant 0 : index
    %84 = vector.load %arg14[%c0_82, %c10, %c0_83] : memref<2x24x120xf32, #tpu.memory_space<vmem>>, vector<1x1x120xf32>
    %85 = vector.shape_cast %84 : vector<1x1x120xf32> to vector<1x120xf32>
    %c0_84 = arith.constant 0 : index
    %c11 = arith.constant 11 : index
    %c0_85 = arith.constant 0 : index
    %86 = vector.load %arg14[%c0_84, %c11, %c0_85] : memref<2x24x120xf32, #tpu.memory_space<vmem>>, vector<1x1x120xf32>
    %87 = vector.shape_cast %86 : vector<1x1x120xf32> to vector<1x120xf32>
    %88 = arith.maximumf %85, %87 : vector<1x120xf32>
    %c0_86 = arith.constant 0 : index
    %c5_87 = arith.constant 5 : index
    %c0_88 = arith.constant 0 : index
    %89 = vector.load %arg15[%c0_86, %c5_87, %c0_88] : memref<2x12x120xf32, #tpu.memory_space<vmem>>, vector<1x1x120xf32>
    %90 = vector.shape_cast %89 : vector<1x1x120xf32> to vector<1x120xf32>
    %91 = vector.shape_cast %88 : vector<1x120xf32> to vector<1x1x120xf32>
    tpu.vector_store %arg15[%c0_86, %c5_87, %c0_88], %91 {strides = array<i32>} : memref<2x12x120xf32, #tpu.memory_space<vmem>>, vector<1x1x120xf32>,
    %c0_89 = arith.constant 0 : index
    %c12 = arith.constant 12 : index
    %c0_90 = arith.constant 0 : index
    %92 = vector.load %arg14[%c0_89, %c12, %c0_90] : memref<2x24x120xf32, #tpu.memory_space<vmem>>, vector<1x1x120xf32>
    %93 = vector.shape_cast %92 : vector<1x1x120xf32> to vector<1x120xf32>
    %c0_91 = arith.constant 0 : index
    %c13 = arith.constant 13 : index
    %c0_92 = arith.constant 0 : index
    %94 = vector.load %arg14[%c0_91, %c13, %c0_92] : memref<2x24x120xf32, #tpu.memory_space<vmem>>, vector<1x1x120xf32>
    %95 = vector.shape_cast %94 : vector<1x1x120xf32> to vector<1x120xf32>
    %96 = arith.maximumf %93, %95 : vector<1x120xf32>
    %c0_93 = arith.constant 0 : index
    %c6_94 = arith.constant 6 : index
    %c0_95 = arith.constant 0 : index
    %97 = vector.load %arg15[%c0_93, %c6_94, %c0_95] : memref<2x12x120xf32, #tpu.memory_space<vmem>>, vector<1x1x120xf32>
    %98 = vector.shape_cast %97 : vector<1x1x120xf32> to vector<1x120xf32>
    %99 = vector.shape_cast %96 : vector<1x120xf32> to vector<1x1x120xf32>
    tpu.vector_store %arg15[%c0_93, %c6_94, %c0_95], %99 {strides = array<i32>} : memref<2x12x120xf32, #tpu.memory_space<vmem>>, vector<1x1x120xf32>,
    %c0_96 = arith.constant 0 : index
    %c14 = arith.constant 14 : index
    %c0_97 = arith.constant 0 : index
    %100 = vector.load %arg14[%c0_96, %c14, %c0_97] : memref<2x24x120xf32, #tpu.memory_space<vmem>>, vector<1x1x120xf32>
    %101 = vector.shape_cast %100 : vector<1x1x120xf32> to vector<1x120xf32>
    %c0_98 = arith.constant 0 : index
    %c15 = arith.constant 15 : index
    %c0_99 = arith.constant 0 : index
    %102 = vector.load %arg14[%c0_98, %c15, %c0_99] : memref<2x24x120xf32, #tpu.memory_space<vmem>>, vector<1x1x120xf32>
    %103 = vector.shape_cast %102 : vector<1x1x120xf32> to vector<1x120xf32>
    %104 = arith.maximumf %101, %103 : vector<1x120xf32>
    %c0_100 = arith.constant 0 : index
    %c7_101 = arith.constant 7 : index
    %c0_102 = arith.constant 0 : index
    %105 = vector.load %arg15[%c0_100, %c7_101, %c0_102] : memref<2x12x120xf32, #tpu.memory_space<vmem>>, vector<1x1x120xf32>
    %106 = vector.shape_cast %105 : vector<1x1x120xf32> to vector<1x120xf32>
    %107 = vector.shape_cast %104 : vector<1x120xf32> to vector<1x1x120xf32>
    tpu.vector_store %arg15[%c0_100, %c7_101, %c0_102], %107 {strides = array<i32>} : memref<2x12x120xf32, #tpu.memory_space<vmem>>, vector<1x1x120xf32>,
    %c0_103 = arith.constant 0 : index
    %c16 = arith.constant 16 : index
    %c0_104 = arith.constant 0 : index
    %108 = vector.load %arg14[%c0_103, %c16, %c0_104] : memref<2x24x120xf32, #tpu.memory_space<vmem>>, vector<1x1x120xf32>
    %109 = vector.shape_cast %108 : vector<1x1x120xf32> to vector<1x120xf32>
    %c0_105 = arith.constant 0 : index
    %c17 = arith.constant 17 : index
    %c0_106 = arith.constant 0 : index
    %110 = vector.load %arg14[%c0_105, %c17, %c0_106] : memref<2x24x120xf32, #tpu.memory_space<vmem>>, vector<1x1x120xf32>
    %111 = vector.shape_cast %110 : vector<1x1x120xf32> to vector<1x120xf32>
    %112 = arith.maximumf %109, %111 : vector<1x120xf32>
    %c0_107 = arith.constant 0 : index
    %c8_108 = arith.constant 8 : index
    %c0_109 = arith.constant 0 : index
    %113 = vector.load %arg15[%c0_107, %c8_108, %c0_109] : memref<2x12x120xf32, #tpu.memory_space<vmem>>, vector<1x1x120xf32>
    %114 = vector.shape_cast %113 : vector<1x1x120xf32> to vector<1x120xf32>
    %115 = vector.shape_cast %112 : vector<1x120xf32> to vector<1x1x120xf32>
    tpu.vector_store %arg15[%c0_107, %c8_108, %c0_109], %115 {strides = array<i32>} : memref<2x12x120xf32, #tpu.memory_space<vmem>>, vector<1x1x120xf32>,
    %c0_110 = arith.constant 0 : index
    %c18 = arith.constant 18 : index
    %c0_111 = arith.constant 0 : index
    %116 = vector.load %arg14[%c0_110, %c18, %c0_111] : memref<2x24x120xf32, #tpu.memory_space<vmem>>, vector<1x1x120xf32>
    %117 = vector.shape_cast %116 : vector<1x1x120xf32> to vector<1x120xf32>
    %c0_112 = arith.constant 0 : index
    %c19 = arith.constant 19 : index
    %c0_113 = arith.constant 0 : index
    %118 = vector.load %arg14[%c0_112, %c19, %c0_113] : memref<2x24x120xf32, #tpu.memory_space<vmem>>, vector<1x1x120xf32>
    %119 = vector.shape_cast %118 : vector<1x1x120xf32> to vector<1x120xf32>
    %120 = arith.maximumf %117, %119 : vector<1x120xf32>
    %c0_114 = arith.constant 0 : index
    %c9_115 = arith.constant 9 : index
    %c0_116 = arith.constant 0 : index
    %121 = vector.load %arg15[%c0_114, %c9_115, %c0_116] : memref<2x12x120xf32, #tpu.memory_space<vmem>>, vector<1x1x120xf32>
    %122 = vector.shape_cast %121 : vector<1x1x120xf32> to vector<1x120xf32>
    %123 = vector.shape_cast %120 : vector<1x120xf32> to vector<1x1x120xf32>
    tpu.vector_store %arg15[%c0_114, %c9_115, %c0_116], %123 {strides = array<i32>} : memref<2x12x120xf32, #tpu.memory_space<vmem>>, vector<1x1x120xf32>,
    %c0_117 = arith.constant 0 : index
    %c20 = arith.constant 20 : index
    %c0_118 = arith.constant 0 : index
    %124 = vector.load %arg14[%c0_117, %c20, %c0_118] : memref<2x24x120xf32, #tpu.memory_space<vmem>>, vector<1x1x120xf32>
    %125 = vector.shape_cast %124 : vector<1x1x120xf32> to vector<1x120xf32>
    %c0_119 = arith.constant 0 : index
    %c21 = arith.constant 21 : index
    %c0_120 = arith.constant 0 : index
    %126 = vector.load %arg14[%c0_119, %c21, %c0_120] : memref<2x24x120xf32, #tpu.memory_space<vmem>>, vector<1x1x120xf32>
    %127 = vector.shape_cast %126 : vector<1x1x120xf32> to vector<1x120xf32>
    %128 = arith.maximumf %125, %127 : vector<1x120xf32>
    %c0_121 = arith.constant 0 : index
    %c10_122 = arith.constant 10 : index
    %c0_123 = arith.constant 0 : index
    %129 = vector.load %arg15[%c0_121, %c10_122, %c0_123] : memref<2x12x120xf32, #tpu.memory_space<vmem>>, vector<1x1x120xf32>
    %130 = vector.shape_cast %129 : vector<1x1x120xf32> to vector<1x120xf32>
    %131 = vector.shape_cast %128 : vector<1x120xf32> to vector<1x1x120xf32>
    tpu.vector_store %arg15[%c0_121, %c10_122, %c0_123], %131 {strides = array<i32>} : memref<2x12x120xf32, #tpu.memory_space<vmem>>, vector<1x1x120xf32>,
    %c0_124 = arith.constant 0 : index
    %c22 = arith.constant 22 : index
    %c0_125 = arith.constant 0 : index
    %132 = vector.load %arg14[%c0_124, %c22, %c0_125] : memref<2x24x120xf32, #tpu.memory_space<vmem>>, vector<1x1x120xf32>
    %133 = vector.shape_cast %132 : vector<1x1x120xf32> to vector<1x120xf32>
    %c0_126 = arith.constant 0 : index
    %c23 = arith.constant 23 : index
    %c0_127 = arith.constant 0 : index
    %134 = vector.load %arg14[%c0_126, %c23, %c0_127] : memref<2x24x120xf32, #tpu.memory_space<vmem>>, vector<1x1x120xf32>
    %135 = vector.shape_cast %134 : vector<1x1x120xf32> to vector<1x120xf32>
    %136 = arith.maximumf %133, %135 : vector<1x120xf32>
    %c0_128 = arith.constant 0 : index
    %c11_129 = arith.constant 11 : index
    %c0_130 = arith.constant 0 : index
    %137 = vector.load %arg15[%c0_128, %c11_129, %c0_130] : memref<2x12x120xf32, #tpu.memory_space<vmem>>, vector<1x1x120xf32>
    %138 = vector.shape_cast %137 : vector<1x1x120xf32> to vector<1x120xf32>
    %139 = vector.shape_cast %136 : vector<1x120xf32> to vector<1x1x120xf32>
    tpu.vector_store %arg15[%c0_128, %c11_129, %c0_130], %139 {strides = array<i32>} : memref<2x12x120xf32, #tpu.memory_space<vmem>>, vector<1x1x120xf32>,
    %cst_131 = arith.constant 0.000000e+00 : f32
    %140 = vector.broadcast %cst_131 : f32 to vector<8x160xf32>
    %c0_132 = arith.constant 0 : index
    %c0_133 = arith.constant 0 : index
    %c0_134 = arith.constant 0 : index
    %141 = vector.load %arg15[%c0_132, %c0_133, %c0_134] : memref<2x12x120xf32, #tpu.memory_space<vmem>>, vector<1x8x120xf32>
    %142 = vector.shape_cast %141 : vector<1x8x120xf32> to vector<8x120xf32>
    %c0_135 = arith.constant 0 : index
    %c0_136 = arith.constant 0 : index
    %c0_137 = arith.constant 0 : index
    %143 = vector.load %arg5[%c0_135, %c0_136, %c0_137] : memref<5x120x160xf32, #tpu.memory_space<vmem>>, vector<1x120x160xf32>
    %144 = vector.shape_cast %143 : vector<1x120x160xf32> to vector<120x160xf32>
    %cst_138 = arith.constant dense<0.000000e+00> : vector<8x160xf32>
    %145 = tpu.matmul %142, %144, %cst_138 {dimension_numbers = #tpu.dot_dimension_numbers<[1], [0], [0], [1], [0, 0, 1, 1], [], []>} : vector<8x120xf32>, vector<120x160xf32>, vector<8x160xf32> -> vector<8x160xf32>
    %146 = arith.addf %140, %145 : vector<8x160xf32>
    %c0_139 = arith.constant 0 : index
    %c1_140 = arith.constant 1 : index
    %c0_141 = arith.constant 0 : index
    %147 = vector.load %arg15[%c0_139, %c1_140, %c0_141] : memref<2x12x120xf32, #tpu.memory_space<vmem>>, vector<1x8x120xf32>
    %148 = vector.shape_cast %147 : vector<1x8x120xf32> to vector<8x120xf32>
    %c1_142 = arith.constant 1 : index
    %c0_143 = arith.constant 0 : index
    %c0_144 = arith.constant 0 : index
    %149 = vector.load %arg5[%c1_142, %c0_143, %c0_144] : memref<5x120x160xf32, #tpu.memory_space<vmem>>, vector<1x120x160xf32>
    %150 = vector.shape_cast %149 : vector<1x120x160xf32> to vector<120x160xf32>
    %cst_145 = arith.constant dense<0.000000e+00> : vector<8x160xf32>
    %151 = tpu.matmul %148, %150, %cst_145 {dimension_numbers = #tpu.dot_dimension_numbers<[1], [0], [0], [1], [0, 0, 1, 1], [], []>} : vector<8x120xf32>, vector<120x160xf32>, vector<8x160xf32> -> vector<8x160xf32>
    %152 = arith.addf %146, %151 : vector<8x160xf32>
    %c0_146 = arith.constant 0 : index
    %c2_147 = arith.constant 2 : index
    %c0_148 = arith.constant 0 : index
    %153 = vector.load %arg15[%c0_146, %c2_147, %c0_148] : memref<2x12x120xf32, #tpu.memory_space<vmem>>, vector<1x8x120xf32>
    %154 = vector.shape_cast %153 : vector<1x8x120xf32> to vector<8x120xf32>
    %c2_149 = arith.constant 2 : index
    %c0_150 = arith.constant 0 : index
    %c0_151 = arith.constant 0 : index
    %155 = vector.load %arg5[%c2_149, %c0_150, %c0_151] : memref<5x120x160xf32, #tpu.memory_space<vmem>>, vector<1x120x160xf32>
    %156 = vector.shape_cast %155 : vector<1x120x160xf32> to vector<120x160xf32>
    %cst_152 = arith.constant dense<0.000000e+00> : vector<8x160xf32>
    %157 = tpu.matmul %154, %156, %cst_152 {dimension_numbers = #tpu.dot_dimension_numbers<[1], [0], [0], [1], [0, 0, 1, 1], [], []>} : vector<8x120xf32>, vector<120x160xf32>, vector<8x160xf32> -> vector<8x160xf32>
    %158 = arith.addf %152, %157 : vector<8x160xf32>
    %c0_153 = arith.constant 0 : index
    %c3_154 = arith.constant 3 : index
    %c0_155 = arith.constant 0 : index
    %159 = vector.load %arg15[%c0_153, %c3_154, %c0_155] : memref<2x12x120xf32, #tpu.memory_space<vmem>>, vector<1x8x120xf32>
    %160 = vector.shape_cast %159 : vector<1x8x120xf32> to vector<8x120xf32>
    %c3_156 = arith.constant 3 : index
    %c0_157 = arith.constant 0 : index
    %c0_158 = arith.constant 0 : index
    %161 = vector.load %arg5[%c3_156, %c0_157, %c0_158] : memref<5x120x160xf32, #tpu.memory_space<vmem>>, vector<1x120x160xf32>
    %162 = vector.shape_cast %161 : vector<1x120x160xf32> to vector<120x160xf32>
    %cst_159 = arith.constant dense<0.000000e+00> : vector<8x160xf32>
    %163 = tpu.matmul %160, %162, %cst_159 {dimension_numbers = #tpu.dot_dimension_numbers<[1], [0], [0], [1], [0, 0, 1, 1], [], []>} : vector<8x120xf32>, vector<120x160xf32>, vector<8x160xf32> -> vector<8x160xf32>
    %164 = arith.addf %158, %163 : vector<8x160xf32>
    %c0_160 = arith.constant 0 : index
    %c4_161 = arith.constant 4 : index
    %c0_162 = arith.constant 0 : index
    %165 = vector.load %arg15[%c0_160, %c4_161, %c0_162] : memref<2x12x120xf32, #tpu.memory_space<vmem>>, vector<1x8x120xf32>
    %166 = vector.shape_cast %165 : vector<1x8x120xf32> to vector<8x120xf32>
    %c4_163 = arith.constant 4 : index
    %c0_164 = arith.constant 0 : index
    %c0_165 = arith.constant 0 : index
    %167 = vector.load %arg5[%c4_163, %c0_164, %c0_165] : memref<5x120x160xf32, #tpu.memory_space<vmem>>, vector<1x120x160xf32>
    %168 = vector.shape_cast %167 : vector<1x120x160xf32> to vector<120x160xf32>
    %cst_166 = arith.constant dense<0.000000e+00> : vector<8x160xf32>
    %169 = tpu.matmul %166, %168, %cst_166 {dimension_numbers = #tpu.dot_dimension_numbers<[1], [0], [0], [1], [0, 0, 1, 1], [], []>} : vector<8x120xf32>, vector<120x160xf32>, vector<8x160xf32> -> vector<8x160xf32>
    %170 = arith.addf %164, %169 : vector<8x160xf32>
    %c0_167 = arith.constant 0 : index
    %c0_168 = arith.constant 0 : index
    %171 = vector.load %arg6[%c0_167, %c0_168] : memref<1x160xf32, #tpu.memory_space<vmem>>, vector<1x160xf32>
    %172 = vector.broadcast %171 : vector<1x160xf32> to vector<8x160xf32>
    %173 = arith.addf %170, %172 : vector<8x160xf32>
    %cst_169 = arith.constant 0.000000e+00 : f32
    %174 = vector.broadcast %cst_169 : f32 to vector<8x160xf32>
    %175 = arith.maximumf %173, %174 : vector<8x160xf32>
    %c0_170 = arith.constant 0 : index
    %c0_171 = arith.constant 0 : index
    %176 = vector.load %arg7[%c0_170, %c0_171] : memref<160x80xf32, #tpu.memory_space<vmem>>, vector<160x80xf32>
    %cst_172 = arith.constant dense<0.000000e+00> : vector<8x80xf32>
    %177 = tpu.matmul %175, %176, %cst_172 {dimension_numbers = #tpu.dot_dimension_numbers<[1], [0], [0], [1], [0, 0, 1, 1], [], []>} : vector<8x160xf32>, vector<160x80xf32>, vector<8x80xf32> -> vector<8x80xf32>
    %c0_173 = arith.constant 0 : index
    %c0_174 = arith.constant 0 : index
    %178 = vector.load %arg8[%c0_173, %c0_174] : memref<160x80xf32, #tpu.memory_space<vmem>>, vector<160x80xf32>
    %cst_175 = arith.constant dense<0.000000e+00> : vector<8x80xf32>
    %179 = tpu.matmul %175, %178, %cst_175 {dimension_numbers = #tpu.dot_dimension_numbers<[1], [0], [0], [1], [0, 0, 1, 1], [], []>} : vector<8x160xf32>, vector<160x80xf32>, vector<8x80xf32> -> vector<8x80xf32>
    %180 = arith.maximumf %177, %179 : vector<8x80xf32>
    %c0_176 = arith.constant 0 : index
    %c0_177 = arith.constant 0 : index
    %c0_178 = arith.constant 0 : index
    %181 = vector.load %arg16[%c0_176, %c0_177, %c0_178] : memref<2x8x80xf32, #tpu.memory_space<vmem>>, vector<1x8x80xf32>
    %182 = vector.shape_cast %181 : vector<1x8x80xf32> to vector<8x80xf32>
    %183 = vector.shape_cast %180 : vector<8x80xf32> to vector<1x8x80xf32>
    tpu.vector_store %arg16[%c0_176, %c0_177, %c0_178], %183 {strides = array<i32>} : memref<2x8x80xf32, #tpu.memory_space<vmem>>, vector<1x8x80xf32>,
    %cst_179 = arith.constant 0.000000e+00 : f32
    %184 = vector.broadcast %cst_179 : f32 to vector<1x50xf32>
    %c0_180 = arith.constant 0 : index
    %c0_181 = arith.constant 0 : index
    %c0_182 = arith.constant 0 : index
    %185 = vector.load %arg16[%c0_180, %c0_181, %c0_182] : memref<2x8x80xf32, #tpu.memory_space<vmem>>, vector<1x1x80xf32>
    %186 = vector.shape_cast %185 : vector<1x1x80xf32> to vector<1x80xf32>
    %c0_183 = arith.constant 0 : index
    %c1_184 = arith.constant 1 : index
    %c0_185 = arith.constant 0 : index
    %187 = vector.load %arg16[%c0_183, %c1_184, %c0_185] : memref<2x8x80xf32, #tpu.memory_space<vmem>>, vector<1x1x80xf32>
    %188 = vector.shape_cast %187 : vector<1x1x80xf32> to vector<1x80xf32>
    %189 = arith.maximumf %186, %188 : vector<1x80xf32>
    %c0_186 = arith.constant 0 : index
    %c0_187 = arith.constant 0 : index
    %c0_188 = arith.constant 0 : index
    %190 = vector.load %arg9[%c0_186, %c0_187, %c0_188] : memref<4x80x50xf32, #tpu.memory_space<vmem>>, vector<1x80x50xf32>
    %191 = vector.shape_cast %190 : vector<1x80x50xf32> to vector<80x50xf32>
    %cst_189 = arith.constant dense<0.000000e+00> : vector<1x50xf32>
    %192 = tpu.matmul %189, %191, %cst_189 {dimension_numbers = #tpu.dot_dimension_numbers<[1], [0], [0], [1], [0, 0, 1, 1], [], []>} : vector<1x80xf32>, vector<80x50xf32>, vector<1x50xf32> -> vector<1x50xf32>
    %193 = arith.addf %184, %192 : vector<1x50xf32>
    %c0_190 = arith.constant 0 : index
    %c2_191 = arith.constant 2 : index
    %c0_192 = arith.constant 0 : index
    %194 = vector.load %arg16[%c0_190, %c2_191, %c0_192] : memref<2x8x80xf32, #tpu.memory_space<vmem>>, vector<1x1x80xf32>
    %195 = vector.shape_cast %194 : vector<1x1x80xf32> to vector<1x80xf32>
    %c0_193 = arith.constant 0 : index
    %c3_194 = arith.constant 3 : index
    %c0_195 = arith.constant 0 : index
    %196 = vector.load %arg16[%c0_193, %c3_194, %c0_195] : memref<2x8x80xf32, #tpu.memory_space<vmem>>, vector<1x1x80xf32>
    %197 = vector.shape_cast %196 : vector<1x1x80xf32> to vector<1x80xf32>
    %198 = arith.maximumf %195, %197 : vector<1x80xf32>
    %c1_196 = arith.constant 1 : index
    %c0_197 = arith.constant 0 : index
    %c0_198 = arith.constant 0 : index
    %199 = vector.load %arg9[%c1_196, %c0_197, %c0_198] : memref<4x80x50xf32, #tpu.memory_space<vmem>>, vector<1x80x50xf32>
    %200 = vector.shape_cast %199 : vector<1x80x50xf32> to vector<80x50xf32>
    %cst_199 = arith.constant dense<0.000000e+00> : vector<1x50xf32>
    %201 = tpu.matmul %198, %200, %cst_199 {dimension_numbers = #tpu.dot_dimension_numbers<[1], [0], [0], [1], [0, 0, 1, 1], [], []>} : vector<1x80xf32>, vector<80x50xf32>, vector<1x50xf32> -> vector<1x50xf32>
    %202 = arith.addf %193, %201 : vector<1x50xf32>
    %c0_200 = arith.constant 0 : index
    %c4_201 = arith.constant 4 : index
    %c0_202 = arith.constant 0 : index
    %203 = vector.load %arg16[%c0_200, %c4_201, %c0_202] : memref<2x8x80xf32, #tpu.memory_space<vmem>>, vector<1x1x80xf32>
    %204 = vector.shape_cast %203 : vector<1x1x80xf32> to vector<1x80xf32>
    %c0_203 = arith.constant 0 : index
    %c5_204 = arith.constant 5 : index
    %c0_205 = arith.constant 0 : index
    %205 = vector.load %arg16[%c0_203, %c5_204, %c0_205] : memref<2x8x80xf32, #tpu.memory_space<vmem>>, vector<1x1x80xf32>
    %206 = vector.shape_cast %205 : vector<1x1x80xf32> to vector<1x80xf32>
    %207 = arith.maximumf %204, %206 : vector<1x80xf32>
    %c2_206 = arith.constant 2 : index
    %c0_207 = arith.constant 0 : index
    %c0_208 = arith.constant 0 : index
    %208 = vector.load %arg9[%c2_206, %c0_207, %c0_208] : memref<4x80x50xf32, #tpu.memory_space<vmem>>, vector<1x80x50xf32>
    %209 = vector.shape_cast %208 : vector<1x80x50xf32> to vector<80x50xf32>
    %cst_209 = arith.constant dense<0.000000e+00> : vector<1x50xf32>
    %210 = tpu.matmul %207, %209, %cst_209 {dimension_numbers = #tpu.dot_dimension_numbers<[1], [0], [0], [1], [0, 0, 1, 1], [], []>} : vector<1x80xf32>, vector<80x50xf32>, vector<1x50xf32> -> vector<1x50xf32>
    %211 = arith.addf %202, %210 : vector<1x50xf32>
    %c0_210 = arith.constant 0 : index
    %c6_211 = arith.constant 6 : index
    %c0_212 = arith.constant 0 : index
    %212 = vector.load %arg16[%c0_210, %c6_211, %c0_212] : memref<2x8x80xf32, #tpu.memory_space<vmem>>, vector<1x1x80xf32>
    %213 = vector.shape_cast %212 : vector<1x1x80xf32> to vector<1x80xf32>
    %c0_213 = arith.constant 0 : index
    %c7_214 = arith.constant 7 : index
    %c0_215 = arith.constant 0 : index
    %214 = vector.load %arg16[%c0_213, %c7_214, %c0_215] : memref<2x8x80xf32, #tpu.memory_space<vmem>>, vector<1x1x80xf32>
    %215 = vector.shape_cast %214 : vector<1x1x80xf32> to vector<1x80xf32>
    %216 = arith.maximumf %213, %215 : vector<1x80xf32>
    %c3_216 = arith.constant 3 : index
    %c0_217 = arith.constant 0 : index
    %c0_218 = arith.constant 0 : index
    %217 = vector.load %arg9[%c3_216, %c0_217, %c0_218] : memref<4x80x50xf32, #tpu.memory_space<vmem>>, vector<1x80x50xf32>
    %218 = vector.shape_cast %217 : vector<1x80x50xf32> to vector<80x50xf32>
    %cst_219 = arith.constant dense<0.000000e+00> : vector<1x50xf32>
    %219 = tpu.matmul %216, %218, %cst_219 {dimension_numbers = #tpu.dot_dimension_numbers<[1], [0], [0], [1], [0, 0, 1, 1], [], []>} : vector<1x80xf32>, vector<80x50xf32>, vector<1x50xf32> -> vector<1x50xf32>
    %220 = arith.addf %211, %219 : vector<1x50xf32>
    %c0_220 = arith.constant 0 : index
    %c0_221 = arith.constant 0 : index
    %221 = vector.load %arg10[%c0_220, %c0_221] : memref<1x50xf32, #tpu.memory_space<vmem>>, vector<1x50xf32>
    %222 = arith.addf %220, %221 : vector<1x50xf32>
    %cst_222 = arith.constant 0.000000e+00 : f32
    %223 = vector.broadcast %cst_222 : f32 to vector<1x50xf32>
    %224 = arith.maximumf %222, %223 : vector<1x50xf32>
    %c0_223 = arith.constant 0 : index
    %c0_224 = arith.constant 0 : index
    %225 = vector.load %arg11[%c0_223, %c0_224] : memref<50x10xf32, #tpu.memory_space<vmem>>, vector<50x10xf32>
    %cst_225 = arith.constant dense<0.000000e+00> : vector<1x10xf32>
    %226 = tpu.matmul %224, %225, %cst_225 {dimension_numbers = #tpu.dot_dimension_numbers<[1], [0], [0], [1], [0, 0, 1, 1], [], []>} : vector<1x50xf32>, vector<50x10xf32>, vector<1x10xf32> -> vector<1x10xf32>
    %c0_226 = arith.constant 0 : index
    %c0_227 = arith.constant 0 : index
    %227 = vector.load %arg12[%c0_226, %c0_227] : memref<1x10xf32, #tpu.memory_space<vmem>>, vector<1x10xf32>
    %228 = arith.addf %226, %227 : vector<1x10xf32>
    %c0_228 = arith.constant 0 : index
    %c0_229 = arith.constant 0 : index
    %229 = vector.load %arg13[%c0_228, %c0_229] : memref<2x10xf32, #tpu.memory_space<vmem>>, vector<1x10xf32>
    tpu.vector_store %arg13[%c0_228, %c0_229], %228 {strides = array<i32>} : memref<2x10xf32, #tpu.memory_space<vmem>>, vector<1x10xf32>,
    %cst_230 = arith.constant 0.000000e+00 : f32
    %230 = vector.broadcast %cst_230 : f32 to vector<24x240xf32>
    %c1_231 = arith.constant 1 : index
    %c0_232 = arith.constant 0 : index
    %c0_233 = arith.constant 0 : index
    %231 = vector.load %arg0[%c1_231, %c0_232, %c0_233] : memref<2x28x28xf32, #tpu.memory_space<vmem>>, vector<1x24x28xf32>
    %232 = vector.shape_cast %231 : vector<1x24x28xf32> to vector<24x28xf32>
    %c0_234 = arith.constant 0 : index
    %c0_235 = arith.constant 0 : index
    %c0_236 = arith.constant 0 : index
    %233 = vector.load %arg1[%c0_234, %c0_235, %c0_236] : memref<5x28x240xf32, #tpu.memory_space<vmem>>, vector<1x28x240xf32>
    %234 = vector.shape_cast %233 : vector<1x28x240xf32> to vector<28x240xf32>
    %cst_237 = arith.constant dense<0.000000e+00> : vector<24x240xf32>
    %235 = tpu.matmul %232, %234, %cst_237 {dimension_numbers = #tpu.dot_dimension_numbers<[1], [0], [0], [1], [0, 0, 1, 1], [], []>} : vector<24x28xf32>, vector<28x240xf32>, vector<24x240xf32> -> vector<24x240xf32>
    %236 = arith.addf %230, %235 : vector<24x240xf32>
    %c1_238 = arith.constant 1 : index
    %c1_239 = arith.constant 1 : index
    %c0_240 = arith.constant 0 : index
    %237 = vector.load %arg0[%c1_238, %c1_239, %c0_240] : memref<2x28x28xf32, #tpu.memory_space<vmem>>, vector<1x24x28xf32>
    %238 = vector.shape_cast %237 : vector<1x24x28xf32> to vector<24x28xf32>
    %c1_241 = arith.constant 1 : index
    %c0_242 = arith.constant 0 : index
    %c0_243 = arith.constant 0 : index
    %239 = vector.load %arg1[%c1_241, %c0_242, %c0_243] : memref<5x28x240xf32, #tpu.memory_space<vmem>>, vector<1x28x240xf32>
    %240 = vector.shape_cast %239 : vector<1x28x240xf32> to vector<28x240xf32>
    %cst_244 = arith.constant dense<0.000000e+00> : vector<24x240xf32>
    %241 = tpu.matmul %238, %240, %cst_244 {dimension_numbers = #tpu.dot_dimension_numbers<[1], [0], [0], [1], [0, 0, 1, 1], [], []>} : vector<24x28xf32>, vector<28x240xf32>, vector<24x240xf32> -> vector<24x240xf32>
    %242 = arith.addf %236, %241 : vector<24x240xf32>
    %c1_245 = arith.constant 1 : index
    %c2_246 = arith.constant 2 : index
    %c0_247 = arith.constant 0 : index
    %243 = vector.load %arg0[%c1_245, %c2_246, %c0_247] : memref<2x28x28xf32, #tpu.memory_space<vmem>>, vector<1x24x28xf32>
    %244 = vector.shape_cast %243 : vector<1x24x28xf32> to vector<24x28xf32>
    %c2_248 = arith.constant 2 : index
    %c0_249 = arith.constant 0 : index
    %c0_250 = arith.constant 0 : index
    %245 = vector.load %arg1[%c2_248, %c0_249, %c0_250] : memref<5x28x240xf32, #tpu.memory_space<vmem>>, vector<1x28x240xf32>
    %246 = vector.shape_cast %245 : vector<1x28x240xf32> to vector<28x240xf32>
    %cst_251 = arith.constant dense<0.000000e+00> : vector<24x240xf32>
    %247 = tpu.matmul %244, %246, %cst_251 {dimension_numbers = #tpu.dot_dimension_numbers<[1], [0], [0], [1], [0, 0, 1, 1], [], []>} : vector<24x28xf32>, vector<28x240xf32>, vector<24x240xf32> -> vector<24x240xf32>
    %248 = arith.addf %242, %247 : vector<24x240xf32>
    %c1_252 = arith.constant 1 : index
    %c3_253 = arith.constant 3 : index
    %c0_254 = arith.constant 0 : index
    %249 = vector.load %arg0[%c1_252, %c3_253, %c0_254] : memref<2x28x28xf32, #tpu.memory_space<vmem>>, vector<1x24x28xf32>
    %250 = vector.shape_cast %249 : vector<1x24x28xf32> to vector<24x28xf32>
    %c3_255 = arith.constant 3 : index
    %c0_256 = arith.constant 0 : index
    %c0_257 = arith.constant 0 : index
    %251 = vector.load %arg1[%c3_255, %c0_256, %c0_257] : memref<5x28x240xf32, #tpu.memory_space<vmem>>, vector<1x28x240xf32>
    %252 = vector.shape_cast %251 : vector<1x28x240xf32> to vector<28x240xf32>
    %cst_258 = arith.constant dense<0.000000e+00> : vector<24x240xf32>
    %253 = tpu.matmul %250, %252, %cst_258 {dimension_numbers = #tpu.dot_dimension_numbers<[1], [0], [0], [1], [0, 0, 1, 1], [], []>} : vector<24x28xf32>, vector<28x240xf32>, vector<24x240xf32> -> vector<24x240xf32>
    %254 = arith.addf %248, %253 : vector<24x240xf32>
    %c1_259 = arith.constant 1 : index
    %c4_260 = arith.constant 4 : index
    %c0_261 = arith.constant 0 : index
    %255 = vector.load %arg0[%c1_259, %c4_260, %c0_261] : memref<2x28x28xf32, #tpu.memory_space<vmem>>, vector<1x24x28xf32>
    %256 = vector.shape_cast %255 : vector<1x24x28xf32> to vector<24x28xf32>
    %c4_262 = arith.constant 4 : index
    %c0_263 = arith.constant 0 : index
    %c0_264 = arith.constant 0 : index
    %257 = vector.load %arg1[%c4_262, %c0_263, %c0_264] : memref<5x28x240xf32, #tpu.memory_space<vmem>>, vector<1x28x240xf32>
    %258 = vector.shape_cast %257 : vector<1x28x240xf32> to vector<28x240xf32>
    %cst_265 = arith.constant dense<0.000000e+00> : vector<24x240xf32>
    %259 = tpu.matmul %256, %258, %cst_265 {dimension_numbers = #tpu.dot_dimension_numbers<[1], [0], [0], [1], [0, 0, 1, 1], [], []>} : vector<24x28xf32>, vector<28x240xf32>, vector<24x240xf32> -> vector<24x240xf32>
    %260 = arith.addf %254, %259 : vector<24x240xf32>
    %c0_266 = arith.constant 0 : index
    %c0_267 = arith.constant 0 : index
    %261 = vector.load %arg2[%c0_266, %c0_267] : memref<1x240xf32, #tpu.memory_space<vmem>>, vector<1x240xf32>
    %262 = vector.broadcast %261 : vector<1x240xf32> to vector<24x240xf32>
    %263 = arith.addf %260, %262 : vector<24x240xf32>
    %cst_268 = arith.constant 0.000000e+00 : f32
    %264 = vector.broadcast %cst_268 : f32 to vector<24x240xf32>
    %265 = arith.maximumf %263, %264 : vector<24x240xf32>
    %c0_269 = arith.constant 0 : index
    %c0_270 = arith.constant 0 : index
    %266 = vector.load %arg3[%c0_269, %c0_270] : memref<240x120xf32, #tpu.memory_space<vmem>>, vector<240x120xf32>
    %cst_271 = arith.constant dense<0.000000e+00> : vector<24x120xf32>
    %267 = tpu.matmul %265, %266, %cst_271 {dimension_numbers = #tpu.dot_dimension_numbers<[1], [0], [0], [1], [0, 0, 1, 1], [], []>} : vector<24x240xf32>, vector<240x120xf32>, vector<24x120xf32> -> vector<24x120xf32>
    %c0_272 = arith.constant 0 : index
    %c0_273 = arith.constant 0 : index
    %268 = vector.load %arg4[%c0_272, %c0_273] : memref<240x120xf32, #tpu.memory_space<vmem>>, vector<240x120xf32>
    %cst_274 = arith.constant dense<0.000000e+00> : vector<24x120xf32>
    %269 = tpu.matmul %265, %268, %cst_274 {dimension_numbers = #tpu.dot_dimension_numbers<[1], [0], [0], [1], [0, 0, 1, 1], [], []>} : vector<24x240xf32>, vector<240x120xf32>, vector<24x120xf32> -> vector<24x120xf32>
    %270 = arith.maximumf %267, %269 : vector<24x120xf32>
    %c1_275 = arith.constant 1 : index
    %c0_276 = arith.constant 0 : index
    %c0_277 = arith.constant 0 : index
    %271 = vector.load %arg14[%c1_275, %c0_276, %c0_277] : memref<2x24x120xf32, #tpu.memory_space<vmem>>, vector<1x24x120xf32>
    %272 = vector.shape_cast %271 : vector<1x24x120xf32> to vector<24x120xf32>
    %273 = vector.shape_cast %270 : vector<24x120xf32> to vector<1x24x120xf32>
    tpu.vector_store %arg14[%c1_275, %c0_276, %c0_277], %273 {strides = array<i32>} : memref<2x24x120xf32, #tpu.memory_space<vmem>>, vector<1x24x120xf32>,
    %c1_278 = arith.constant 1 : index
    %c0_279 = arith.constant 0 : index
    %c0_280 = arith.constant 0 : index
    %274 = vector.load %arg14[%c1_278, %c0_279, %c0_280] : memref<2x24x120xf32, #tpu.memory_space<vmem>>, vector<1x1x120xf32>
    %275 = vector.shape_cast %274 : vector<1x1x120xf32> to vector<1x120xf32>
    %c1_281 = arith.constant 1 : index
    %c1_282 = arith.constant 1 : index
    %c0_283 = arith.constant 0 : index
    %276 = vector.load %arg14[%c1_281, %c1_282, %c0_283] : memref<2x24x120xf32, #tpu.memory_space<vmem>>, vector<1x1x120xf32>
    %277 = vector.shape_cast %276 : vector<1x1x120xf32> to vector<1x120xf32>
    %278 = arith.maximumf %275, %277 : vector<1x120xf32>
    %c1_284 = arith.constant 1 : index
    %c0_285 = arith.constant 0 : index
    %c0_286 = arith.constant 0 : index
    %279 = vector.load %arg15[%c1_284, %c0_285, %c0_286] : memref<2x12x120xf32, #tpu.memory_space<vmem>>, vector<1x1x120xf32>
    %280 = vector.shape_cast %279 : vector<1x1x120xf32> to vector<1x120xf32>
    %281 = vector.shape_cast %278 : vector<1x120xf32> to vector<1x1x120xf32>
    tpu.vector_store %arg15[%c1_284, %c0_285, %c0_286], %281 {strides = array<i32>} : memref<2x12x120xf32, #tpu.memory_space<vmem>>, vector<1x1x120xf32>,
    %c1_287 = arith.constant 1 : index
    %c2_288 = arith.constant 2 : index
    %c0_289 = arith.constant 0 : index
    %282 = vector.load %arg14[%c1_287, %c2_288, %c0_289] : memref<2x24x120xf32, #tpu.memory_space<vmem>>, vector<1x1x120xf32>
    %283 = vector.shape_cast %282 : vector<1x1x120xf32> to vector<1x120xf32>
    %c1_290 = arith.constant 1 : index
    %c3_291 = arith.constant 3 : index
    %c0_292 = arith.constant 0 : index
    %284 = vector.load %arg14[%c1_290, %c3_291, %c0_292] : memref<2x24x120xf32, #tpu.memory_space<vmem>>, vector<1x1x120xf32>
    %285 = vector.shape_cast %284 : vector<1x1x120xf32> to vector<1x120xf32>
    %286 = arith.maximumf %283, %285 : vector<1x120xf32>
    %c1_293 = arith.constant 1 : index
    %c1_294 = arith.constant 1 : index
    %c0_295 = arith.constant 0 : index
    %287 = vector.load %arg15[%c1_293, %c1_294, %c0_295] : memref<2x12x120xf32, #tpu.memory_space<vmem>>, vector<1x1x120xf32>
    %288 = vector.shape_cast %287 : vector<1x1x120xf32> to vector<1x120xf32>
    %289 = vector.shape_cast %286 : vector<1x120xf32> to vector<1x1x120xf32>
    tpu.vector_store %arg15[%c1_293, %c1_294, %c0_295], %289 {strides = array<i32>} : memref<2x12x120xf32, #tpu.memory_space<vmem>>, vector<1x1x120xf32>,
    %c1_296 = arith.constant 1 : index
    %c4_297 = arith.constant 4 : index
    %c0_298 = arith.constant 0 : index
    %290 = vector.load %arg14[%c1_296, %c4_297, %c0_298] : memref<2x24x120xf32, #tpu.memory_space<vmem>>, vector<1x1x120xf32>
    %291 = vector.shape_cast %290 : vector<1x1x120xf32> to vector<1x120xf32>
    %c1_299 = arith.constant 1 : index
    %c5_300 = arith.constant 5 : index
    %c0_301 = arith.constant 0 : index
    %292 = vector.load %arg14[%c1_299, %c5_300, %c0_301] : memref<2x24x120xf32, #tpu.memory_space<vmem>>, vector<1x1x120xf32>
    %293 = vector.shape_cast %292 : vector<1x1x120xf32> to vector<1x120xf32>
    %294 = arith.maximumf %291, %293 : vector<1x120xf32>
    %c1_302 = arith.constant 1 : index
    %c2_303 = arith.constant 2 : index
    %c0_304 = arith.constant 0 : index
    %295 = vector.load %arg15[%c1_302, %c2_303, %c0_304] : memref<2x12x120xf32, #tpu.memory_space<vmem>>, vector<1x1x120xf32>
    %296 = vector.shape_cast %295 : vector<1x1x120xf32> to vector<1x120xf32>
    %297 = vector.shape_cast %294 : vector<1x120xf32> to vector<1x1x120xf32>
    tpu.vector_store %arg15[%c1_302, %c2_303, %c0_304], %297 {strides = array<i32>} : memref<2x12x120xf32, #tpu.memory_space<vmem>>, vector<1x1x120xf32>,
    %c1_305 = arith.constant 1 : index
    %c6_306 = arith.constant 6 : index
    %c0_307 = arith.constant 0 : index
    %298 = vector.load %arg14[%c1_305, %c6_306, %c0_307] : memref<2x24x120xf32, #tpu.memory_space<vmem>>, vector<1x1x120xf32>
    %299 = vector.shape_cast %298 : vector<1x1x120xf32> to vector<1x120xf32>
    %c1_308 = arith.constant 1 : index
    %c7_309 = arith.constant 7 : index
    %c0_310 = arith.constant 0 : index
    %300 = vector.load %arg14[%c1_308, %c7_309, %c0_310] : memref<2x24x120xf32, #tpu.memory_space<vmem>>, vector<1x1x120xf32>
    %301 = vector.shape_cast %300 : vector<1x1x120xf32> to vector<1x120xf32>
    %302 = arith.maximumf %299, %301 : vector<1x120xf32>
    %c1_311 = arith.constant 1 : index
    %c3_312 = arith.constant 3 : index
    %c0_313 = arith.constant 0 : index
    %303 = vector.load %arg15[%c1_311, %c3_312, %c0_313] : memref<2x12x120xf32, #tpu.memory_space<vmem>>, vector<1x1x120xf32>
    %304 = vector.shape_cast %303 : vector<1x1x120xf32> to vector<1x120xf32>
    %305 = vector.shape_cast %302 : vector<1x120xf32> to vector<1x1x120xf32>
    tpu.vector_store %arg15[%c1_311, %c3_312, %c0_313], %305 {strides = array<i32>} : memref<2x12x120xf32, #tpu.memory_space<vmem>>, vector<1x1x120xf32>,
    %c1_314 = arith.constant 1 : index
    %c8_315 = arith.constant 8 : index
    %c0_316 = arith.constant 0 : index
    %306 = vector.load %arg14[%c1_314, %c8_315, %c0_316] : memref<2x24x120xf32, #tpu.memory_space<vmem>>, vector<1x1x120xf32>
    %307 = vector.shape_cast %306 : vector<1x1x120xf32> to vector<1x120xf32>
    %c1_317 = arith.constant 1 : index
    %c9_318 = arith.constant 9 : index
    %c0_319 = arith.constant 0 : index
    %308 = vector.load %arg14[%c1_317, %c9_318, %c0_319] : memref<2x24x120xf32, #tpu.memory_space<vmem>>, vector<1x1x120xf32>
    %309 = vector.shape_cast %308 : vector<1x1x120xf32> to vector<1x120xf32>
    %310 = arith.maximumf %307, %309 : vector<1x120xf32>
    %c1_320 = arith.constant 1 : index
    %c4_321 = arith.constant 4 : index
    %c0_322 = arith.constant 0 : index
    %311 = vector.load %arg15[%c1_320, %c4_321, %c0_322] : memref<2x12x120xf32, #tpu.memory_space<vmem>>, vector<1x1x120xf32>
    %312 = vector.shape_cast %311 : vector<1x1x120xf32> to vector<1x120xf32>
    %313 = vector.shape_cast %310 : vector<1x120xf32> to vector<1x1x120xf32>
    tpu.vector_store %arg15[%c1_320, %c4_321, %c0_322], %313 {strides = array<i32>} : memref<2x12x120xf32, #tpu.memory_space<vmem>>, vector<1x1x120xf32>,
    %c1_323 = arith.constant 1 : index
    %c10_324 = arith.constant 10 : index
    %c0_325 = arith.constant 0 : index
    %314 = vector.load %arg14[%c1_323, %c10_324, %c0_325] : memref<2x24x120xf32, #tpu.memory_space<vmem>>, vector<1x1x120xf32>
    %315 = vector.shape_cast %314 : vector<1x1x120xf32> to vector<1x120xf32>
    %c1_326 = arith.constant 1 : index
    %c11_327 = arith.constant 11 : index
    %c0_328 = arith.constant 0 : index
    %316 = vector.load %arg14[%c1_326, %c11_327, %c0_328] : memref<2x24x120xf32, #tpu.memory_space<vmem>>, vector<1x1x120xf32>
    %317 = vector.shape_cast %316 : vector<1x1x120xf32> to vector<1x120xf32>
    %318 = arith.maximumf %315, %317 : vector<1x120xf32>
    %c1_329 = arith.constant 1 : index
    %c5_330 = arith.constant 5 : index
    %c0_331 = arith.constant 0 : index
    %319 = vector.load %arg15[%c1_329, %c5_330, %c0_331] : memref<2x12x120xf32, #tpu.memory_space<vmem>>, vector<1x1x120xf32>
    %320 = vector.shape_cast %319 : vector<1x1x120xf32> to vector<1x120xf32>
    %321 = vector.shape_cast %318 : vector<1x120xf32> to vector<1x1x120xf32>
    tpu.vector_store %arg15[%c1_329, %c5_330, %c0_331], %321 {strides = array<i32>} : memref<2x12x120xf32, #tpu.memory_space<vmem>>, vector<1x1x120xf32>,
    %c1_332 = arith.constant 1 : index
    %c12_333 = arith.constant 12 : index
    %c0_334 = arith.constant 0 : index
    %322 = vector.load %arg14[%c1_332, %c12_333, %c0_334] : memref<2x24x120xf32, #tpu.memory_space<vmem>>, vector<1x1x120xf32>
    %323 = vector.shape_cast %322 : vector<1x1x120xf32> to vector<1x120xf32>
    %c1_335 = arith.constant 1 : index
    %c13_336 = arith.constant 13 : index
    %c0_337 = arith.constant 0 : index
    %324 = vector.load %arg14[%c1_335, %c13_336, %c0_337] : memref<2x24x120xf32, #tpu.memory_space<vmem>>, vector<1x1x120xf32>
    %325 = vector.shape_cast %324 : vector<1x1x120xf32> to vector<1x120xf32>
    %326 = arith.maximumf %323, %325 : vector<1x120xf32>
    %c1_338 = arith.constant 1 : index
    %c6_339 = arith.constant 6 : index
    %c0_340 = arith.constant 0 : index
    %327 = vector.load %arg15[%c1_338, %c6_339, %c0_340] : memref<2x12x120xf32, #tpu.memory_space<vmem>>, vector<1x1x120xf32>
    %328 = vector.shape_cast %327 : vector<1x1x120xf32> to vector<1x120xf32>
    %329 = vector.shape_cast %326 : vector<1x120xf32> to vector<1x1x120xf32>
    tpu.vector_store %arg15[%c1_338, %c6_339, %c0_340], %329 {strides = array<i32>} : memref<2x12x120xf32, #tpu.memory_space<vmem>>, vector<1x1x120xf32>,
    %c1_341 = arith.constant 1 : index
    %c14_342 = arith.constant 14 : index
    %c0_343 = arith.constant 0 : index
    %330 = vector.load %arg14[%c1_341, %c14_342, %c0_343] : memref<2x24x120xf32, #tpu.memory_space<vmem>>, vector<1x1x120xf32>
    %331 = vector.shape_cast %330 : vector<1x1x120xf32> to vector<1x120xf32>
    %c1_344 = arith.constant 1 : index
    %c15_345 = arith.constant 15 : index
    %c0_346 = arith.constant 0 : index
    %332 = vector.load %arg14[%c1_344, %c15_345, %c0_346] : memref<2x24x120xf32, #tpu.memory_space<vmem>>, vector<1x1x120xf32>
    %333 = vector.shape_cast %332 : vector<1x1x120xf32> to vector<1x120xf32>
    %334 = arith.maximumf %331, %333 : vector<1x120xf32>
    %c1_347 = arith.constant 1 : index
    %c7_348 = arith.constant 7 : index
    %c0_349 = arith.constant 0 : index
    %335 = vector.load %arg15[%c1_347, %c7_348, %c0_349] : memref<2x12x120xf32, #tpu.memory_space<vmem>>, vector<1x1x120xf32>
    %336 = vector.shape_cast %335 : vector<1x1x120xf32> to vector<1x120xf32>
    %337 = vector.shape_cast %334 : vector<1x120xf32> to vector<1x1x120xf32>
    tpu.vector_store %arg15[%c1_347, %c7_348, %c0_349], %337 {strides = array<i32>} : memref<2x12x120xf32, #tpu.memory_space<vmem>>, vector<1x1x120xf32>,
    %c1_350 = arith.constant 1 : index
    %c16_351 = arith.constant 16 : index
    %c0_352 = arith.constant 0 : index
    %338 = vector.load %arg14[%c1_350, %c16_351, %c0_352] : memref<2x24x120xf32, #tpu.memory_space<vmem>>, vector<1x1x120xf32>
    %339 = vector.shape_cast %338 : vector<1x1x120xf32> to vector<1x120xf32>
    %c1_353 = arith.constant 1 : index
    %c17_354 = arith.constant 17 : index
    %c0_355 = arith.constant 0 : index
    %340 = vector.load %arg14[%c1_353, %c17_354, %c0_355] : memref<2x24x120xf32, #tpu.memory_space<vmem>>, vector<1x1x120xf32>
    %341 = vector.shape_cast %340 : vector<1x1x120xf32> to vector<1x120xf32>
    %342 = arith.maximumf %339, %341 : vector<1x120xf32>
    %c1_356 = arith.constant 1 : index
    %c8_357 = arith.constant 8 : index
    %c0_358 = arith.constant 0 : index
    %343 = vector.load %arg15[%c1_356, %c8_357, %c0_358] : memref<2x12x120xf32, #tpu.memory_space<vmem>>, vector<1x1x120xf32>
    %344 = vector.shape_cast %343 : vector<1x1x120xf32> to vector<1x120xf32>
    %345 = vector.shape_cast %342 : vector<1x120xf32> to vector<1x1x120xf32>
    tpu.vector_store %arg15[%c1_356, %c8_357, %c0_358], %345 {strides = array<i32>} : memref<2x12x120xf32, #tpu.memory_space<vmem>>, vector<1x1x120xf32>,
    %c1_359 = arith.constant 1 : index
    %c18_360 = arith.constant 18 : index
    %c0_361 = arith.constant 0 : index
    %346 = vector.load %arg14[%c1_359, %c18_360, %c0_361] : memref<2x24x120xf32, #tpu.memory_space<vmem>>, vector<1x1x120xf32>
    %347 = vector.shape_cast %346 : vector<1x1x120xf32> to vector<1x120xf32>
    %c1_362 = arith.constant 1 : index
    %c19_363 = arith.constant 19 : index
    %c0_364 = arith.constant 0 : index
    %348 = vector.load %arg14[%c1_362, %c19_363, %c0_364] : memref<2x24x120xf32, #tpu.memory_space<vmem>>, vector<1x1x120xf32>
    %349 = vector.shape_cast %348 : vector<1x1x120xf32> to vector<1x120xf32>
    %350 = arith.maximumf %347, %349 : vector<1x120xf32>
    %c1_365 = arith.constant 1 : index
    %c9_366 = arith.constant 9 : index
    %c0_367 = arith.constant 0 : index
    %351 = vector.load %arg15[%c1_365, %c9_366, %c0_367] : memref<2x12x120xf32, #tpu.memory_space<vmem>>, vector<1x1x120xf32>
    %352 = vector.shape_cast %351 : vector<1x1x120xf32> to vector<1x120xf32>
    %353 = vector.shape_cast %350 : vector<1x120xf32> to vector<1x1x120xf32>
    tpu.vector_store %arg15[%c1_365, %c9_366, %c0_367], %353 {strides = array<i32>} : memref<2x12x120xf32, #tpu.memory_space<vmem>>, vector<1x1x120xf32>,
    %c1_368 = arith.constant 1 : index
    %c20_369 = arith.constant 20 : index
    %c0_370 = arith.constant 0 : index
    %354 = vector.load %arg14[%c1_368, %c20_369, %c0_370] : memref<2x24x120xf32, #tpu.memory_space<vmem>>, vector<1x1x120xf32>
    %355 = vector.shape_cast %354 : vector<1x1x120xf32> to vector<1x120xf32>
    %c1_371 = arith.constant 1 : index
    %c21_372 = arith.constant 21 : index
    %c0_373 = arith.constant 0 : index
    %356 = vector.load %arg14[%c1_371, %c21_372, %c0_373] : memref<2x24x120xf32, #tpu.memory_space<vmem>>, vector<1x1x120xf32>
    %357 = vector.shape_cast %356 : vector<1x1x120xf32> to vector<1x120xf32>
    %358 = arith.maximumf %355, %357 : vector<1x120xf32>
    %c1_374 = arith.constant 1 : index
    %c10_375 = arith.constant 10 : index
    %c0_376 = arith.constant 0 : index
    %359 = vector.load %arg15[%c1_374, %c10_375, %c0_376] : memref<2x12x120xf32, #tpu.memory_space<vmem>>, vector<1x1x120xf32>
    %360 = vector.shape_cast %359 : vector<1x1x120xf32> to vector<1x120xf32>
    %361 = vector.shape_cast %358 : vector<1x120xf32> to vector<1x1x120xf32>
    tpu.vector_store %arg15[%c1_374, %c10_375, %c0_376], %361 {strides = array<i32>} : memref<2x12x120xf32, #tpu.memory_space<vmem>>, vector<1x1x120xf32>,
    %c1_377 = arith.constant 1 : index
    %c22_378 = arith.constant 22 : index
    %c0_379 = arith.constant 0 : index
    %362 = vector.load %arg14[%c1_377, %c22_378, %c0_379] : memref<2x24x120xf32, #tpu.memory_space<vmem>>, vector<1x1x120xf32>
    %363 = vector.shape_cast %362 : vector<1x1x120xf32> to vector<1x120xf32>
    %c1_380 = arith.constant 1 : index
    %c23_381 = arith.constant 23 : index
    %c0_382 = arith.constant 0 : index
    %364 = vector.load %arg14[%c1_380, %c23_381, %c0_382] : memref<2x24x120xf32, #tpu.memory_space<vmem>>, vector<1x1x120xf32>
    %365 = vector.shape_cast %364 : vector<1x1x120xf32> to vector<1x120xf32>
    %366 = arith.maximumf %363, %365 : vector<1x120xf32>
    %c1_383 = arith.constant 1 : index
    %c11_384 = arith.constant 11 : index
    %c0_385 = arith.constant 0 : index
    %367 = vector.load %arg15[%c1_383, %c11_384, %c0_385] : memref<2x12x120xf32, #tpu.memory_space<vmem>>, vector<1x1x120xf32>
    %368 = vector.shape_cast %367 : vector<1x1x120xf32> to vector<1x120xf32>
    %369 = vector.shape_cast %366 : vector<1x120xf32> to vector<1x1x120xf32>
    tpu.vector_store %arg15[%c1_383, %c11_384, %c0_385], %369 {strides = array<i32>} : memref<2x12x120xf32, #tpu.memory_space<vmem>>, vector<1x1x120xf32>,
    %cst_386 = arith.constant 0.000000e+00 : f32
    %370 = vector.broadcast %cst_386 : f32 to vector<8x160xf32>
    %c1_387 = arith.constant 1 : index
    %c0_388 = arith.constant 0 : index
    %c0_389 = arith.constant 0 : index
    %371 = vector.load %arg15[%c1_387, %c0_388, %c0_389] : memref<2x12x120xf32, #tpu.memory_space<vmem>>, vector<1x8x120xf32>
    %372 = vector.shape_cast %371 : vector<1x8x120xf32> to vector<8x120xf32>
    %c0_390 = arith.constant 0 : index
    %c0_391 = arith.constant 0 : index
    %c0_392 = arith.constant 0 : index
    %373 = vector.load %arg5[%c0_390, %c0_391, %c0_392] : memref<5x120x160xf32, #tpu.memory_space<vmem>>, vector<1x120x160xf32>
    %374 = vector.shape_cast %373 : vector<1x120x160xf32> to vector<120x160xf32>
    %cst_393 = arith.constant dense<0.000000e+00> : vector<8x160xf32>
    %375 = tpu.matmul %372, %374, %cst_393 {dimension_numbers = #tpu.dot_dimension_numbers<[1], [0], [0], [1], [0, 0, 1, 1], [], []>} : vector<8x120xf32>, vector<120x160xf32>, vector<8x160xf32> -> vector<8x160xf32>
    %376 = arith.addf %370, %375 : vector<8x160xf32>
    %c1_394 = arith.constant 1 : index
    %c1_395 = arith.constant 1 : index
    %c0_396 = arith.constant 0 : index
    %377 = vector.load %arg15[%c1_394, %c1_395, %c0_396] : memref<2x12x120xf32, #tpu.memory_space<vmem>>, vector<1x8x120xf32>
    %378 = vector.shape_cast %377 : vector<1x8x120xf32> to vector<8x120xf32>
    %c1_397 = arith.constant 1 : index
    %c0_398 = arith.constant 0 : index
    %c0_399 = arith.constant 0 : index
    %379 = vector.load %arg5[%c1_397, %c0_398, %c0_399] : memref<5x120x160xf32, #tpu.memory_space<vmem>>, vector<1x120x160xf32>
    %380 = vector.shape_cast %379 : vector<1x120x160xf32> to vector<120x160xf32>
    %cst_400 = arith.constant dense<0.000000e+00> : vector<8x160xf32>
    %381 = tpu.matmul %378, %380, %cst_400 {dimension_numbers = #tpu.dot_dimension_numbers<[1], [0], [0], [1], [0, 0, 1, 1], [], []>} : vector<8x120xf32>, vector<120x160xf32>, vector<8x160xf32> -> vector<8x160xf32>
    %382 = arith.addf %376, %381 : vector<8x160xf32>
    %c1_401 = arith.constant 1 : index
    %c2_402 = arith.constant 2 : index
    %c0_403 = arith.constant 0 : index
    %383 = vector.load %arg15[%c1_401, %c2_402, %c0_403] : memref<2x12x120xf32, #tpu.memory_space<vmem>>, vector<1x8x120xf32>
    %384 = vector.shape_cast %383 : vector<1x8x120xf32> to vector<8x120xf32>
    %c2_404 = arith.constant 2 : index
    %c0_405 = arith.constant 0 : index
    %c0_406 = arith.constant 0 : index
    %385 = vector.load %arg5[%c2_404, %c0_405, %c0_406] : memref<5x120x160xf32, #tpu.memory_space<vmem>>, vector<1x120x160xf32>
    %386 = vector.shape_cast %385 : vector<1x120x160xf32> to vector<120x160xf32>
    %cst_407 = arith.constant dense<0.000000e+00> : vector<8x160xf32>
    %387 = tpu.matmul %384, %386, %cst_407 {dimension_numbers = #tpu.dot_dimension_numbers<[1], [0], [0], [1], [0, 0, 1, 1], [], []>} : vector<8x120xf32>, vector<120x160xf32>, vector<8x160xf32> -> vector<8x160xf32>
    %388 = arith.addf %382, %387 : vector<8x160xf32>
    %c1_408 = arith.constant 1 : index
    %c3_409 = arith.constant 3 : index
    %c0_410 = arith.constant 0 : index
    %389 = vector.load %arg15[%c1_408, %c3_409, %c0_410] : memref<2x12x120xf32, #tpu.memory_space<vmem>>, vector<1x8x120xf32>
    %390 = vector.shape_cast %389 : vector<1x8x120xf32> to vector<8x120xf32>
    %c3_411 = arith.constant 3 : index
    %c0_412 = arith.constant 0 : index
    %c0_413 = arith.constant 0 : index
    %391 = vector.load %arg5[%c3_411, %c0_412, %c0_413] : memref<5x120x160xf32, #tpu.memory_space<vmem>>, vector<1x120x160xf32>
    %392 = vector.shape_cast %391 : vector<1x120x160xf32> to vector<120x160xf32>
    %cst_414 = arith.constant dense<0.000000e+00> : vector<8x160xf32>
    %393 = tpu.matmul %390, %392, %cst_414 {dimension_numbers = #tpu.dot_dimension_numbers<[1], [0], [0], [1], [0, 0, 1, 1], [], []>} : vector<8x120xf32>, vector<120x160xf32>, vector<8x160xf32> -> vector<8x160xf32>
    %394 = arith.addf %388, %393 : vector<8x160xf32>
    %c1_415 = arith.constant 1 : index
    %c4_416 = arith.constant 4 : index
    %c0_417 = arith.constant 0 : index
    %395 = vector.load %arg15[%c1_415, %c4_416, %c0_417] : memref<2x12x120xf32, #tpu.memory_space<vmem>>, vector<1x8x120xf32>
    %396 = vector.shape_cast %395 : vector<1x8x120xf32> to vector<8x120xf32>
    %c4_418 = arith.constant 4 : index
    %c0_419 = arith.constant 0 : index
    %c0_420 = arith.constant 0 : index
    %397 = vector.load %arg5[%c4_418, %c0_419, %c0_420] : memref<5x120x160xf32, #tpu.memory_space<vmem>>, vector<1x120x160xf32>
    %398 = vector.shape_cast %397 : vector<1x120x160xf32> to vector<120x160xf32>
    %cst_421 = arith.constant dense<0.000000e+00> : vector<8x160xf32>
    %399 = tpu.matmul %396, %398, %cst_421 {dimension_numbers = #tpu.dot_dimension_numbers<[1], [0], [0], [1], [0, 0, 1, 1], [], []>} : vector<8x120xf32>, vector<120x160xf32>, vector<8x160xf32> -> vector<8x160xf32>
    %400 = arith.addf %394, %399 : vector<8x160xf32>
    %c0_422 = arith.constant 0 : index
    %c0_423 = arith.constant 0 : index
    %401 = vector.load %arg6[%c0_422, %c0_423] : memref<1x160xf32, #tpu.memory_space<vmem>>, vector<1x160xf32>
    %402 = vector.broadcast %401 : vector<1x160xf32> to vector<8x160xf32>
    %403 = arith.addf %400, %402 : vector<8x160xf32>
    %cst_424 = arith.constant 0.000000e+00 : f32
    %404 = vector.broadcast %cst_424 : f32 to vector<8x160xf32>
    %405 = arith.maximumf %403, %404 : vector<8x160xf32>
    %c0_425 = arith.constant 0 : index
    %c0_426 = arith.constant 0 : index
    %406 = vector.load %arg7[%c0_425, %c0_426] : memref<160x80xf32, #tpu.memory_space<vmem>>, vector<160x80xf32>
    %cst_427 = arith.constant dense<0.000000e+00> : vector<8x80xf32>
    %407 = tpu.matmul %405, %406, %cst_427 {dimension_numbers = #tpu.dot_dimension_numbers<[1], [0], [0], [1], [0, 0, 1, 1], [], []>} : vector<8x160xf32>, vector<160x80xf32>, vector<8x80xf32> -> vector<8x80xf32>
    %c0_428 = arith.constant 0 : index
    %c0_429 = arith.constant 0 : index
    %408 = vector.load %arg8[%c0_428, %c0_429] : memref<160x80xf32, #tpu.memory_space<vmem>>, vector<160x80xf32>
    %cst_430 = arith.constant dense<0.000000e+00> : vector<8x80xf32>
    %409 = tpu.matmul %405, %408, %cst_430 {dimension_numbers = #tpu.dot_dimension_numbers<[1], [0], [0], [1], [0, 0, 1, 1], [], []>} : vector<8x160xf32>, vector<160x80xf32>, vector<8x80xf32> -> vector<8x80xf32>
    %410 = arith.maximumf %407, %409 : vector<8x80xf32>
    %c1_431 = arith.constant 1 : index
    %c0_432 = arith.constant 0 : index
    %c0_433 = arith.constant 0 : index
    %411 = vector.load %arg16[%c1_431, %c0_432, %c0_433] : memref<2x8x80xf32, #tpu.memory_space<vmem>>, vector<1x8x80xf32>
    %412 = vector.shape_cast %411 : vector<1x8x80xf32> to vector<8x80xf32>
    %413 = vector.shape_cast %410 : vector<8x80xf32> to vector<1x8x80xf32>
    tpu.vector_store %arg16[%c1_431, %c0_432, %c0_433], %413 {strides = array<i32>} : memref<2x8x80xf32, #tpu.memory_space<vmem>>, vector<1x8x80xf32>,
    %cst_434 = arith.constant 0.000000e+00 : f32
    %414 = vector.broadcast %cst_434 : f32 to vector<1x50xf32>
    %c1_435 = arith.constant 1 : index
    %c0_436 = arith.constant 0 : index
    %c0_437 = arith.constant 0 : index
    %415 = vector.load %arg16[%c1_435, %c0_436, %c0_437] : memref<2x8x80xf32, #tpu.memory_space<vmem>>, vector<1x1x80xf32>
    %416 = vector.shape_cast %415 : vector<1x1x80xf32> to vector<1x80xf32>
    %c1_438 = arith.constant 1 : index
    %c1_439 = arith.constant 1 : index
    %c0_440 = arith.constant 0 : index
    %417 = vector.load %arg16[%c1_438, %c1_439, %c0_440] : memref<2x8x80xf32, #tpu.memory_space<vmem>>, vector<1x1x80xf32>
    %418 = vector.shape_cast %417 : vector<1x1x80xf32> to vector<1x80xf32>
    %419 = arith.maximumf %416, %418 : vector<1x80xf32>
    %c0_441 = arith.constant 0 : index
    %c0_442 = arith.constant 0 : index
    %c0_443 = arith.constant 0 : index
    %420 = vector.load %arg9[%c0_441, %c0_442, %c0_443] : memref<4x80x50xf32, #tpu.memory_space<vmem>>, vector<1x80x50xf32>
    %421 = vector.shape_cast %420 : vector<1x80x50xf32> to vector<80x50xf32>
    %cst_444 = arith.constant dense<0.000000e+00> : vector<1x50xf32>
    %422 = tpu.matmul %419, %421, %cst_444 {dimension_numbers = #tpu.dot_dimension_numbers<[1], [0], [0], [1], [0, 0, 1, 1], [], []>} : vector<1x80xf32>, vector<80x50xf32>, vector<1x50xf32> -> vector<1x50xf32>
    %423 = arith.addf %414, %422 : vector<1x50xf32>
    %c1_445 = arith.constant 1 : index
    %c2_446 = arith.constant 2 : index
    %c0_447 = arith.constant 0 : index
    %424 = vector.load %arg16[%c1_445, %c2_446, %c0_447] : memref<2x8x80xf32, #tpu.memory_space<vmem>>, vector<1x1x80xf32>
    %425 = vector.shape_cast %424 : vector<1x1x80xf32> to vector<1x80xf32>
    %c1_448 = arith.constant 1 : index
    %c3_449 = arith.constant 3 : index
    %c0_450 = arith.constant 0 : index
    %426 = vector.load %arg16[%c1_448, %c3_449, %c0_450] : memref<2x8x80xf32, #tpu.memory_space<vmem>>, vector<1x1x80xf32>
    %427 = vector.shape_cast %426 : vector<1x1x80xf32> to vector<1x80xf32>
    %428 = arith.maximumf %425, %427 : vector<1x80xf32>
    %c1_451 = arith.constant 1 : index
    %c0_452 = arith.constant 0 : index
    %c0_453 = arith.constant 0 : index
    %429 = vector.load %arg9[%c1_451, %c0_452, %c0_453] : memref<4x80x50xf32, #tpu.memory_space<vmem>>, vector<1x80x50xf32>
    %430 = vector.shape_cast %429 : vector<1x80x50xf32> to vector<80x50xf32>
    %cst_454 = arith.constant dense<0.000000e+00> : vector<1x50xf32>
    %431 = tpu.matmul %428, %430, %cst_454 {dimension_numbers = #tpu.dot_dimension_numbers<[1], [0], [0], [1], [0, 0, 1, 1], [], []>} : vector<1x80xf32>, vector<80x50xf32>, vector<1x50xf32> -> vector<1x50xf32>
    %432 = arith.addf %423, %431 : vector<1x50xf32>
    %c1_455 = arith.constant 1 : index
    %c4_456 = arith.constant 4 : index
    %c0_457 = arith.constant 0 : index
    %433 = vector.load %arg16[%c1_455, %c4_456, %c0_457] : memref<2x8x80xf32, #tpu.memory_space<vmem>>, vector<1x1x80xf32>
    %434 = vector.shape_cast %433 : vector<1x1x80xf32> to vector<1x80xf32>
    %c1_458 = arith.constant 1 : index
    %c5_459 = arith.constant 5 : index
    %c0_460 = arith.constant 0 : index
    %435 = vector.load %arg16[%c1_458, %c5_459, %c0_460] : memref<2x8x80xf32, #tpu.memory_space<vmem>>, vector<1x1x80xf32>
    %436 = vector.shape_cast %435 : vector<1x1x80xf32> to vector<1x80xf32>
    %437 = arith.maximumf %434, %436 : vector<1x80xf32>
    %c2_461 = arith.constant 2 : index
    %c0_462 = arith.constant 0 : index
    %c0_463 = arith.constant 0 : index
    %438 = vector.load %arg9[%c2_461, %c0_462, %c0_463] : memref<4x80x50xf32, #tpu.memory_space<vmem>>, vector<1x80x50xf32>
    %439 = vector.shape_cast %438 : vector<1x80x50xf32> to vector<80x50xf32>
    %cst_464 = arith.constant dense<0.000000e+00> : vector<1x50xf32>
    %440 = tpu.matmul %437, %439, %cst_464 {dimension_numbers = #tpu.dot_dimension_numbers<[1], [0], [0], [1], [0, 0, 1, 1], [], []>} : vector<1x80xf32>, vector<80x50xf32>, vector<1x50xf32> -> vector<1x50xf32>
    %441 = arith.addf %432, %440 : vector<1x50xf32>
    %c1_465 = arith.constant 1 : index
    %c6_466 = arith.constant 6 : index
    %c0_467 = arith.constant 0 : index
    %442 = vector.load %arg16[%c1_465, %c6_466, %c0_467] : memref<2x8x80xf32, #tpu.memory_space<vmem>>, vector<1x1x80xf32>
    %443 = vector.shape_cast %442 : vector<1x1x80xf32> to vector<1x80xf32>
    %c1_468 = arith.constant 1 : index
    %c7_469 = arith.constant 7 : index
    %c0_470 = arith.constant 0 : index
    %444 = vector.load %arg16[%c1_468, %c7_469, %c0_470] : memref<2x8x80xf32, #tpu.memory_space<vmem>>, vector<1x1x80xf32>
    %445 = vector.shape_cast %444 : vector<1x1x80xf32> to vector<1x80xf32>
    %446 = arith.maximumf %443, %445 : vector<1x80xf32>
    %c3_471 = arith.constant 3 : index
    %c0_472 = arith.constant 0 : index
    %c0_473 = arith.constant 0 : index
    %447 = vector.load %arg9[%c3_471, %c0_472, %c0_473] : memref<4x80x50xf32, #tpu.memory_space<vmem>>, vector<1x80x50xf32>
    %448 = vector.shape_cast %447 : vector<1x80x50xf32> to vector<80x50xf32>
    %cst_474 = arith.constant dense<0.000000e+00> : vector<1x50xf32>
    %449 = tpu.matmul %446, %448, %cst_474 {dimension_numbers = #tpu.dot_dimension_numbers<[1], [0], [0], [1], [0, 0, 1, 1], [], []>} : vector<1x80xf32>, vector<80x50xf32>, vector<1x50xf32> -> vector<1x50xf32>
    %450 = arith.addf %441, %449 : vector<1x50xf32>
    %c0_475 = arith.constant 0 : index
    %c0_476 = arith.constant 0 : index
    %451 = vector.load %arg10[%c0_475, %c0_476] : memref<1x50xf32, #tpu.memory_space<vmem>>, vector<1x50xf32>
    %452 = arith.addf %450, %451 : vector<1x50xf32>
    %cst_477 = arith.constant 0.000000e+00 : f32
    %453 = vector.broadcast %cst_477 : f32 to vector<1x50xf32>
    %454 = arith.maximumf %452, %453 : vector<1x50xf32>
    %c0_478 = arith.constant 0 : index
    %c0_479 = arith.constant 0 : index
    %455 = vector.load %arg11[%c0_478, %c0_479] : memref<50x10xf32, #tpu.memory_space<vmem>>, vector<50x10xf32>
    %cst_480 = arith.constant dense<0.000000e+00> : vector<1x10xf32>
    %456 = tpu.matmul %454, %455, %cst_480 {dimension_numbers = #tpu.dot_dimension_numbers<[1], [0], [0], [1], [0, 0, 1, 1], [], []>} : vector<1x50xf32>, vector<50x10xf32>, vector<1x10xf32> -> vector<1x10xf32>
    %c0_481 = arith.constant 0 : index
    %c0_482 = arith.constant 0 : index
    %457 = vector.load %arg12[%c0_481, %c0_482] : memref<1x10xf32, #tpu.memory_space<vmem>>, vector<1x10xf32>
    %458 = arith.addf %456, %457 : vector<1x10xf32>
    %c1_483 = arith.constant 1 : index
    %c0_484 = arith.constant 0 : index
    %459 = vector.load %arg13[%c1_483, %c0_484] : memref<2x10xf32, #tpu.memory_space<vmem>>, vector<1x10xf32>
    tpu.vector_store %arg13[%c1_483, %c0_484], %458 {strides = array<i32>} : memref<2x10xf32, #tpu.memory_space<vmem>>, vector<1x10xf32>,
    return
  }
}

</mosaic_0001>

<bundles_post_ra>
// kernel: net_forward.1
= control target key start
LH: loop header
LB: loop body
LE: loop exit
PB: predicated region body
PF: predicated region fallthrough
CT: control target
= control target key end

     0   :  { %vm78_vm0 = vcmask 1043456   ;;  %v5856_v7 = vmov 0.0   ;;  %vm5857_vm1 = vmmov 1   ;;  %v5858_v13 = vmov 0.0|0.0   ;;  %s8445_s0 = inlined_call_operand.vmem [shape: f32[2,28,28], index: 0, kind: input, shape index: {}]   ;;  %s8446_s1 = inlined_call_operand.vmem [shape: f32[5,28,240], index: 1, kind: input, shape index: {}]   ;;  %s8447_s2 = inlined_call_operand.vmem [shape: f32[1,240], index: 2, kind: input, shape index: {}]   ;;  %s8448_s3 = inlined_call_operand.vmem [shape: f32[240,120], index: 3, kind: input, shape index: {}]   ;;  %s8449_s4 = inlined_call_operand.vmem [shape: f32[240,120], index: 4, kind: input, shape index: {}]   ;;  %s8450_s5 = inlined_call_operand.vmem [shape: f32[5,120,160], index: 5, kind: input, shape index: {}]   ;;  %s8451_s6 = inlined_call_operand.vmem [shape: f32[1,160], index: 6, kind: input, shape index: {}]   ;;  %s8452_s7 = inlined_call_operand.vmem [shape: f32[160,80], index: 7, kind: input, shape index: {}]   ;;  %s8453_s8 = inlined_call_operand.vmem [shape: f32[160,80], index: 8, kind: input, shape index: {}]   ;;  %s8454_s9 = inlined_call_operand.vmem [shape: f32[4,80,50], index: 9, kind: input, shape index: {}]   ;;  %s8455_s10 = inlined_call_operand.vmem [shape: f32[1,50], index: 10, kind: input, shape index: {}]   ;;  %s8456_s11 = inlined_call_operand.vmem [shape: f32[50,10], index: 11, kind: input, shape index: {}]   ;;  %s8457_s12 = inlined_call_operand.vmem [shape: f32[1,10], index: 12, kind: input, shape index: {}]   ;;  %s8458_s13 = inlined_call_operand.hbm [shape: f32[2,10], index: 13, kind: output, shape index: {}]  }
   0x1   :  { %v4157_v0 = vld [vmem:[%s8446_s1 + $0x48] sm:$0xff]  ;;  %v4159_v1 = vld [vmem:[%s8446_s1 + $0x58] sm:$0xff]  ;;  %v4156_v2 = vld [vmem:[%s8446_s1 + $0x40] sm:$0xff]  ;;  %149 = vmatprep.mubr.f32.mxu0 %v5856_v7  ;;  %4995 = vmatprep.subr.bf16.mxu1 %v5858_v13  ;;  %vm68_vm3 = vcmask 228352  }
   0x2   :  { %v4945_v3 = vpack.c.bf16 %v4159_v1, %v4157_v0  ;;  %v4158_v4 = vld [vmem:[%s8446_s1 + $0x50] sm:$0xff]  ;;  %v4161_v5 = vld [vmem:[%s8446_s1 + $0x68] sm:$0xff]  ;;  %v4163_v6 = vld [vmem:[%s8446_s1 + $0x78] sm:$0xf] }
   0x3   :  { %v4947_v8 = vpack.c.bf16 %v4158_v4, %v4156_v2  ;;  %v4949_v9 = vpack.c.bf16 %v4163_v6, %v4161_v5  ;;  %vm5950_vm2 = vmpackc.low %vm78_vm0, %vm5857_vm1  ;;  %v4160_v11 = vld [vmem:[%s8446_s1 + $0x60] sm:$0xff]  ;;  %v4162_v12 = vld [vmem:[%s8446_s1 + $0x70] sm:$0xf] }
   0x4   :  { %4946 = vmatprep.subr.bf16.mxu0 %v4945_v3  ;;  %v49_v14 = vld [vmem:[%s8446_s1 + $0x8] sm:$0xff]  ;;  %v51_v15 = vld [vmem:[%s8446_s1 + $0x18] sm:$0xff]  ;;  %v4952_v16 = vpack.c.bf16 %v4162_v12, %v4160_v11  ;;  %v48_v18 = vld [vmem:[%s8446_s1] sm:$0xff] }
   0x5   :  { %4948 = vmatpush1.bf16.msra.mxu0 %v4947_v8  ;;  %v4955_v17 = vpack.c.bf16 %v51_v15, %v49_v14  ;;  %v50_v19 = vld [vmem:[%s8446_s1 + $0x10] sm:$0xff]  ;;  %v53_v20 = vld [vmem:[%s8446_s1 + $0x28] sm:$0xff]  ;;  %v55_v21 = vld [vmem:[%s8446_s1 + $0x38] sm:$0xf] }
   0x6   :  { %4951 = vmatprep.subr.msk.bf16.mxu0 %vm5950_vm2, %v4949_v9  ;;  %v56_v22 = vld [vmem:[%s8445_s0 + $0x1] sm:$0xff]  ;;  %v4957_v23 = vpack.c.bf16 %v50_v19, %v48_v18  ;;  %v4959_v24 = vpack.c.bf16 %v55_v21, %v53_v20  ;;  %v54_v26 = vld [vmem:[%s8446_s1 + $0x30] sm:$0xf]  ;;  %v4177_v28 = vld [vmem:[%s8446_s1 + $0x98] sm:$0xff] }
   0x7   :  { %v52_v25 = vld [vmem:[%s8446_s1 + $0x20] sm:$0xff]  ;;  %v4175_v27 = vld [vmem:[%s8446_s1 + $0x88] sm:$0xff]  ;;  %v58_v32 = vld [vmem:[%s8445_s0 + $0x11] sm:$0xff] }
   0x8   :  { %v57_v29 = vld [vmem:[%s8445_s0 + $0x9] sm:$0xff]  ;;  %v4962_v30 = vpack.c.bf16 %v54_v26, %v52_v25  ;;  %v4965_v31 = vpack.c.bf16 %v4177_v28, %v4175_v27  ;;  %v4174_v33 = vld [vmem:[%s8446_s1 + $0x80] sm:$0xff]  ;;  %v4181_v36 = vld [vmem:[%s8446_s1 + $0xb8] sm:$0xf] }
   0x9   :  { %4954 = vmatpush1.bf16.msk.msra.mxu0 %vm5950_vm2, %v4952_v16  ;;  %v4176_v34 = vld [vmem:[%s8446_s1 + $0x90] sm:$0xff]  ;;  %v4179_v35 = vld [vmem:[%s8446_s1 + $0xa8] sm:$0xff]  ;;  %v638_v37 = vld [vmem:[%s8448_s3] sm:$0xff] }
   0xa   :  { %4956 = vmatprep.subr.bf16.mxu0 %v4955_v17  ;;  %v639_v38 = vld [vmem:[%s8448_s3 + $0x8] sm:$0xff]  ;;  %v45_v39 = vld [vmem:[%s8445_s0] sm:$0xff]  ;;  %v4967_v40 = vpack.c.bf16 %v4176_v34, %v4174_v33  ;;  %v640_v42 = vld [vmem:[%s8448_s3 + $0x10] sm:$0xff]  ;;  %v4969_v44 = vpack.c.bf16 %v4181_v36, %v4179_v35 }
   0xb   :  { %v4996_v41 = vpack.c.bf16 %v639_v38, %v638_v37  ;;  %v641_v43 = vld [vmem:[%s8448_s3 + $0x18] sm:$0xff]  ;;  %v4178_v45 = vld [vmem:[%s8446_s1 + $0xa0] sm:$0xff]  ;;  %v4180_v46 = vld [vmem:[%s8446_s1 + $0xb0] sm:$0xf] }
   0xc   :  { %4166 = vmatmul.mubr.msk.f32.vlgmr.msra.gmra.mrb[0].mxu0 %vm68_vm3, %v56_v22  ;;  %v4188_v47 = vld [vmem:[%s8446_s1 + $0xc8] sm:$0xff]  ;;  %v4190_v48 = vld [vmem:[%s8446_s1 + $0xd8] sm:$0xff]  ;;  %v4999_v49 = vpack.c.bf16 %v641_v43, %v640_v42  ;;  %v642_v50 = vld [vmem:[%s8448_s3 + $0x20] sm:$0xff]  ;;  %v4972_v53 = vpack.c.bf16 %v4180_v46, %v4178_v45 }
   0xd   :  { %4958 = vmatpush1.bf16.msra.mxu0 %v4957_v23  ;;  %155 = vmatprep.mubr.f32.mxu0 %v5856_v7  ;;  %v643_v51 = vld [vmem:[%s8448_s3 + $0x28] sm:$0xff]  ;;  %v4975_v54 = vpack.c.bf16 %v4190_v48, %v4188_v47  ;;  %v644_v56 = vld [vmem:[%s8448_s3 + $0x30] sm:$0xff]  ;;  %v645_v57 = vld [vmem:[%s8448_s3 + $0x38] sm:$0xff] }
   0xe   :  { %4961 = vmatprep.subr.msk.bf16.mxu0 %vm5950_vm2, %v4959_v24  ;;  %4997 = vmatpush1.bf16.msra.mxu1 %v4996_v41  ;;  %v46_v52 = vld [vmem:[%s8445_s0 + $0x8] sm:$0xff]  ;;  %v5002_v55 = vpack.c.bf16 %v643_v51, %v642_v50  ;;  %v47_v58 = vld [vmem:[%s8445_s0 + $0x10] sm:$0xff]  ;;  %v4187_v59 = vld [vmem:[%s8446_s1 + $0xc0] sm:$0xff]  ;;  %v5005_v63 = vpack.c.bf16 %v645_v57, %v644_v56 }
   0xf   :  { %4998 = vmatprep.subr.bf16.mxu1 %v5858_v13  ;;  %v4189_v60 = vld [vmem:[%s8446_s1 + $0xd0] sm:$0xff]  ;;  %v4192_v61 = vld [vmem:[%s8446_s1 + $0xe8] sm:$0xff]  ;;  %v4194_v62 = vld [vmem:[%s8446_s1 + $0xf8] sm:$0xf] }
  0x10   :  { %4167 = vmatmul.mubr.msk.f32.gmra.mrb[2].mxu0 %vm68_vm3, %v57_v29  ;;  %v646_v0 = vld [vmem:[%s8448_s3 + $0x40] sm:$0xff]  ;;  %v647_v1 = vld [vmem:[%s8448_s3 + $0x48] sm:$0xff]  ;;  %v4977_v3 = vpack.c.bf16 %v4189_v60, %v4187_v59  ;;  %v4979_v4 = vpack.c.bf16 %v4194_v62, %v4192_v61  ;;  %v4193_v6 = vld [vmem:[%s8446_s1 + $0xf0] sm:$0xf] }
  0x11   :  { %161 = vmatprep.mubr.f32.mxu0 %v5856_v7  ;;  %4964 = vmatpush1.bf16.msk.msra.mxu0 %vm5950_vm2, %v4962_v30  ;;  %v266_v2 = vld [vmem:[%s8445_s0 + $0x2] sm:$0xff]  ;;  %v4203_v9 = vld [vmem:[%s8446_s1 + $0x118] sm:$0xff]  ;;  %v5008_v11 = vpack.c.bf16 %v647_v1, %v646_v0  ;;  %v648_v12 = vld [vmem:[%s8448_s3 + $0x50] sm:$0xff] }
  0x12   :  { %4966 = vmatprep.subr.bf16.mxu0 %v4965_v31  ;;  %5000 = vmatpush1.bf16.msra.mxu1 %v4999_v49  ;;  %v4191_v5 = vld [vmem:[%s8446_s1 + $0xe0] sm:$0xff]  ;;  %v4201_v8 = vld [vmem:[%s8446_s1 + $0x108] sm:$0xff]  ;;  %v649_v14 = vld [vmem:[%s8448_s3 + $0x58] sm:$0xff] }
  0x13   :  { %5001 = vmatprep.subr.bf16.mxu1 %v5858_v13  ;;  %v267_v15 = vld [vmem:[%s8445_s0 + $0xa] sm:$0xff]  ;;  %v4982_v16 = vpack.c.bf16 %v4193_v6, %v4191_v5 }
  0x14   :  { %4168 = vmatmul.mubr.msk.f32.gmra.mrb[4].mxu0 %vm68_vm3, %v58_v32 }
  0x15   :  { %247 = vmatprep.mubr.f32.mxu0 %v5856_v7 }
  0x16   :  { %5003 = vmatpush1.bf16.msra.mxu1 %v5002_v55 }
  0x17   :  { %5004 = vmatprep.subr.bf16.mxu1 %v5858_v13 }
  0x18   :  { %4171 = vmatmul.mubr.msk.f32.vlgmr.msra.gmra.mrb[0].mxu0 %vm68_vm3, %v45_v39 }
  0x19   :  { %4968 = vmatpush1.bf16.msra.mxu0 %v4967_v40  ;;  %253 = vmatprep.mubr.f32.mxu0 %v5856_v7 }
  0x1a   :  { %4971 = vmatprep.subr.msk.bf16.mxu0 %vm5950_vm2, %v4969_v44  ;;  %5006 = vmatpush1.bf16.msra.mxu1 %v5005_v63 }
  0x1b   :  { %5007 = vmatprep.subr.bf16.mxu1 %v5858_v13 }
  0x1c   :  { %4172 = vmatmul.mubr.msk.f32.gmra.mrb[2].mxu0 %vm68_vm3, %v46_v52 }
  0x1d   :  { %259 = vmatprep.mubr.f32.mxu0 %v5856_v7  ;;  %4974 = vmatpush1.bf16.msk.msra.mxu0 %vm5950_vm2, %v4972_v53 }
  0x1e   :  { %4976 = vmatprep.subr.bf16.mxu0 %v4975_v54 }
  0x20   :  { %4173 = vmatmul.mubr.msk.f32.gmra.mrb[4].mxu0 %vm68_vm3, %v47_v58 }
  0x21   :  { %357 = vmatprep.mubr.f32.mxu0 %v5856_v7 }
  0x24   :  { %4184 = vmatmul.mubr.msk.f32.vlgmr.msra.gmra.mrb[0].mxu0 %vm68_vm3, %v266_v2 }
  0x25   :  { %4978 = vmatpush1.bf16.msra.mxu0 %v4977_v3  ;;  %363 = vmatprep.mubr.f32.mxu0 %v5856_v7 }
  0x26   :  { %18 = vsyncpa [#allocation6], 0  ;;  %4981 = vmatprep.subr.msk.bf16.mxu0 %vm5950_vm2, %v4979_v4  ;;  %v4985_v17 = vpack.c.bf16 %v4203_v9, %v4201_v8  ;;  %5009 = vmatpush1.bf16.msra.mxu1 %v5008_v11  ;;  %v5011_v18 = vpack.c.bf16 %v649_v14, %v648_v12  ;;  %v650_v19 = vld [vmem:[%s8448_s3 + $0x60] sm:$0xff]  ;;  %v651_v20 = vld [vmem:[%s8448_s3 + $0x68] sm:$0xff]  ;;  %vm668_vm4 = vcmask 916480   ;;  %vm871_vm5 = vcmask 982016  }
  0x27   :  { %5010 = vmatprep.subr.bf16.mxu1 %v5858_v13  ;;  %v268_v21 = vld [vmem:[%s8445_s0 + $0x12] sm:$0xff]  ;;  %v4200_v22 = vld [vmem:[%s8446_s1 + $0x100] sm:$0xff]  ;;  %v4205_v24 = vld [vmem:[%s8446_s1 + $0x128] sm:$0xff]  ;;  %v5014_v26 = vpack.c.bf16 %v651_v20, %v650_v19  ;;  %vm878_vm6 = vcmask 974848   ;;  %vm1495_vm7 = vcmask 261120   ;;  %vm5859_vm8 = vmmov 0  }
  0x28   :  { %4185 = vmatmul.mubr.msk.f32.gmra.mrb[2].mxu0 %vm68_vm3, %v267_v15  ;;  %v4202_v23 = vld [vmem:[%s8446_s1 + $0x110] sm:$0xff]  ;;  %v4207_v25 = vld [vmem:[%s8446_s1 + $0x138] sm:$0xf]  ;;  %v382_v29 = vld [vmem:[%s8445_s0 + $0x3] sm:$0xff]  ;;  %vm1660_vm9 = vcmask 654336   ;;  %vm2026_vm10 = vcmask 1041408  }
  0x29   :  { %369 = vmatprep.mubr.f32.mxu0 %v5856_v7  ;;  %4984 = vmatpush1.bf16.msk.msra.mxu0 %vm5950_vm2, %v4982_v16  ;;  %v652_v27 = vld [vmem:[%s8448_s3 + $0x70] sm:$0xff]  ;;  %v653_v28 = vld [vmem:[%s8448_s3 + $0x78] sm:$0xff]  ;;  %v4987_v30 = vpack.c.bf16 %v4202_v23, %v4200_v22  ;;  %v4989_v31 = vpack.c.bf16 %v4207_v25, %v4205_v24  ;;  %v4204_v32 = vld [vmem:[%s8446_s1 + $0x120] sm:$0xff]  ;;  %vm2022_vm11 = vcmask 408576   ;;  %vm2100_vm12 = vcmask 73728   ;;  %s5860_s15 = smov [#allocation5]  }
  0x2a   :  { %4986 = vmatprep.subr.bf16.mxu0 %v4985_v17  ;;  %5012 = vmatpush1.bf16.msra.mxu1 %v5011_v18  ;;  %v4206_v33 = vld [vmem:[%s8446_s1 + $0x130] sm:$0xf]  ;;  %v5017_v34 = vpack.c.bf16 %v653_v28, %v652_v27  ;;  %v654_v35 = vld [vmem:[%s8448_s3 + $0x80] sm:$0xff]  ;;  %v655_v36 = vld [vmem:[%s8448_s3 + $0x88] sm:$0xff]  ;;  %s4148_s16 = sshll.u32 %s5860_s15, 4  ;;  %s4149_s16 = int_to_ptr.vmem [resolvable:$true] %s4148_s16 }
  0x2b   :  { %5013 = vmatprep.subr.bf16.mxu1 %v5858_v13  ;;  %v383_v37 = vld [vmem:[%s8445_s0 + $0xb] sm:$0xff]  ;;  %v4992_v38 = vpack.c.bf16 %v4206_v33, %v4204_v32  ;;  %v5020_v39 = vpack.c.bf16 %v655_v36, %v654_v35  ;;  %v657_v41 = vld [vmem:[%s8448_s3 + $0x98] sm:$0xff]  ;;  %v758_v43 = vld [vmem:[%s8449_s4] sm:$0xff]  ;;  %s5832_s17 = scalar_lea.vmem %s4149_s16, 32  ;;  %p5837_p1 = scmp.lt.s32.totalorder %s4149_s16, %s4149_s16 }
  0x2c   :  { %4186 = vmatmul.mubr.msk.f32.gmra.mrb[4].mxu0 %vm68_vm3, %v268_v21  ;;  %v656_v40 = vld [vmem:[%s8448_s3 + $0x90] sm:$0xff]  ;;  %v759_v44 = vld [vmem:[%s8449_s4 + $0x8] sm:$0xff]  ;;  %v658_v46 = vld [vmem:[%s8448_s3 + $0xa0] sm:$0xff]  ;;  %p5833_p0 = scmp.ne.s32.totalorder %s4149_s16, %s5832_s17  ;;  %p5838_p2 = scmp.lt.s32.totalorder %s5832_s17, %s5832_s17 }
  0x2d   :  { %473 = vmatprep.mubr.f32.mxu0 %v5856_v7  ;;  %v384_v42 = vld [vmem:[%s8445_s0 + $0x13] sm:$0xff]  ;;  %v5023_v45 = vpack.c.bf16 %v657_v41, %v656_v40  ;;  %v659_v47 = vld [vmem:[%s8448_s3 + $0xa8] sm:$0xff]  ;;  %v5041_v49 = vpack.c.bf16 %v759_v44, %v758_v43  ;;  %v762_v57 = vld [vmem:[%s8449_s4 + $0x20] sm:$0xff] }
  0x2e   :  { %5015 = vmatpush1.bf16.msra.mxu1 %v5014_v26  ;;  %v498_v48 = vld [vmem:[%s8445_s0 + $0x4] sm:$0xff]  ;;  %v760_v50 = vld [vmem:[%s8449_s4 + $0x10] sm:$0xff]  ;;  %v761_v51 = vld [vmem:[%s8449_s4 + $0x18] sm:$0xff]  ;;  %v5026_v52 = vpack.c.bf16 %v659_v47, %v658_v46  ;;  %p5839_p3 = por %p5838_p2, %p5837_p1 }
  0x2f   :  { %5016 = vmatprep.subr.bf16.mxu1 %v5858_v13  ;;  %v660_v53 = vld [vmem:[%s8448_s3 + $0xb0] sm:$0xff]  ;;  %v661_v54 = vld [vmem:[%s8448_s3 + $0xb8] sm:$0xff]  ;;  %v5044_v56 = vpack.c.bf16 %v761_v51, %v760_v50  ;;  %v763_v58 = vld [vmem:[%s8449_s4 + $0x28] sm:$0xff] }
  0x30   :  { %4197 = vmatmul.mubr.msk.f32.vlgmr.msra.gmra.mrb[0].mxu0 %vm68_vm3, %v382_v29  ;;  %v499_v55 = vld [vmem:[%s8445_s0 + $0xc] sm:$0xff]  ;;  %v5029_v59 = vpack.c.bf16 %v661_v54, %v660_v53  ;;  %v662_v60 = vld [vmem:[%s8448_s3 + $0xc0] sm:$0xff]  ;;  %v500_v62 = vld [vmem:[%s8445_s0 + $0x14] sm:$0xff]  ;;  %v5047_v63 = vpack.c.bf16 %v763_v58, %v762_v57  ;;  %p5840_p4 = pnand %p5839_p3, %p5833_p0 }
  0x31   :  { %4988 = vmatpush1.bf16.msra.mxu0 %v4987_v30  ;;  %479 = vmatprep.mubr.f32.mxu0 %v5856_v7  ;;  %v663_v61 = vld [vmem:[%s8448_s3 + $0xc8] sm:$0xff]  ;;  %v764_v0 = vld [vmem:[%s8449_s4 + $0x30] sm:$0xff]  ;;  %v765_v1 = vld [vmem:[%s8449_s4 + $0x38] sm:$0xff] }
  0x32   :  { %4991 = vmatprep.subr.msk.bf16.mxu0 %vm5950_vm2, %v4989_v31  ;;  %5018 = vmatpush1.bf16.msra.mxu1 %v5017_v34  ;;  %v5032_v2 = vpack.c.bf16 %v663_v61, %v662_v60  ;;  %v5050_v3 = vpack.c.bf16 %v765_v1, %v764_v0  ;;  %v766_v4 = vld [vmem:[%s8449_s4 + $0x40] sm:$0xff]  ;;  %v767_v5 = vld [vmem:[%s8449_s4 + $0x48] sm:$0xff]  ;;  %v768_v8 = vld [vmem:[%s8449_s4 + $0x50] sm:$0xff] }
  0x33   :  { %5019 = vmatprep.subr.bf16.mxu1 %v5858_v13  ;;  %v5053_v6 = vpack.c.bf16 %v767_v5, %v766_v4  ;;  %v769_v9 = vld [vmem:[%s8449_s4 + $0x58] sm:$0xff]  ;;  %v770_v12 = vld [vmem:[%s8449_s4 + $0x60] sm:$0xff]  ;;  %v771_v14 = vld [vmem:[%s8449_s4 + $0x68] sm:$0xff] }
  0x34   :  { %4198 = vmatmul.mubr.msk.f32.gmra.mrb[2].mxu0 %vm68_vm3, %v383_v37  ;;  %v5056_v11 = vpack.c.bf16 %v769_v9, %v768_v8  ;;  %v5059_v15 = vpack.c.bf16 %v771_v14, %v770_v12  ;;  %v772_v16 = vld [vmem:[%s8449_s4 + $0x70] sm:$0xff]  ;;  %v773_v17 = vld [vmem:[%s8449_s4 + $0x78] sm:$0xff]  ;;  %v774_v19 = vld [vmem:[%s8449_s4 + $0x80] sm:$0xff] }
  0x35   :  { %485 = vmatprep.mubr.f32.mxu0 %v5856_v7  ;;  %4994 = vmatpush1.bf16.msk.msra.mxu0 %vm5950_vm2, %v4992_v38  ;;  %v5062_v18 = vpack.c.bf16 %v773_v17, %v772_v16  ;;  %v775_v20 = vld [vmem:[%s8449_s4 + $0x88] sm:$0xff]  ;;  %v776_v22 = vld [vmem:[%s8449_s4 + $0x90] sm:$0xff]  ;;  %v777_v23 = vld [vmem:[%s8449_s4 + $0x98] sm:$0xff] }
  0x36   :  { %5040 = vmatprep.subr.bf16.mxu0 %v5858_v13  ;;  %5021 = vmatpush1.bf16.msra.mxu1 %v5020_v39  ;;  %v5065_v21 = vpack.c.bf16 %v775_v20, %v774_v19  ;;  %v5068_v24 = vpack.c.bf16 %v777_v23, %v776_v22  ;;  %v778_v25 = vld [vmem:[%s8449_s4 + $0xa0] sm:$0xff]  ;;  %v779_v26 = vld [vmem:[%s8449_s4 + $0xa8] sm:$0xff]  ;;  %v780_v28 = vld [vmem:[%s8449_s4 + $0xb0] sm:$0xff] }
  0x37   :  { %5022 = vmatprep.subr.bf16.mxu1 %v5858_v13  ;;  %v5071_v27 = vpack.c.bf16 %v779_v26, %v778_v25  ;;  %v781_v29 = vld [vmem:[%s8449_s4 + $0xb8] sm:$0xff]  ;;  %v782_v31 = vld [vmem:[%s8449_s4 + $0xc0] sm:$0xff]  ;;  %v783_v32 = vld [vmem:[%s8449_s4 + $0xc8] sm:$0xff] }
  0x38   :  { %4199 = vmatmul.mubr.msk.f32.gmra.mrb[4].mxu0 %vm68_vm3, %v384_v42  ;;  %v5074_v30 = vpack.c.bf16 %v781_v29, %v780_v28  ;;  %v5077_v33 = vpack.c.bf16 %v783_v32, %v782_v31  ;;  %v664_v34 = vld [vmem:[%s8448_s3 + $0xd0] sm:$0xff]  ;;  %v665_v35 = vld [vmem:[%s8448_s3 + $0xd8] sm:$0xff]  ;;  %v666_v40 = vld [vmem:[%s8448_s3 + $0xe0] sm:$0xff] }
  0x39   :  { %589 = vmatprep.mubr.f32.mxu0 %v5856_v7  ;;  %v784_v36 = vld [vmem:[%s8449_s4 + $0xd0] sm:$0xff]  ;;  %v5035_v37 = vpack.c.bf16 %v665_v35, %v664_v34  ;;  %v785_v38 = vld [vmem:[%s8449_s4 + $0xd8] sm:$0xff]  ;;  %v667_v41 = vld [vmem:[%s8448_s3 + $0xe8] sm:$0xff] }
  0x3a   :  { %5024 = vmatpush1.bf16.msra.mxu1 %v5023_v45  ;;  %v5080_v39 = vpack.c.bf16 %v785_v38, %v784_v36  ;;  %v786_v42 = vld [vmem:[%s8449_s4 + $0xe0] sm:$0xff]  ;;  %v5038_v43 = vpack.c.bf16 %v667_v41, %v666_v40  ;;  %v787_v44 = vld [vmem:[%s8449_s4 + $0xe8] sm:$0xff]  ;;  %v4220_v46 = vld [vmem:[%s8450_s5 + $0xf8] sm:$0xff] }
  0x3b   :  { %5025 = vmatprep.subr.bf16.mxu1 %v5858_v13  ;;  %v5083_v45 = vpack.c.bf16 %v787_v44, %v786_v42  ;;  %v4222_v47 = vld [vmem:[%s8450_s5 + $0x108] sm:$0xff]  ;;  %v4221_v60 = vld [vmem:[%s8450_s5 + $0x100] sm:$0xff]  ;;  %v4224_v16 = vld [vmem:[%s8450_s5 + $0x118] sm:$0xff] }
  0x3c   :  { %4210 = vmatmul.mubr.msk.f32.vlgmr.msra.gmra.mrb[0].mxu0 %vm68_vm3, %v498_v48  ;;  %v5085_v48 = vpack.c.bf16 %v4222_v47, %v4220_v46  ;;  %v4226_v17 = vld [vmem:[%s8450_s5 + $0x128] sm:$0xff]  ;;  %v4223_v19 = vld [vmem:[%s8450_s5 + $0x110] sm:$0xff]  ;;  %v4225_v20 = vld [vmem:[%s8450_s5 + $0x120] sm:$0xff] }
  0x3d   :  { %595 = vmatprep.mubr.f32.mxu0 %v5856_v7  ;;  %5042 = vmatpush1.bf16.msra.mxu0 %v5041_v49  ;;  %v616_v49 = vlaneseq  ;;  %v4228_v22 = vld [vmem:[%s8450_s5 + $0x138] sm:$0xff]  ;;  %v4230_v23 = vld [vmem:[%s8450_s5 + $0x148] sm:$0xff]  ;;  %v4227_v25 = vld [vmem:[%s8450_s5 + $0x130] sm:$0xff] }
  0x3e   :  { %5043 = vmatprep.subr.bf16.mxu0 %v5858_v13  ;;  %5027 = vmatpush1.bf16.msra.mxu1 %v5026_v52  ;;  %v614_v52 = vld [vmem:[%s8447_s2] sm:$0x3]  ;;  %v4232_v28 = vld [vmem:[%s8450_s5 + $0x158] sm:$0xff]  ;;  %v4234_v29 = vld [vmem:[%s8450_s5 + $0x168] sm:$0xff] }
  0x3f   :  { %5028 = vmatprep.subr.bf16.mxu1 %v5858_v13  ;;  %v617_v50 = vshrl.u32 %v616_v49, 7  ;;  %v4229_v26 = vld [vmem:[%s8450_s5 + $0x140] sm:$0xff]  ;;  %v4231_v31 = vld [vmem:[%s8450_s5 + $0x150] sm:$0xff]  ;;  %v4236_v34 = vld [vmem:[%s8450_s5 + $0x178] sm:$0xff] }
  0x40   :  { %4211 = vmatmul.mubr.msk.f32.gmra.mrb[2].mxu0 %vm68_vm3, %v499_v55  ;;  %v4233_v32 = vld [vmem:[%s8450_s5 + $0x160] sm:$0xff]  ;;  %v4238_v35 = vld [vmem:[%s8450_s5 + $0x188] sm:$0xff]  ;;  %v4240_v40 = vld [vmem:[%s8450_s5 + $0x198] sm:$0xff] }
  0x41   :  { %601 = vmatprep.mubr.f32.mxu0 %v5856_v7  ;;  %5045 = vmatpush1.bf16.msra.mxu0 %v5044_v56  ;;  %v6367_v51 = vsub.s32 0, %v617_v50  ;;  %v6372_v53 = vsub.s32 1, %v617_v50  ;;  %v5101_v36 = vpack.c.bf16 %v4238_v35, %v4236_v34  ;;  %v4237_v38 = vld [vmem:[%s8450_s5 + $0x180] sm:$0xff]  ;;  %v4242_v41 = vld [vmem:[%s8450_s5 + $0x1a8] sm:$0xff]  ;;  %v4244_v46 = vld [vmem:[%s8450_s5 + $0x1b8] sm:$0xff] }
  0x42   :  { %5046 = vmatprep.subr.bf16.mxu0 %v5858_v13  ;;  %5030 = vmatpush1.bf16.msra.mxu1 %v5029_v59  ;;  %v4219_v59 = vld [vmem:[%s8450_s5 + $0xf0] sm:$0xff]  ;;  %v5105_v42 = vpack.c.bf16 %v4242_v41, %v4240_v40  ;;  %v4241_v44 = vld [vmem:[%s8450_s5 + $0x1a0] sm:$0xff]  ;;  %v4246_v47 = vld [vmem:[%s8450_s5 + $0x1c8] sm:$0xff] }
  0x43   :  { %5031 = vmatprep.subr.bf16.mxu1 %v5858_v13  ;;  %v619_v54 = vrot.slane %v614_v52, %v6367_v51  ;;  %v623_v55 = vrot.slane %v614_v52, %v6372_v53  ;;  %v5087_v0 = vpack.c.bf16 %v4221_v60, %v4219_v59  ;;  %v4243_v49 = vld [vmem:[%s8450_s5 + $0x1b0] sm:$0xff]  ;;  %v4245_v50 = vld [vmem:[%s8450_s5 + $0x1c0] sm:$0xff] }
  0x44   :  { %4212 = vmatmul.mubr.msk.f32.gmra.mrb[4].mxu0 %vm68_vm3, %v500_v62  ;;  %v5111_v52 = vpack.c.bf16 %v4245_v50, %v4243_v49  ;;  %v1475_v49 = vld [vmem:[%s8452_s7] sm:$0xff]  ;;  %v1476_v50 = vld [vmem:[%s8452_s7 + $0x8] sm:$0xff] }
  0x45   :  { %5048 = vmatpush1.bf16.msra.mxu0 %v5047_v63  ;;  %v4439_v10 = vld [vmem:[%s8445_s0 + $0x2c] sm:$0xff] }
  0x46   :  { %5049 = vmatprep.subr.bf16.mxu0 %v5858_v13  ;;  %5033 = vmatpush1.bf16.msra.mxu1 %v5032_v2 }
  0x47   :  { %5034 = vmatprep.subr.bf16.mxu1 %v5858_v13 }
  0x49   :  { %5051 = vmatpush1.bf16.msra.mxu0 %v5050_v3 }
  0x4a   :  { %5052 = vmatprep.subr.bf16.mxu0 %v5858_v13  ;;  %5036 = vmatpush1.bf16.msra.mxu1 %v5035_v37  ;;  %v4235_v37 = vld [vmem:[%s8450_s5 + $0x170] sm:$0xff] }
  0x4b   :  { %5037 = vmatprep.subr.bf16.mxu1 %v5858_v13 }
  0x4d   :  { %5054 = vmatpush1.bf16.msra.mxu0 %v5053_v6 }
  0x4e   :  { %5055 = vmatprep.subr.bf16.mxu0 %v5858_v13  ;;  %5039 = vmatpush1.bf16.msra.mxu1 %v5038_v43  ;;  %v4239_v43 = vld [vmem:[%s8450_s5 + $0x190] sm:$0xff] }
  0x4f   :  { %5086 = vmatprep.subr.bf16.mxu1 %v5085_v48  ;;  %v5109_v48 = vpack.c.bf16 %v4246_v47, %v4244_v46 }
  0x51   :  { %5057 = vmatpush1.bf16.msra.mxu0 %v5056_v11 }
  0x52   :  { %5058 = vmatprep.subr.bf16.mxu0 %v5858_v13 }
  0x55   :  { %5060 = vmatpush1.bf16.msra.mxu0 %v5059_v15 }
  0x56   :  { %5061 = vmatprep.subr.bf16.mxu0 %v5858_v13 }
  0x59   :  { %5063 = vmatpush1.bf16.msra.mxu0 %v5062_v18  ;;  %v5089_v18 = vpack.c.bf16 %v4226_v17, %v4224_v16 }
  0x5a   :  { %5064 = vmatprep.subr.bf16.mxu0 %v5858_v13 }
  0x5d   :  { %5066 = vmatpush1.bf16.msra.mxu0 %v5065_v21  ;;  %v5091_v21 = vpack.c.bf16 %v4225_v20, %v4223_v19 }
  0x5e   :  { %5067 = vmatprep.subr.bf16.mxu0 %v5858_v13 }
  0x61   :  { %5069 = vmatpush1.bf16.msra.mxu0 %v5068_v24  ;;  %v5093_v24 = vpack.c.bf16 %v4230_v23, %v4228_v22 }
  0x62   :  { %5070 = vmatprep.subr.bf16.mxu0 %v5858_v13 }
  0x65   :  { %5072 = vmatpush1.bf16.msra.mxu0 %v5071_v27  ;;  %v5095_v27 = vpack.c.bf16 %v4229_v26, %v4227_v25 }
  0x66   :  { %5073 = vmatprep.subr.bf16.mxu0 %v5858_v13 }
  0x69   :  { %5075 = vmatpush1.bf16.msra.mxu0 %v5074_v30  ;;  %v5097_v30 = vpack.c.bf16 %v4234_v29, %v4232_v28 }
  0x6a   :  { %5076 = vmatprep.subr.bf16.mxu0 %v5858_v13 }
  0x6d   :  { %5078 = vmatpush1.bf16.msra.mxu0 %v5077_v33  ;;  %v5099_v33 = vpack.c.bf16 %v4233_v32, %v4231_v31 }
  0x6e   :  { %5079 = vmatprep.subr.bf16.mxu0 %v5858_v13 }
  0x71   :  { %5081 = vmatpush1.bf16.msra.mxu0 %v5080_v39  ;;  %v5103_v39 = vpack.c.bf16 %v4237_v38, %v4235_v37 }
  0x72   :  { %5082 = vmatprep.subr.bf16.mxu0 %v5858_v13 }
  0x75   :  { %5084 = vmatpush1.bf16.msra.mxu0 %v5083_v45  ;;  %v5107_v45 = vpack.c.bf16 %v4241_v44, %v4239_v43 }
  0x76   :  { %5225 = vmatprep.subr.bf16.mxu0 %v5858_v13 }
 0x10f   :  { %v591_v56 = vpop.f32.mrb[0].mxu0 }
 0x110   :  { %v626_v57 = vadd.f32 %v619_v54, %v591_v56  ;;  %v593_v58 = vpop.f32.mrb[1].mxu0  ;;  %v928_v56 = vld [vmem:[%s8450_s5 + $0x18] sm:$0xff] }
 0x111   :  { %v627_v61 = vadd.f32 %v623_v55, %v593_v58 }
 0x112   :  { %v632_v1 = vmax.f32 %v626_v57, 0.0  ;;  %v4247_v57 = vld [vmem:[%s8450_s5 + $0x1d0] sm:$0xff] }
 0x113   :  { %v633_v62 = vmax.f32 %v627_v61, 0.0  ;;  %v597_v63 = vpop.f32.mrb[2].mxu0 }
 0x114   :  { %v628_v2 = vadd.f32 %v619_v54, %v597_v63  ;;  %v599_v3 = vpop.f32.mrb[3].mxu0 }
 0x115   :  { %v629_v4 = vadd.f32 %v623_v55, %v599_v3  ;;  %4213 = vmatprep.mubr.msk.f32.mxu1 %vm668_vm4, %v633_v62  ;;  %4216 = vmatprep.mubr.msk.f32.mxu0 %vm668_vm4, %v633_v62 }
 0x116   :  { %743 = vmatmul.mubr.f32.vlgmr.msra.gmra.mrb[0].mxu1 %v632_v1  ;;  %853 = vmatmul.mubr.f32.vlgmr.msra.gmra.mrb[6].mxu0 %v632_v1  ;;  %v634_v8 = vmax.f32 %v628_v2, 0.0 }
 0x117   :  { %v635_v5 = vmax.f32 %v629_v4, 0.0  ;;  %v603_v6 = vpop.f32.mrb[4].mxu0  ;;  %5088 = vmatpush1.bf16.msra.mxu1 %v5087_v0 }
 0x118   :  { %v630_v9 = vadd.f32 %v619_v54, %v603_v6  ;;  %v605_v11 = vpop.f32.mrb[5].mxu0  ;;  %5090 = vmatprep.subr.bf16.mxu1 %v5089_v18  ;;  %v4248_v54 = vld [vmem:[%s8450_s5 + $0x1d8] sm:$0xff] }
 0x119   :  { %v631_v12 = vadd.f32 %v623_v55, %v605_v11  ;;  %4214 = vmatprep.mubr.msk.f32.mxu1 %vm668_vm4, %v635_v5  ;;  %4217 = vmatprep.mubr.msk.f32.mxu0 %vm668_vm4, %v635_v5  ;;  %v926_v55 = vld [vmem:[%s8450_s5 + $0x8] sm:$0xff] }
 0x11a   :  { %748 = vmatmul.mubr.f32.gmra.mrb[2].mxu1 %v634_v8  ;;  %858 = vmatmul.mubr.f32.gmra.mrb[8].mxu0 %v634_v8  ;;  %v636_v15 = vmax.f32 %v630_v9, 0.0  ;;  %v5113_v58 = vpack.c.bf16 %v928_v56, %v926_v55  ;;  %v1478_v55 = vld [vmem:[%s8452_s7 + $0x18] sm:$0xff]  ;;  %v925_v56 = vld [vmem:[%s8450_s5] sm:$0xff] }
 0x11b   :  { %v637_v14 = vmax.f32 %v631_v12, 0.0  ;;  %5092 = vmatpush1.bf16.msra.mxu1 %v5091_v21 }
 0x11c   :  { %5094 = vmatprep.subr.bf16.mxu1 %v5093_v24 }
 0x11d   :  { %4215 = vmatprep.mubr.msk.f32.mxu1 %vm668_vm4, %v637_v14  ;;  %4218 = vmatprep.mubr.msk.f32.mxu0 %vm668_vm4, %v637_v14 }
 0x11e   :  { %753 = vmatmul.mubr.f32.gmra.mrb[4].mxu1 %v636_v15  ;;  %863 = vmatmul.mubr.f32.gmra.mrb[10].mxu0 %v636_v15 }
 0x11f   :  { %1054 = vmatprep.mubr.f32.mxu1 %v5856_v7  ;;  %5096 = vmatpush1.bf16.msra.mxu1 %v5095_v27 }
 0x120   :  { %5098 = vmatprep.subr.bf16.mxu1 %v5097_v30 }
 0x123   :  { %5100 = vmatpush1.bf16.msra.mxu1 %v5099_v33 }
 0x124   :  { %5102 = vmatprep.subr.bf16.mxu1 %v5101_v36 }
 0x127   :  { %5104 = vmatpush1.bf16.msra.mxu1 %v5103_v39 }
 0x128   :  { %5106 = vmatprep.subr.bf16.mxu1 %v5105_v42 }
 0x12b   :  { %5108 = vmatpush1.bf16.msra.mxu1 %v5107_v45 }
 0x12c   :  { %5110 = vmatprep.subr.bf16.mxu1 %v5109_v48 }
 0x12f   :  { %5112 = vmatpush1.bf16.msra.mxu1 %v5111_v52  ;;  %v1477_v52 = vld [vmem:[%s8452_s7 + $0x10] sm:$0xff] }
 0x130   :  { %1018 = vmatprep.subr.mxu1 %v4248_v54  ;;  %v5226_v54 = vpack.c.bf16 %v1476_v50, %v1475_v49  ;;  %v949_v50 = vld [vmem:[%s8450_s5 + $0xc0] sm:$0xff] }
 0x132   :  { %5227 = vmatpush1.bf16.msra.mxu0 %v5226_v54 }
 0x133   :  { %1019 = vmatpush1.msra.mxu1 %v4247_v57  ;;  %v927_v57 = vld [vmem:[%s8450_s5 + $0x10] sm:$0xff]  ;;  %5228 = vmatprep.subr.bf16.mxu0 %v5858_v13 }
 0x134   :  { %5114 = vmatprep.subr.bf16.mxu1 %v5113_v58  ;;  %v930_v58 = vld [vmem:[%s8450_s5 + $0x28] sm:$0xff] }
 0x1e9   :  { %v744_v59 = vpop.f32.mrb[0].mxu1  ;;  %v854_v60 = vpop.f32.mrb[6].mxu0 }
 0x1ea   :  { %v868_v61 = vmax.f32 %v744_v59, %v854_v60  ;;  %v746_v62 = vpop.f32.mrb[1].mxu1  ;;  %v856_v63 = vpop.f32.mrb[7].mxu0  ;;  %v932_v59 = vld [vmem:[%s8450_s5 + $0x38] sm:$0xff]  ;;  %v5229_v60 = vpack.c.bf16 %v1478_v55, %v1477_v52  ;;  %v951_v52 = vld [vmem:[%s8450_s5 + $0xd0] sm:$0xff]  ;;  %v1491_v55 = vld [vmem:[%s8452_s7 + $0x80] sm:$0xff] }
 0x1eb   :  { %v1480_v62 = vld [vmem:[%s8452_s7 + $0x28] sm:$0xff]  ;;  %v5115_v63 = vpack.c.bf16 %v927_v57, %v925_v56  ;;  %v5139_v57 = vpack.c.bf16 %v951_v52, %v949_v50  ;;  %v4279_v50 = vld [vmem:[%s8450_s5 + $0x2c0] sm:$0xff] }
 0x1ec   :  { %872 = vst.msk [vmem:[#allocation2] sm:$0xff] %vm871_vm5, %v868_v61  ;;  %v1479_v61 = vld [vmem:[%s8452_s7 + $0x20] sm:$0xff]  ;;  %5230 = vmatpush1.bf16.msra.mxu0 %v5229_v60  ;;  %v1492_v56 = vld [vmem:[%s8452_s7 + $0x88] sm:$0xff]  ;;  %v4254_v60 = vld [vmem:[%s8450_s5 + $0x1f8] sm:$0xff] }
 0x1ed   :  { %v749_v0 = vpop.f32.mrb[2].mxu1  ;;  %v859_v1 = vpop.f32.mrb[8].mxu0  ;;  %5231 = vmatprep.subr.bf16.mxu0 %v5858_v13 }
 0x1ee   :  { %v869_v2 = vmax.f32 %v749_v0, %v859_v1  ;;  %v751_v3 = vpop.f32.mrb[3].mxu1  ;;  %v861_v4 = vpop.f32.mrb[9].mxu0  ;;  %v5117_v0 = vpack.c.bf16 %v932_v59, %v930_v58  ;;  %v929_v1 = vld [vmem:[%s8450_s5 + $0x20] sm:$0xff]  ;;  %v954_v58 = vld [vmem:[%s8450_s5 + $0xe8] sm:$0xff] }
 0x1ef   :  { %v934_v4 = vld [vmem:[%s8450_s5 + $0x48] sm:$0xff] }
 0x1f0   :  { %873 = vst.msk [vmem:[#allocation2 + $0x8] sm:$0xff] %vm871_vm5, %v869_v2  ;;  %v931_v2 = vld [vmem:[%s8450_s5 + $0x30] sm:$0xff]  ;;  %v4252_v59 = vld [vmem:[%s8450_s5 + $0x1e8] sm:$0xff] }
 0x1f1   :  { %v754_v5 = vpop.f32.mrb[4].mxu1  ;;  %v864_v6 = vpop.f32.mrb[10].mxu0 }
 0x1f2   :  { %v870_v8 = vmax.f32 %v754_v5, %v864_v6  ;;  %v756_v9 = vpop.f32.mrb[5].mxu1  ;;  %v866_v11 = vpop.f32.mrb[11].mxu0  ;;  %v936_v5 = vld [vmem:[%s8450_s5 + $0x58] sm:$0xff]  ;;  %v5232_v6 = vpack.c.bf16 %v1480_v62, %v1479_v61  ;;  %v5250_v61 = vpack.c.bf16 %v1492_v56, %v1491_v55  ;;  %v4251_v62 = vld [vmem:[%s8450_s5 + $0x1e0] sm:$0xff]  ;;  %v4286_v56 = vld [vmem:[%s8450_s5 + $0x2f0] sm:$0xff] }
 0x1f3   :  { %v875_v12 = vld [vmem:[#allocation2] sm:$0x1]  ;;  %v876_v14 = vld [vmem:[#allocation2 + $0x1] sm:$0x1]  ;;  %v880_v15 = vld [vmem:[#allocation2 + $0x2] sm:$0x1]  ;;  %v5119_v11 = vpack.c.bf16 %v931_v2, %v929_v1 }
 0x1f4   :  { %v877_v16 = vmax.f32 %v875_v12, %v876_v14  ;;  %v881_v17 = vld [vmem:[#allocation2 + $0x3] sm:$0x1]  ;;  %v884_v18 = vld [vmem:[#allocation2 + $0x4] sm:$0x1]  ;;  %v885_v19 = vld [vmem:[#allocation2 + $0x5] sm:$0x1]  ;;  %v5121_v12 = vpack.c.bf16 %v936_v5, %v934_v4  ;;  %5233 = vmatpush1.bf16.msra.mxu0 %v5232_v6 }
 0x1f5   :  { %874 = vst.msk [vmem:[#allocation2 + $0x10] sm:$0xff] %vm871_vm5, %v870_v8  ;;  %v882_v20 = vmax.f32 %v880_v15, %v881_v17  ;;  %v886_v21 = vmax.f32 %v884_v18, %v885_v19  ;;  %v888_v22 = vld [vmem:[#allocation2 + $0x6] sm:$0x1]  ;;  %v889_v23 = vld [vmem:[#allocation2 + $0x7] sm:$0x1]  ;;  %v1481_v8 = vld [vmem:[%s8452_s7 + $0x30] sm:$0xff]  ;;  %5234 = vmatprep.subr.bf16.mxu0 %v5858_v13 }
 0x1f6   :  { %879 = vst.msk [vmem:[#allocation3] sm:$0x1] %vm878_vm6, %v877_v16  ;;  %v890_v24 = vmax.f32 %v888_v22, %v889_v23  ;;  %v1482_v9 = vld [vmem:[%s8452_s7 + $0x38] sm:$0xff]  ;;  %v933_v14 = vld [vmem:[%s8450_s5 + $0x40] sm:$0xff]  ;;  %v935_v15 = vld [vmem:[%s8450_s5 + $0x50] sm:$0xff] }
 0x1f7   :  { %883 = vst.msk [vmem:[#allocation3 + $0x1] sm:$0x1] %vm878_vm6, %v882_v20  ;;  %887 = vst.msk [vmem:[#allocation3 + $0x2] sm:$0x1] %vm878_vm6, %v886_v21  ;;  %v892_v25 = vld [vmem:[#allocation2 + $0x8] sm:$0x1]  ;;  %v5235_v18 = vpack.c.bf16 %v1482_v9, %v1481_v8  ;;  %v5123_v21 = vpack.c.bf16 %v935_v15, %v933_v14 }
 0x1f8   :  { %v893_v26 = vld [vmem:[#allocation2 + $0x9] sm:$0x1]  ;;  %v896_v27 = vld [vmem:[#allocation2 + $0xa] sm:$0x1]  ;;  %891 = vst.msk [vmem:[#allocation3 + $0x3] sm:$0x1] %vm878_vm6, %v890_v24 }
 0x1f9   :  { %v894_v28 = vmax.f32 %v892_v25, %v893_v26  ;;  %v897_v29 = vld [vmem:[#allocation2 + $0xb] sm:$0x1]  ;;  %v900_v30 = vld [vmem:[#allocation2 + $0xc] sm:$0x1]  ;;  %v901_v31 = vld [vmem:[#allocation2 + $0xd] sm:$0x1]  ;;  %5236 = vmatpush1.bf16.msra.mxu0 %v5235_v18 }
 0x1fa   :  { %v898_v32 = vmax.f32 %v896_v27, %v897_v29  ;;  %v902_v33 = vmax.f32 %v900_v30, %v901_v31  ;;  %v904_v34 = vld [vmem:[#allocation2 + $0xe] sm:$0x1]  ;;  %v905_v35 = vld [vmem:[#allocation2 + $0xf] sm:$0x1]  ;;  %v940_v17 = vld [vmem:[%s8450_s5 + $0x78] sm:$0xff]  ;;  %5237 = vmatprep.subr.bf16.mxu0 %v5858_v13 }
 0x1fb   :  { %895 = vst.msk [vmem:[#allocation3 + $0x4] sm:$0x1] %vm878_vm6, %v894_v28  ;;  %v906_v36 = vmax.f32 %v904_v34, %v905_v35  ;;  %v938_v16 = vld [vmem:[%s8450_s5 + $0x68] sm:$0xff]  ;;  %v1483_v19 = vld [vmem:[%s8452_s7 + $0x40] sm:$0xff]  ;;  %v939_v24 = vld [vmem:[%s8450_s5 + $0x70] sm:$0xff] }
 0x1fc   :  { %899 = vst.msk [vmem:[#allocation3 + $0x5] sm:$0x1] %vm878_vm6, %v898_v32  ;;  %903 = vst.msk [vmem:[#allocation3 + $0x6] sm:$0x1] %vm878_vm6, %v902_v33  ;;  %v908_v37 = vld [vmem:[#allocation2 + $0x10] sm:$0x1]  ;;  %v5125_v22 = vpack.c.bf16 %v940_v17, %v938_v16 }
 0x1fd   :  { %v909_v38 = vld [vmem:[#allocation2 + $0x11] sm:$0x1]  ;;  %v912_v39 = vld [vmem:[#allocation2 + $0x12] sm:$0x1]  ;;  %907 = vst.msk [vmem:[#allocation3 + $0x7] sm:$0x1] %vm878_vm6, %v906_v36 }
 0x1fe   :  { %v910_v40 = vmax.f32 %v908_v37, %v909_v38  ;;  %v913_v41 = vld [vmem:[#allocation2 + $0x13] sm:$0x1]  ;;  %v916_v42 = vld [vmem:[#allocation2 + $0x14] sm:$0x1]  ;;  %v917_v43 = vld [vmem:[#allocation2 + $0x15] sm:$0x1] }
 0x1ff   :  { %v914_v44 = vmax.f32 %v912_v39, %v913_v41  ;;  %v918_v45 = vmax.f32 %v916_v42, %v917_v43  ;;  %v920_v46 = vld [vmem:[#allocation2 + $0x16] sm:$0x1]  ;;  %v921_v47 = vld [vmem:[#allocation2 + $0x17] sm:$0x1]  ;;  %v1484_v20 = vld [vmem:[%s8452_s7 + $0x48] sm:$0xff] }
 0x200   :  { %911 = vst.msk [vmem:[#allocation3 + $0x8] sm:$0x1] %vm878_vm6, %v910_v40  ;;  %v922_v48 = vmax.f32 %v920_v46, %v921_v47  ;;  %v937_v23 = vld [vmem:[%s8450_s5 + $0x60] sm:$0xff]  ;;  %v942_v25 = vld [vmem:[%s8450_s5 + $0x88] sm:$0xff]  ;;  %v944_v26 = vld [vmem:[%s8450_s5 + $0x98] sm:$0xff]  ;;  %v5238_v27 = vpack.c.bf16 %v1484_v20, %v1483_v19 }
 0x201   :  { %915 = vst.msk [vmem:[#allocation3 + $0x9] sm:$0x1] %vm878_vm6, %v914_v44  ;;  %919 = vst.msk [vmem:[#allocation3 + $0xa] sm:$0x1] %vm878_vm6, %v918_v45  ;;  %v1485_v28 = vld [vmem:[%s8452_s7 + $0x50] sm:$0xff]  ;;  %v1486_v29 = vld [vmem:[%s8452_s7 + $0x58] sm:$0xff]  ;;  %v5127_v30 = vpack.c.bf16 %v939_v24, %v937_v23  ;;  %v5129_v31 = vpack.c.bf16 %v944_v26, %v942_v25 }
 0x202   :  { %923 = vst.msk [vmem:[#allocation3 + $0xb] sm:$0x1] %vm878_vm6, %v922_v48  ;;  %v941_v32 = vld [vmem:[%s8450_s5 + $0x80] sm:$0xff]  ;;  %v943_v33 = vld [vmem:[%s8450_s5 + $0x90] sm:$0xff]  ;;  %v946_v34 = vld [vmem:[%s8450_s5 + $0xa8] sm:$0xff]  ;;  %5239 = vmatpush1.bf16.msra.mxu0 %v5238_v27  ;;  %v5241_v36 = vpack.c.bf16 %v1486_v29, %v1485_v28 }
 0x203   :  { %v948_v35 = vld [vmem:[%s8450_s5 + $0xb8] sm:$0xff]  ;;  %5240 = vmatprep.subr.bf16.mxu0 %v5858_v13  ;;  %v1487_v37 = vld [vmem:[%s8452_s7 + $0x60] sm:$0xff]  ;;  %v1488_v38 = vld [vmem:[%s8452_s7 + $0x68] sm:$0xff]  ;;  %v5131_v39 = vpack.c.bf16 %v943_v33, %v941_v32 }
 0x204   :  { %v5133_v40 = vpack.c.bf16 %v948_v35, %v946_v34  ;;  %v945_v41 = vld [vmem:[%s8450_s5 + $0xa0] sm:$0xff]  ;;  %v947_v42 = vld [vmem:[%s8450_s5 + $0xb0] sm:$0xff]  ;;  %v950_v43 = vld [vmem:[%s8450_s5 + $0xc8] sm:$0xff]  ;;  %v5244_v45 = vpack.c.bf16 %v1488_v38, %v1487_v37 }
 0x205   :  { %v952_v44 = vld [vmem:[%s8450_s5 + $0xd8] sm:$0xff]  ;;  %v1489_v46 = vld [vmem:[%s8452_s7 + $0x70] sm:$0xff]  ;;  %v5135_v48 = vpack.c.bf16 %v947_v42, %v945_v41  ;;  %v953_v2 = vld [vmem:[%s8450_s5 + $0xe0] sm:$0xff] }
 0x206   :  { %5242 = vmatpush1.bf16.msra.mxu0 %v5241_v36  ;;  %v1490_v47 = vld [vmem:[%s8452_s7 + $0x78] sm:$0xff]  ;;  %v5137_v49 = vpack.c.bf16 %v952_v44, %v950_v43  ;;  %v4255_v6 = vld [vmem:[%s8450_s5 + $0x200] sm:$0xff]  ;;  %v4257_v8 = vld [vmem:[%s8450_s5 + $0x210] sm:$0xff] }
 0x207   :  { %v955_v3 = vld [vmem:[#allocation3 + $0x1] sm:$0xff]  ;;  %5243 = vmatprep.subr.bf16.mxu0 %v5858_v13  ;;  %v5247_v54 = vpack.c.bf16 %v1490_v47, %v1489_v46  ;;  %v5147_v14 = vpack.c.bf16 %v4257_v8, %v4255_v6  ;;  %v4259_v16 = vld [vmem:[%s8450_s5 + $0x220] sm:$0xff]  ;;  %v4264_v18 = vld [vmem:[%s8450_s5 + $0x248] sm:$0xff] }
 0x208   :  { %4249 = vmatmul.mubr.msk.f32.vlgmr.msra.gmra.mrb[6].mxu1 %vm871_vm5, %v955_v3  ;;  %v4258_v1 = vld [vmem:[%s8450_s5 + $0x218] sm:$0xff]  ;;  %v5141_v3 = vpack.c.bf16 %v4254_v60, %v4252_v59  ;;  %v924_v9 = vld [vmem:[#allocation3] sm:$0xff]  ;;  %v4268_v24 = vld [vmem:[%s8450_s5 + $0x268] sm:$0xff] }
 0x209   :  { %5116 = vmatpush1.bf16.msra.mxu1 %v5115_v63  ;;  %1128 = vmatprep.mubr.f32.mxu1 %v5856_v7  ;;  %v4253_v63 = vld [vmem:[%s8450_s5 + $0x1f0] sm:$0xff]  ;;  %v4266_v19 = vld [vmem:[%s8450_s5 + $0x258] sm:$0xff]  ;;  %v4267_v28 = vld [vmem:[%s8450_s5 + $0x260] sm:$0xff] }
 0x20a   :  { %5118 = vmatprep.subr.bf16.mxu1 %v5117_v0  ;;  %5245 = vmatpush1.bf16.msra.mxu0 %v5244_v45  ;;  %v4256_v0 = vld [vmem:[%s8450_s5 + $0x208] sm:$0xff]  ;;  %v5143_v4 = vpack.c.bf16 %v4253_v63, %v4251_v62  ;;  %v4261_v17 = vld [vmem:[%s8450_s5 + $0x230] sm:$0xff]  ;;  %v4270_v25 = vld [vmem:[%s8450_s5 + $0x278] sm:$0xff] }
 0x20b   :  { %5246 = vmatprep.subr.bf16.mxu0 %v5858_v13  ;;  %v5145_v5 = vpack.c.bf16 %v4258_v1, %v4256_v0  ;;  %v5151_v20 = vpack.c.bf16 %v4261_v17, %v4259_v16  ;;  %v4265_v23 = vld [vmem:[%s8450_s5 + $0x250] sm:$0xff]  ;;  %v5157_v27 = vpack.c.bf16 %v4270_v25, %v4268_v24  ;;  %v4271_v34 = vld [vmem:[%s8450_s5 + $0x280] sm:$0xff]  ;;  %v4276_v36 = vld [vmem:[%s8450_s5 + $0x2a8] sm:$0xff] }
 0x20c   :  { %v4269_v29 = vld [vmem:[%s8450_s5 + $0x270] sm:$0xff]  ;;  %v4278_v37 = vld [vmem:[%s8450_s5 + $0x2b8] sm:$0xff]  ;;  %v4280_v43 = vld [vmem:[%s8450_s5 + $0x2c8] sm:$0xff] }
 0x20d   :  { %5120 = vmatpush1.bf16.msra.mxu1 %v5119_v11  ;;  %v4260_v11 = vld [vmem:[%s8450_s5 + $0x228] sm:$0xff]  ;;  %v5159_v32 = vpack.c.bf16 %v4269_v29, %v4267_v28  ;;  %v4273_v35 = vld [vmem:[%s8450_s5 + $0x290] sm:$0xff]  ;;  %v4283_v44 = vld [vmem:[%s8450_s5 + $0x2d8] sm:$0xff] }
 0x20e   :  { %5122 = vmatprep.subr.bf16.mxu1 %v5121_v12  ;;  %5248 = vmatpush1.bf16.msra.mxu0 %v5247_v54  ;;  %v4262_v12 = vld [vmem:[%s8450_s5 + $0x238] sm:$0xff]  ;;  %v5163_v38 = vpack.c.bf16 %v4273_v35, %v4271_v34  ;;  %v4277_v41 = vld [vmem:[%s8450_s5 + $0x2b0] sm:$0xff]  ;;  %v4285_v45 = vld [vmem:[%s8450_s5 + $0x2e8] sm:$0xff] }
 0x20f   :  { %5249 = vmatprep.subr.bf16.mxu0 %v5858_v13  ;;  %v5149_v15 = vpack.c.bf16 %v4262_v12, %v4260_v11  ;;  %v4282_v46 = vld [vmem:[%s8450_s5 + $0x2d0] sm:$0xff]  ;;  %v4284_v47 = vld [vmem:[%s8450_s5 + $0x2e0] sm:$0xff]  ;;  %v5169_v52 = vpack.c.bf16 %v4285_v45, %v4283_v44  ;;  %v4291_v59 = vld [vmem:[%s8450_s5 + $0x318] sm:$0xff] }
 0x210   :  { %v5171_v54 = vpack.c.bf16 %v4284_v47, %v4282_v46  ;;  %v4293_v60 = vld [vmem:[%s8450_s5 + $0x328] sm:$0xff]  ;;  %v4290_v63 = vld [vmem:[%s8450_s5 + $0x310] sm:$0xff]  ;;  %v4292_v0 = vld [vmem:[%s8450_s5 + $0x320] sm:$0xff] }
 0x211   :  { %5124 = vmatpush1.bf16.msra.mxu1 %v5123_v21  ;;  %v5153_v21 = vpack.c.bf16 %v4266_v19, %v4264_v18  ;;  %v5177_v62 = vpack.c.bf16 %v4293_v60, %v4291_v59  ;;  %v4295_v1 = vld [vmem:[%s8450_s5 + $0x338] sm:$0xff]  ;;  %v4296_v6 = vld [vmem:[%s8450_s5 + $0x340] sm:$0xff]  ;;  %v4305_v17 = vld [vmem:[%s8450_s5 + $0x388] sm:$0xff] }
 0x212   :  { %5126 = vmatprep.subr.bf16.mxu1 %v5125_v22  ;;  %5251 = vmatpush1.bf16.msra.mxu0 %v5250_v61  ;;  %v4263_v22 = vld [vmem:[%s8450_s5 + $0x240] sm:$0xff]  ;;  %v4299_v8 = vld [vmem:[%s8450_s5 + $0x358] sm:$0xff]  ;;  %v4318_v34 = vld [vmem:[%s8450_s5 + $0x3e8] sm:$0xff] }
 0x213   :  { %5252 = vmatprep.subr.bf16.mxu0 %v5858_v13  ;;  %v5155_v26 = vpack.c.bf16 %v4265_v23, %v4263_v22  ;;  %v4303_v16 = vld [vmem:[%s8450_s5 + $0x378] sm:$0xff]  ;;  %v4309_v23 = vld [vmem:[%s8450_s5 + $0x3a8] sm:$0xff]  ;;  %v4321_v47 = vld [vmem:[%s8450_s5 + $0x400] sm:$0xff] }
 0x214   :  { %v5189_v19 = vpack.c.bf16 %v4305_v17, %v4303_v16  ;;  %v4307_v22 = vld [vmem:[%s8450_s5 + $0x398] sm:$0xff]  ;;  %v4341_v16 = vld [vmem:[%s8450_s5 + $0x4a0] sm:$0xff] }
 0x215   :  { %5128 = vmatpush1.bf16.msra.mxu1 %v5127_v30  ;;  %v4272_v30 = vld [vmem:[%s8450_s5 + $0x288] sm:$0xff]  ;;  %v5193_v25 = vpack.c.bf16 %v4309_v23, %v4307_v22  ;;  %v4311_v29 = vld [vmem:[%s8450_s5 + $0x3b8] sm:$0xff] }
 0x216   :  { %5130 = vmatprep.subr.bf16.mxu1 %v5129_v31  ;;  %v4274_v31 = vld [vmem:[%s8450_s5 + $0x298] sm:$0xff] }
 0x217   :  { %v5161_v33 = vpack.c.bf16 %v4274_v31, %v4272_v30  ;;  %v4314_v30 = vld [vmem:[%s8450_s5 + $0x3c8] sm:$0xff]  ;;  %v4316_v31 = vld [vmem:[%s8450_s5 + $0x3d8] sm:$0xff] }
 0x218   :  { %v4320_v35 = vld [vmem:[%s8450_s5 + $0x3f8] sm:$0xff] }
 0x219   :  { %5132 = vmatpush1.bf16.msra.mxu1 %v5131_v39  ;;  %v5165_v39 = vpack.c.bf16 %v4278_v37, %v4276_v36  ;;  %v4310_v36 = vld [vmem:[%s8450_s5 + $0x3b0] sm:$0xff]  ;;  %v5197_v37 = vpack.c.bf16 %v4316_v31, %v4314_v30  ;;  %v4324_v44 = vld [vmem:[%s8450_s5 + $0x418] sm:$0xff] }
 0x21a   :  { %5134 = vmatprep.subr.bf16.mxu1 %v5133_v40  ;;  %v4275_v40 = vld [vmem:[%s8450_s5 + $0x2a0] sm:$0xff]  ;;  %v1351_v17 = vld [vmem:[#allocation3 + $0x4] sm:$0xff] }
 0x21b   :  { %v5167_v42 = vpack.c.bf16 %v4277_v41, %v4275_v40  ;;  %v4317_v40 = vld [vmem:[%s8450_s5 + $0x3e0] sm:$0xff]  ;;  %v4319_v41 = vld [vmem:[%s8450_s5 + $0x3f0] sm:$0xff] }
 0x21c   :  { %v5203_v45 = vpack.c.bf16 %v4319_v41, %v4317_v40  ;;  %v1576_v40 = vld [vmem:[%s8453_s8 + $0x38] sm:$0xff] }
 0x21d   :  { %5136 = vmatpush1.bf16.msra.mxu1 %v5135_v48  ;;  %v4287_v48 = vld [vmem:[%s8450_s5 + $0x2f8] sm:$0xff] }
 0x21e   :  { %5138 = vmatprep.subr.bf16.mxu1 %v5137_v49  ;;  %v4289_v49 = vld [vmem:[%s8450_s5 + $0x308] sm:$0xff] }
 0x21f   :  { %v5173_v55 = vpack.c.bf16 %v4289_v49, %v4287_v48  ;;  %v4323_v48 = vld [vmem:[%s8450_s5 + $0x410] sm:$0xff]  ;;  %v4326_v49 = vld [vmem:[%s8450_s5 + $0x428] sm:$0xff] }
 0x221   :  { %5140 = vmatpush1.bf16.msra.mxu1 %v5139_v57  ;;  %v4288_v57 = vld [vmem:[%s8450_s5 + $0x300] sm:$0xff] }
 0x222   :  { %1092 = vmatprep.subr.mxu1 %v954_v58  ;;  %v1135_v58 = vld [vmem:[#allocation3 + $0x2] sm:$0xff]  ;;  %v5175_v61 = vpack.c.bf16 %v4288_v57, %v4286_v56  ;;  %v4330_v57 = vld [vmem:[%s8450_s5 + $0x448] sm:$0xff] }
 0x223   :  { %v4327_v56 = vld [vmem:[%s8450_s5 + $0x430] sm:$0xff] }
 0x225   :  { %1093 = vmatpush1.msra.mxu1 %v953_v2  ;;  %v4297_v2 = vld [vmem:[%s8450_s5 + $0x348] sm:$0xff] }
 0x226   :  { %4250 = vmatmul.mubr.msk.f32.vlgmr.msra.gmra.mrb[6].mxu1 %vm871_vm5, %v924_v9  ;;  %5142 = vmatprep.subr.bf16.mxu1 %v5141_v3  ;;  %v5179_v3 = vpack.c.bf16 %v4292_v0, %v4290_v63  ;;  %v4301_v9 = vld [vmem:[%s8450_s5 + $0x368] sm:$0xff]  ;;  %v4336_v0 = vld [vmem:[%s8450_s5 + $0x478] sm:$0xff] }
 0x227   :  { %5144 = vmatpush1.bf16.msra.mxu1 %v5143_v4  ;;  %1234 = vmatprep.mubr.f32.mxu1 %v5856_v7  ;;  %v5181_v4 = vpack.c.bf16 %v4297_v2, %v4295_v1  ;;  %v5185_v12 = vpack.c.bf16 %v4301_v9, %v4299_v8  ;;  %v4334_v63 = vld [vmem:[%s8450_s5 + $0x468] sm:$0xff] }
 0x228   :  { %5146 = vmatprep.subr.bf16.mxu1 %v5145_v5  ;;  %v4294_v5 = vld [vmem:[%s8450_s5 + $0x330] sm:$0xff]  ;;  %v5217_v2 = vpack.c.bf16 %v4336_v0, %v4334_v63  ;;  %v4347_v63 = vld [vmem:[%s8454_s9 + $0x58] sm:$0xff]  ;;  %v1665_v0 = vld [vmem:[%s8454_s9] sm:$0xff] }
 0x229   :  { %v5183_v11 = vpack.c.bf16 %v4296_v6, %v4294_v5  ;;  %v4338_v5 = vld [vmem:[%s8450_s5 + $0x488] sm:$0xff]  ;;  %v4340_v6 = vld [vmem:[%s8450_s5 + $0x498] sm:$0xff] }
 0x22a   :  { %v5221_v9 = vpack.c.bf16 %v4340_v6, %v4338_v5  ;;  %v1667_v6 = vld [vmem:[%s8454_s9 + $0x10] sm:$0xff] }
 0x22b   :  { %5148 = vmatpush1.bf16.msra.mxu1 %v5147_v14  ;;  %v4298_v14 = vld [vmem:[%s8450_s5 + $0x350] sm:$0xff] }
 0x22c   :  { %5150 = vmatprep.subr.bf16.mxu1 %v5149_v15  ;;  %v4300_v15 = vld [vmem:[%s8450_s5 + $0x360] sm:$0xff] }
 0x22d   :  { %v5187_v18 = vpack.c.bf16 %v4300_v15, %v4298_v14  ;;  %v4342_v15 = vld [vmem:[%s8450_s5 + $0x4a8] sm:$0xff] }
 0x22f   :  { %5152 = vmatpush1.bf16.msra.mxu1 %v5151_v20  ;;  %v4302_v20 = vld [vmem:[%s8450_s5 + $0x370] sm:$0xff] }
 0x230   :  { %5154 = vmatprep.subr.bf16.mxu1 %v5153_v21  ;;  %v4304_v21 = vld [vmem:[%s8450_s5 + $0x380] sm:$0xff] }
 0x231   :  { %v5191_v24 = vpack.c.bf16 %v4304_v21, %v4302_v20  ;;  %v1459_v21 = vld [vmem:[%s8451_s6] sm:$0x3] }
 0x232   :  { %v1464_v22 = vrot.slane %v1459_v21, %v6367_v51  ;;  %v1468_v23 = vrot.slane %v1459_v21, %v6372_v53  ;;  %v1671_v21 = vld [vmem:[%s8454_s9 + $0x30] sm:$0xff] }
 0x233   :  { %5156 = vmatpush1.bf16.msra.mxu1 %v5155_v26  ;;  %v4306_v26 = vld [vmem:[%s8450_s5 + $0x390] sm:$0xff] }
 0x234   :  { %5158 = vmatprep.subr.bf16.mxu1 %v5157_v27  ;;  %v4308_v27 = vld [vmem:[%s8450_s5 + $0x3a0] sm:$0xff] }
 0x235   :  { %v5195_v28 = vpack.c.bf16 %v4308_v27, %v4306_v26  ;;  %v1569_v27 = vld [vmem:[%s8453_s8] sm:$0xff] }
 0x237   :  { %5160 = vmatpush1.bf16.msra.mxu1 %v5159_v32  ;;  %v4313_v32 = vld [vmem:[%s8450_s5 + $0x3c0] sm:$0xff] }
 0x238   :  { %5162 = vmatprep.subr.bf16.mxu1 %v5161_v33  ;;  %v4315_v33 = vld [vmem:[%s8450_s5 + $0x3d0] sm:$0xff] }
 0x23b   :  { %5164 = vmatpush1.bf16.msra.mxu1 %v5163_v38  ;;  %v5199_v38 = vpack.c.bf16 %v4315_v33, %v4313_v32  ;;  %v1571_v33 = vld [vmem:[%s8453_s8 + $0x10] sm:$0xff] }
 0x23c   :  { %5166 = vmatprep.subr.bf16.mxu1 %v5165_v39  ;;  %v5201_v39 = vpack.c.bf16 %v4320_v35, %v4318_v34  ;;  %v1572_v34 = vld [vmem:[%s8453_s8 + $0x18] sm:$0xff] }
 0x23d   :  { %v5259_v35 = vpack.c.bf16 %v1572_v34, %v1571_v33 }
 0x23f   :  { %5168 = vmatpush1.bf16.msra.mxu1 %v5167_v42  ;;  %v1243_v42 = vld [vmem:[#allocation3 + $0x3] sm:$0xff] }
 0x240   :  { %1198 = vmatprep.subr.mxu1 %v4280_v43  ;;  %v4322_v43 = vld [vmem:[%s8450_s5 + $0x408] sm:$0xff] }
 0x241   :  { %v5205_v46 = vpack.c.bf16 %v4324_v44, %v4322_v43  ;;  %v1578_v43 = vld [vmem:[%s8453_s8 + $0x48] sm:$0xff] }
 0x243   :  { %1199 = vmatpush1.msra.mxu1 %v4279_v50  ;;  %v4328_v50 = vld [vmem:[%s8450_s5 + $0x438] sm:$0xff] }
 0x244   :  { %4281 = vmatmul.mubr.msk.f32.vlgmr.msra.gmra.mrb[6].mxu1 %vm871_vm5, %v1135_v58  ;;  %5170 = vmatprep.subr.bf16.mxu1 %v5169_v52  ;;  %v5207_v52 = vpack.c.bf16 %v4323_v48, %v4321_v47  ;;  %v4332_v58 = vld [vmem:[%s8450_s5 + $0x458] sm:$0xff]  ;;  %v1581_v48 = vld [vmem:[%s8453_s8 + $0x60] sm:$0xff] }
 0x245   :  { %5172 = vmatpush1.bf16.msra.mxu1 %v5171_v54  ;;  %1342 = vmatprep.mubr.f32.mxu1 %v5856_v7  ;;  %v5209_v54 = vpack.c.bf16 %v4328_v50, %v4326_v49  ;;  %v5213_v60 = vpack.c.bf16 %v4332_v58, %v4330_v57  ;;  %v1582_v49 = vld [vmem:[%s8453_s8 + $0x68] sm:$0xff] }
 0x246   :  { %5174 = vmatprep.subr.bf16.mxu1 %v5173_v55  ;;  %v4325_v55 = vld [vmem:[%s8450_s5 + $0x420] sm:$0xff]  ;;  %v5274_v50 = vpack.c.bf16 %v1582_v49, %v1581_v48  ;;  %v1586_v57 = vld [vmem:[%s8453_s8 + $0x88] sm:$0xff]  ;;  %v4361_v48 = vld [vmem:[%s8454_s9 + $0xb8] sm:$0xff] }
 0x247   :  { %v5211_v59 = vpack.c.bf16 %v4327_v56, %v4325_v55  ;;  %v1585_v56 = vld [vmem:[%s8453_s8 + $0x80] sm:$0xff] }
 0x248   :  { %v5280_v58 = vpack.c.bf16 %v1586_v57, %v1585_v56  ;;  %v4362_v56 = vld [vmem:[%s8454_s9 + $0xc0] sm:$0xff]  ;;  %v4363_v57 = vld [vmem:[%s8454_s9 + $0xc8] sm:$0xff] }
 0x249   :  { %5176 = vmatpush1.bf16.msra.mxu1 %v5175_v61  ;;  %v4329_v61 = vld [vmem:[%s8450_s5 + $0x440] sm:$0xff] }
 0x24a   :  { %5178 = vmatprep.subr.bf16.mxu1 %v5177_v62  ;;  %v4331_v62 = vld [vmem:[%s8450_s5 + $0x450] sm:$0xff] }
 0x24b   :  { %v5215_v1 = vpack.c.bf16 %v4331_v62, %v4329_v61  ;;  %v4346_v62 = vld [vmem:[%s8454_s9 + $0x50] sm:$0xff] }
 0x24d   :  { %5180 = vmatpush1.bf16.msra.mxu1 %v5179_v3  ;;  %v4333_v3 = vld [vmem:[%s8450_s5 + $0x460] sm:$0xff] }
 0x24e   :  { %5182 = vmatprep.subr.bf16.mxu1 %v5181_v4  ;;  %v4335_v4 = vld [vmem:[%s8450_s5 + $0x470] sm:$0xff] }
 0x24f   :  { %v5219_v8 = vpack.c.bf16 %v4335_v4, %v4333_v3  ;;  %v4348_v3 = vld [vmem:[%s8454_s9 + $0x60] sm:$0xff]  ;;  %v4349_v4 = vld [vmem:[%s8454_s9 + $0x68] sm:$0xff] }
 0x251   :  { %5184 = vmatpush1.bf16.msra.mxu1 %v5183_v11  ;;  %v4337_v11 = vld [vmem:[%s8450_s5 + $0x480] sm:$0xff] }
 0x252   :  { %5186 = vmatprep.subr.bf16.mxu1 %v5185_v12  ;;  %v4339_v12 = vld [vmem:[%s8450_s5 + $0x490] sm:$0xff] }
 0x253   :  { %v5223_v14 = vpack.c.bf16 %v4339_v12, %v4337_v11  ;;  %v4350_v12 = vld [vmem:[%s8454_s9 + $0x70] sm:$0xff] }
 0x255   :  { %5188 = vmatpush1.bf16.msra.mxu1 %v5187_v18  ;;  %v1493_v18 = vld [vmem:[%s8452_s7 + $0x90] sm:$0xff] }
 0x256   :  { %5190 = vmatprep.subr.bf16.mxu1 %v5189_v19  ;;  %v1494_v19 = vld [vmem:[%s8452_s7 + $0x98] sm:$0xff] }
 0x257   :  { %v5253_v20 = vpack.c.bf16 %v1494_v19, %v1493_v18  ;;  %v4352_v19 = vld [vmem:[%s8454_s9 + $0x80] sm:$0xff] }
 0x259   :  { %5192 = vmatpush1.bf16.msra.mxu1 %v5191_v24  ;;  %5254 = vmatpush1.bf16.msra.mxu0 %v5253_v20  ;;  %v4353_v20 = vld [vmem:[%s8454_s9 + $0x88] sm:$0xff] }
 0x25a   :  { %5194 = vmatprep.subr.bf16.mxu1 %v5193_v25  ;;  %5255 = vmatprep.subr.bf16.mxu0 %v5858_v13 }
 0x25d   :  { %5196 = vmatpush1.bf16.msra.mxu1 %v5195_v28  ;;  %v1570_v28 = vld [vmem:[%s8453_s8 + $0x8] sm:$0xff] }
 0x25e   :  { %1306 = vmatprep.subr.mxu1 %v4311_v29  ;;  %v5256_v31 = vpack.c.bf16 %v1570_v28, %v1569_v27  ;;  %v1673_v27 = vld [vmem:[%s8454_s9 + $0x40] sm:$0xff]  ;;  %v1674_v28 = vld [vmem:[%s8454_s9 + $0x48] sm:$0xff] }
 0x261   :  { %1307 = vmatpush1.msra.mxu1 %v4310_v36  ;;  %v1573_v36 = vld [vmem:[%s8453_s8 + $0x20] sm:$0xff] }
 0x262   :  { %4312 = vmatmul.mubr.msk.f32.vlgmr.msra.gmra.mrb[6].mxu1 %vm871_vm5, %v1243_v42  ;;  %5198 = vmatprep.subr.bf16.mxu1 %v5197_v37  ;;  %v1574_v37 = vld [vmem:[%s8453_s8 + $0x28] sm:$0xff]  ;;  %v1577_v42 = vld [vmem:[%s8453_s8 + $0x40] sm:$0xff] }
 0x263   :  { %5200 = vmatpush1.bf16.msra.mxu1 %v5199_v38  ;;  %1450 = vmatprep.mubr.f32.mxu1 %v5856_v7  ;;  %v5262_v38 = vpack.c.bf16 %v1574_v37, %v1573_v36  ;;  %v5268_v44 = vpack.c.bf16 %v1578_v43, %v1577_v42  ;;  %v4358_v36 = vld [vmem:[%s8454_s9 + $0xa0] sm:$0xff]  ;;  %v4359_v37 = vld [vmem:[%s8454_s9 + $0xa8] sm:$0xff] }
 0x264   :  { %5202 = vmatprep.subr.bf16.mxu1 %v5201_v39  ;;  %v1575_v39 = vld [vmem:[%s8453_s8 + $0x30] sm:$0xff]  ;;  %v5316_v43 = vpack.c.bf16 %v4359_v37, %v4358_v36 }
 0x265   :  { %v5265_v41 = vpack.c.bf16 %v1576_v40, %v1575_v39  ;;  %v4370_v39 = vld [vmem:[%s8454_s9 + $0xf8] sm:$0xff] }
 0x267   :  { %5204 = vmatpush1.bf16.msra.mxu1 %v5203_v45  ;;  %v1579_v45 = vld [vmem:[%s8453_s8 + $0x50] sm:$0xff] }
 0x268   :  { %5206 = vmatprep.subr.bf16.mxu1 %v5205_v46  ;;  %v1580_v46 = vld [vmem:[%s8453_s8 + $0x58] sm:$0xff] }
 0x269   :  { %v5271_v47 = vpack.c.bf16 %v1580_v46, %v1579_v45 }
 0x26b   :  { %5208 = vmatpush1.bf16.msra.mxu1 %v5207_v52  ;;  %v1583_v52 = vld [vmem:[%s8453_s8 + $0x70] sm:$0xff] }
 0x26c   :  { %5210 = vmatprep.subr.bf16.mxu1 %v5209_v54  ;;  %v1584_v54 = vld [vmem:[%s8453_s8 + $0x78] sm:$0xff] }
 0x26d   :  { %v5277_v55 = vpack.c.bf16 %v1584_v54, %v1583_v52  ;;  %v4372_v52 = vld [vmem:[%s8454_s9 + $0x108] sm:$0xff] }
 0x26f   :  { %5212 = vmatpush1.bf16.msra.mxu1 %v5211_v59  ;;  %v1587_v59 = vld [vmem:[%s8453_s8 + $0x90] sm:$0xff] }
 0x270   :  { %5214 = vmatprep.subr.bf16.mxu1 %v5213_v60  ;;  %v1588_v60 = vld [vmem:[%s8453_s8 + $0x98] sm:$0xff] }
 0x271   :  { %v5283_v61 = vpack.c.bf16 %v1588_v60, %v1587_v59  ;;  %v4374_v59 = vld [vmem:[%s8454_s9 + $0x118] sm:$0xff]  ;;  %v5322_v60 = vpack.c.bf16 %v4363_v57, %v4362_v56  ;;  %v2107_v56 = vld [vmem:[%s8446_s1 + $0x8] sm:$0xff] }
 0x272   :  { %v2109_v57 = vld [vmem:[%s8446_s1 + $0x18] sm:$0xff] }
 0x273   :  { %5216 = vmatpush1.bf16.msra.mxu1 %v5215_v1  ;;  %v5286_v1 = vpack.c.bf16 %v4347_v63, %v4346_v62  ;;  %v4364_v62 = vld [vmem:[%s8454_s9 + $0xd0] sm:$0xff]  ;;  %v4365_v63 = vld [vmem:[%s8454_s9 + $0xd8] sm:$0xff] }
 0x274   :  { %5218 = vmatprep.subr.bf16.mxu1 %v5217_v2  ;;  %v1666_v2 = vld [vmem:[%s8454_s9 + $0x8] sm:$0xff] }
 0x275   :  { %v5301_v5 = vpack.c.bf16 %v1666_v2, %v1665_v0  ;;  %v4375_v0 = vld [vmem:[%s8454_s9 + $0x120] sm:$0xff]  ;;  %v5325_v2 = vpack.c.bf16 %v4365_v63, %v4364_v62  ;;  %v2111_v62 = vld [vmem:[%s8446_s1 + $0x28] sm:$0xff]  ;;  %v2113_v63 = vld [vmem:[%s8446_s1 + $0x38] sm:$0xf] }
 0x277   :  { %5220 = vmatpush1.bf16.msra.mxu1 %v5219_v8  ;;  %v1668_v8 = vld [vmem:[%s8454_s9 + $0x18] sm:$0xff] }
 0x278   :  { %5222 = vmatprep.subr.bf16.mxu1 %v5221_v9  ;;  %v5289_v9 = vpack.c.bf16 %v4349_v4, %v4348_v3  ;;  %v5304_v11 = vpack.c.bf16 %v1668_v8, %v1667_v6  ;;  %v4366_v4 = vld [vmem:[%s8454_s9 + $0xe0] sm:$0xff]  ;;  %v4377_v6 = vld [vmem:[%s8454_s9 + $0x130] sm:$0xff]  ;;  %v4378_v8 = vld [vmem:[%s8454_s9 + $0x138] sm:$0xff] }
 0x27b   :  { %5224 = vmatpush1.bf16.msra.mxu1 %v5223_v14  ;;  %v4351_v14 = vld [vmem:[%s8454_s9 + $0x78] sm:$0xff] }
 0x27c   :  { %1414 = vmatprep.subr.mxu1 %v4342_v15  ;;  %v1669_v15 = vld [vmem:[%s8454_s9 + $0x20] sm:$0xff] }
 0x27f   :  { %1415 = vmatpush1.msra.mxu1 %v4341_v16  ;;  %v5292_v16 = vpack.c.bf16 %v4351_v14, %v4350_v12 }
 0x280   :  { %4343 = vmatmul.mubr.msk.f32.vlgmr.msra.gmra.mrb[6].mxu1 %vm871_vm5, %v1351_v17  ;;  %5300 = vmatprep.subr.bf16.mxu1 %v5858_v13  ;;  %v1670_v17 = vld [vmem:[%s8454_s9 + $0x28] sm:$0xff] }
 0x281   :  { %5302 = vmatpush3.bf16.msra.mxu1 %v5301_v5  ;;  %v5307_v18 = vpack.c.bf16 %v1670_v17, %v1669_v15  ;;  %4770 = vmatprep.mubr.msk.f32.mxu1 %vm5859_vm8, %v5856_v7  ;;  %v4367_v5 = vld [vmem:[%s8454_s9 + $0xe8] sm:$0xff] }
 0x282   :  { %5303 = vmatprep.subr.bf16.mxu1 %v5858_v13 }
 0x285   :  { %5305 = vmatpush3.bf16.msra.mxu1 %v5304_v11  ;;  %v5343_v11 = vpack.c.bf16 %v4378_v8, %v4377_v6  ;;  %v4412_v6 = vld [vmem:[%s8446_s1 + $0x98] sm:$0xff]  ;;  %v4386_v8 = vld [vmem:[%s8445_s0 + $0x29] sm:$0xff] }
 0x286   :  { %5306 = vmatprep.subr.bf16.mxu1 %v5858_v13 }
 0x289   :  { %5308 = vmatpush3.bf16.msra.mxu1 %v5307_v18 }
 0x28a   :  { %5309 = vmatprep.subr.bf16.mxu1 %v5858_v13 }
 0x353   :  { %v1452_v24 = vpop.f32.mrb[6].mxu1 }
 0x354   :  { %v1471_v25 = vadd.f32 %v1464_v22, %v1452_v24  ;;  %v1454_v26 = vpop.f32.mrb[7].mxu1  ;;  %v5295_v22 = vpack.c.bf16 %v4353_v20, %v4352_v19  ;;  %v4354_v24 = vld [vmem:[%s8454_s9 + $0x90] sm:$0xff]  ;;  %v2014_v19 = vld [vmem:[%s8456_s11] sm:$0xff]  ;;  %v2015_v20 = vld [vmem:[%s8456_s11 + $0x8] sm:$0xff] }
 0x355   :  { %v1472_v29 = vadd.f32 %v1468_v23, %v1454_v26  ;;  %v1672_v23 = vld [vmem:[%s8454_s9 + $0x38] sm:$0xff] }
 0x356   :  { %v1473_v32 = vmax.f32 %v1471_v25, 0.0  ;;  %v4355_v25 = vld [vmem:[%s8454_s9 + $0x98] sm:$0xff]  ;;  %v5310_v26 = vpack.c.bf16 %v1672_v23, %v1671_v21  ;;  %v2016_v21 = vld [vmem:[%s8456_s11 + $0x10] sm:$0xff] }
 0x357   :  { %v1474_v30 = vmax.f32 %v1472_v29, 0.0  ;;  %v5298_v29 = vpack.c.bf16 %v4355_v25, %v4354_v24  ;;  %v2017_v23 = vld [vmem:[%s8456_s11 + $0x18] sm:$0xff]  ;;  %v2018_v25 = vld [vmem:[%s8456_s11 + $0x20] sm:$0xff] }
 0x358   :  { %5311 = vmatpush3.bf16.msra.mxu1 %v5310_v26  ;;  %v5349_v24 = vpack.c.bf16 %v2017_v23, %v2016_v21  ;;  %v2019_v26 = vld [vmem:[%s8456_s11 + $0x28] sm:$0xff]  ;;  %v4413_v21 = vld [vmem:[%s8446_s1 + $0xa0] sm:$0xff] }
 0x359   :  { %4344 = vmatprep.mubr.msk.f32.mxu0 %vm1495_vm7, %v1474_v30  ;;  %5312 = vmatprep.subr.bf16.mxu1 %v5858_v13  ;;  %v4426_v23 = vld [vmem:[%s8446_s1 + $0xc8] sm:$0xff] }
 0x35a   :  { %1564 = vmatmul.mubr.f32.vlgmr.msra.gmra.mrb[12].mxu0 %v1473_v32 }
 0x35b   :  { %5257 = vmatpush1.bf16.msra.mxu0 %v5256_v31  ;;  %4345 = vmatprep.mubr.msk.f32.mxu0 %vm1495_vm7, %v1474_v30  ;;  %v5313_v30 = vpack.c.bf16 %v1674_v28, %v1673_v27  ;;  %v5352_v27 = vpack.c.bf16 %v2019_v26, %v2018_v25  ;;  %v4389_v28 = vld [vmem:[%s8446_s1 + $0x48] sm:$0xff] }
 0x35c   :  { %5258 = vmatprep.subr.bf16.mxu0 %v5858_v13  ;;  %v4383_v25 = vld [vmem:[%s8445_s0 + $0x28] sm:$0xff] }
 0x35d   :  { %5314 = vmatpush3.bf16.msra.mxu1 %v5313_v30  ;;  %v2020_v30 = vld [vmem:[%s8456_s11 + $0x30] sm:$0x3] }
 0x35e   :  { %5330 = vmatprep.subr.bf16.mxu1 %v5858_v13 }
 0x35f   :  { %5260 = vmatpush1.bf16.msra.mxu0 %v5259_v35 }
 0x360   :  { %5261 = vmatprep.subr.bf16.mxu0 %v5858_v13 }
 0x363   :  { %5263 = vmatpush1.bf16.msra.mxu0 %v5262_v38  ;;  %v4369_v38 = vld [vmem:[%s8454_s9 + $0xf0] sm:$0xff] }
 0x364   :  { %5264 = vmatprep.subr.bf16.mxu0 %v5858_v13  ;;  %v5331_v46 = vpack.c.bf16 %v4370_v39, %v4369_v38 }
 0x367   :  { %5266 = vmatpush1.bf16.msra.mxu0 %v5265_v41 }
 0x368   :  { %5267 = vmatprep.subr.bf16.mxu0 %v5858_v13 }
 0x36b   :  { %5269 = vmatpush1.bf16.msra.mxu0 %v5268_v44 }
 0x36c   :  { %5270 = vmatprep.subr.bf16.mxu0 %v5858_v13 }
 0x36f   :  { %5272 = vmatpush1.bf16.msra.mxu0 %v5271_v47  ;;  %v4360_v47 = vld [vmem:[%s8454_s9 + $0xb0] sm:$0xff] }
 0x370   :  { %5273 = vmatprep.subr.bf16.mxu0 %v5858_v13  ;;  %v5319_v54 = vpack.c.bf16 %v4361_v48, %v4360_v47  ;;  %v4395_v47 = vld [vmem:[%s8446_s1 + $0x78] sm:$0xf] }
 0x373   :  { %5275 = vmatpush1.bf16.msra.mxu0 %v5274_v50  ;;  %v4371_v50 = vld [vmem:[%s8454_s9 + $0x100] sm:$0xff] }
 0x374   :  { %5276 = vmatprep.subr.bf16.mxu0 %v5858_v13 }
 0x377   :  { %5278 = vmatpush1.bf16.msra.mxu0 %v5277_v55  ;;  %v5334_v55 = vpack.c.bf16 %v4372_v52, %v4371_v50 }
 0x378   :  { %5279 = vmatprep.subr.bf16.mxu0 %v5858_v13 }
 0x37b   :  { %5281 = vmatpush1.bf16.msra.mxu0 %v5280_v58  ;;  %v4373_v58 = vld [vmem:[%s8454_s9 + $0x110] sm:$0xff] }
 0x37c   :  { %5282 = vmatprep.subr.bf16.mxu0 %v5858_v13 }
 0x37f   :  { %5284 = vmatpush1.bf16.msra.mxu0 %v5283_v61  ;;  %v5337_v61 = vpack.c.bf16 %v4374_v59, %v4373_v58  ;;  %v5364_v59 = vpack.c.bf16 %v2109_v57, %v2107_v56  ;;  %v4424_v57 = vld [vmem:[%s8445_s0 + $0x33] sm:$0xff] }
 0x380   :  { %5285 = vmatprep.subr.bf16.mxu0 %v5858_v13 }
 0x382   :  { %1654 = vmatmul.mubr.f32.vlgmr.msra.gmra.mrb[14].mxu0 %v1473_v32 }
 0x383   :  { %5287 = vmatpush3.bf16.msra.mxu0 %v5286_v1  ;;  %4747 = vmatprep.mubr.msk.f32.mxu0 %vm5859_vm8, %v5856_v7  ;;  %v4376_v1 = vld [vmem:[%s8454_s9 + $0x128] sm:$0xff] }
 0x384   :  { %5288 = vmatprep.subr.bf16.mxu0 %v5858_v13  ;;  %v5340_v3 = vpack.c.bf16 %v4376_v1, %v4375_v0  ;;  %v4385_v0 = vld [vmem:[%s8445_s0 + $0x21] sm:$0xff] }
 0x387   :  { %5290 = vmatpush3.bf16.msra.mxu0 %v5289_v9  ;;  %v5328_v9 = vpack.c.bf16 %v4367_v5, %v4366_v4  ;;  %v2112_v4 = vld [vmem:[%s8446_s1 + $0x30] sm:$0xf]  ;;  %v4410_v5 = vld [vmem:[%s8446_s1 + $0x88] sm:$0xff] }
 0x388   :  { %5291 = vmatprep.subr.bf16.mxu0 %v5858_v13 }
 0x38b   :  { %5293 = vmatpush3.bf16.msra.mxu0 %v5292_v16 }
 0x38c   :  { %5294 = vmatprep.subr.bf16.mxu0 %v5858_v13 }
 0x38f   :  { %5296 = vmatpush3.bf16.msra.mxu0 %v5295_v22  ;;  %v5346_v22 = vpack.c.bf16 %v2015_v20, %v2014_v19 }
 0x390   :  { %5297 = vmatprep.subr.bf16.mxu0 %v5858_v13 }
 0x393   :  { %5299 = vmatpush3.bf16.msra.mxu0 %v5298_v29  ;;  %v4391_v29 = vld [vmem:[%s8446_s1 + $0x58] sm:$0xff] }
 0x394   :  { %5315 = vmatprep.subr.bf16.mxu0 %v5858_v13 }
 0x42d   :  { %v1565_v31 = vpop.f32.mrb[12].mxu0 }
 0x42e   :  { %v1567_v32 = vpop.f32.mrb[13].mxu0 }
 0x455   :  { %v1655_v33 = vpop.f32.mrb[14].mxu0 }
 0x456   :  { %v1659_v34 = vmax.f32 %v1565_v31, %v1655_v33  ;;  %v1657_v35 = vpop.f32.mrb[15].mxu0  ;;  %v5354_v31 = vpack.c.bf16 %v4391_v29, %v4389_v28  ;;  %v4384_v28 = vld [vmem:[%s8445_s0 + $0x30] sm:$0xff]  ;;  %v4425_v29 = vld [vmem:[%s8446_s1 + $0xc0] sm:$0xff] }
 0x458   :  { %1661 = vst.msk [vmem:[#allocation4] sm:$0xff] %vm1660_vm9, %v1659_v34 }
 0x45f   :  { %v1675_v40 = vld [vmem:[#allocation4 + $0x2] sm:$0x1]  ;;  %v1676_v41 = vld [vmem:[#allocation4 + $0x3] sm:$0x1]  ;;  %v1662_v42 = vld [vmem:[#allocation4] sm:$0x1] }
 0x460   :  { %v1677_v44 = vmax.f32 %v1675_v40, %v1676_v41  ;;  %v1663_v45 = vld [vmem:[#allocation4 + $0x1] sm:$0x1]  ;;  %v1835_v12 = vld [vmem:[#allocation4 + $0x4] sm:$0x1]  ;;  %v1836_v14 = vld [vmem:[#allocation4 + $0x5] sm:$0x1] }
 0x461   :  { %v1664_v49 = vmax.f32 %v1662_v42, %v1663_v45  ;;  %v1923_v15 = vld [vmem:[#allocation4 + $0x6] sm:$0x1]  ;;  %v1924_v16 = vld [vmem:[#allocation4 + $0x7] sm:$0x1]  ;;  %v1837_v17 = vmax.f32 %v1835_v12, %v1836_v14  ;;  %v2011_v41 = vld [vmem:[%s8455_s10] sm:$0x1] }
 0x462   :  { %4748 = vmatmul.mubr.msk.f32.vlgmr.msra.gmra.mrb[16].mxu0 %vm1660_vm9, %v1677_v44  ;;  %v1925_v18 = vmax.f32 %v1923_v15, %v1924_v16  ;;  %v4388_v44 = vld [vmem:[%s8446_s1 + $0x40] sm:$0xff]  ;;  %v4390_v45 = vld [vmem:[%s8446_s1 + $0x50] sm:$0xff]  ;;  %v4414_v16 = vld [vmem:[%s8446_s1 + $0xa8] sm:$0xff] }
 0x463   :  { %4771 = vmatmul.mubr.msk.f32.vlgmr.msra.gmra.mrb[8].mxu1 %vm1660_vm9, %v1664_v49  ;;  %5317 = vmatpush3.bf16.msra.mxu0 %v5316_v43  ;;  %v5356_v49 = vpack.c.bf16 %v4390_v45, %v4388_v44  ;;  %v4387_v12 = vld [vmem:[%s8445_s0 + $0x31] sm:$0xff]  ;;  %v4409_v14 = vld [vmem:[%s8446_s1 + $0x80] sm:$0xff] }
 0x464   :  { %5332 = vmatpush3.bf16.msra.mxu1 %v5331_v46  ;;  %5318 = vmatprep.subr.bf16.mxu0 %v5858_v13  ;;  %v4393_v46 = vld [vmem:[%s8446_s1 + $0x68] sm:$0xff]  ;;  %v4411_v15 = vld [vmem:[%s8446_s1 + $0x90] sm:$0xff]  ;;  %v4441_v44 = vld [vmem:[%s8446_s1 + $0x100] sm:$0xff] }
 0x465   :  { %5333 = vmatprep.subr.bf16.mxu1 %v5858_v13  ;;  %4793 = vmatprep.mubr.msk.f32.mxu0 %vm5859_vm8, %v5856_v7  ;;  %v5358_v52 = vpack.c.bf16 %v4395_v47, %v4393_v46  ;;  %v5376_v19 = vpack.c.bf16 %v4411_v15, %v4409_v14  ;;  %v4443_v45 = vld [vmem:[%s8446_s1 + $0x110] sm:$0xff]  ;;  %v4446_v46 = vld [vmem:[%s8446_s1 + $0x128] sm:$0xff]  ;;  %v4448_v47 = vld [vmem:[%s8446_s1 + $0x138] sm:$0xf] }
 0x466   :  { %4816 = vmatprep.mubr.msk.f32.mxu1 %vm5859_vm8, %v5856_v7  ;;  %v2814_v14 = vld [vmem:[%s8449_s4 + $0x28] sm:$0xff] }
 0x467   :  { %5320 = vmatpush3.bf16.msra.mxu0 %v5319_v54  ;;  %v4392_v54 = vld [vmem:[%s8446_s1 + $0x60] sm:$0xff] }
 0x468   :  { %5335 = vmatpush3.bf16.msra.mxu1 %v5334_v55  ;;  %5321 = vmatprep.subr.bf16.mxu0 %v5858_v13  ;;  %v4394_v55 = vld [vmem:[%s8446_s1 + $0x70] sm:$0xf] }
 0x469   :  { %5336 = vmatprep.subr.bf16.mxu1 %v5858_v13  ;;  %v5361_v58 = vpack.c.bf16 %v4394_v55, %v4392_v54  ;;  %v4447_v54 = vld [vmem:[%s8446_s1 + $0x130] sm:$0xf] }
 0x46a   :  { %v4423_v55 = vld [vmem:[%s8445_s0 + $0x2b] sm:$0xff] }
 0x46b   :  { %5323 = vmatpush3.bf16.msra.mxu0 %v5322_v60  ;;  %v2106_v60 = vld [vmem:[%s8446_s1] sm:$0xff] }
 0x46c   :  { %5338 = vmatpush3.bf16.msra.mxu1 %v5337_v61  ;;  %5324 = vmatprep.subr.bf16.mxu0 %v5858_v13  ;;  %v2108_v61 = vld [vmem:[%s8446_s1 + $0x10] sm:$0xff] }
 0x46d   :  { %5339 = vmatprep.subr.bf16.mxu1 %v5858_v13  ;;  %v5366_v1 = vpack.c.bf16 %v2108_v61, %v2106_v60  ;;  %v2690_v60 = vld [vmem:[%s8448_s3] sm:$0xff]  ;;  %v2691_v61 = vld [vmem:[%s8448_s3 + $0x8] sm:$0xff] }
 0x46f   :  { %5326 = vmatpush3.bf16.msra.mxu0 %v5325_v2  ;;  %v5368_v2 = vpack.c.bf16 %v2113_v63, %v2111_v62  ;;  %v2809_v62 = vld [vmem:[%s8449_s4] sm:$0xff]  ;;  %v5405_v63 = vpack.c.bf16 %v2691_v61, %v2690_v60  ;;  %v2711_v61 = vld [vmem:[%s8448_s3 + $0xa8] sm:$0xff] }
 0x470   :  { %5341 = vmatpush3.bf16.msra.mxu1 %v5340_v3  ;;  %5327 = vmatprep.subr.bf16.mxu0 %v5858_v13  ;;  %v2110_v3 = vld [vmem:[%s8446_s1 + $0x20] sm:$0xff] }
 0x471   :  { %5342 = vmatprep.subr.bf16.mxu1 %v5858_v13  ;;  %v2710_v60 = vld [vmem:[%s8448_s3 + $0xa0] sm:$0xff] }
 0x473   :  { %5329 = vmatpush3.bf16.msra.mxu0 %v5328_v9  ;;  %v5371_v9 = vpack.c.bf16 %v2112_v4, %v2110_v3  ;;  %v2693_v3 = vld [vmem:[%s8448_s3 + $0x18] sm:$0xff]  ;;  %v2811_v4 = vld [vmem:[%s8449_s4 + $0x10] sm:$0xff] }
 0x474   :  { %5344 = vmatpush3.bf16.msra.mxu1 %v5343_v11  ;;  %5345 = vmatprep.subr.bf16.mxu0 %v5858_v13  ;;  %v5374_v11 = vpack.c.bf16 %v4412_v6, %v4410_v5  ;;  %v2812_v6 = vld [vmem:[%s8449_s4 + $0x18] sm:$0xff] }
 0x475   :  { %5404 = vmatprep.subr.bf16.mxu1 %v5858_v13 }
 0x476   :  { %4794 = vmatmul.mubr.msk.f32.vlgmr.msra.gmra.mrb[18].mxu0 %vm1660_vm9, %v1837_v17  ;;  %v4416_v17 = vld [vmem:[%s8446_s1 + $0xb8] sm:$0xf] }
 0x477   :  { %4817 = vmatmul.mubr.msk.f32.vlgmr.msra.gmra.mrb[10].mxu1 %vm1660_vm9, %v1925_v18  ;;  %4833 = vmatprep.mubr.msk.f32.mxu0 %vm5859_vm8, %v5856_v7  ;;  %v4382_v18 = vld [vmem:[%s8445_s0 + $0x20] sm:$0xff]  ;;  %v5378_v20 = vpack.c.bf16 %v4416_v17, %v4414_v16  ;;  %v2696_v17 = vld [vmem:[%s8448_s3 + $0x30] sm:$0xff] }
 0x478   :  { %5347 = vmatpush3.bf16.msra.mxu0 %v5346_v22  ;;  %v4415_v22 = vld [vmem:[%s8446_s1 + $0xb0] sm:$0xf]  ;;  %5406 = vmatpush1.bf16.msra.mxu1 %v5405_v63  ;;  %v2830_v63 = vld [vmem:[%s8449_s4 + $0xa8] sm:$0xff] }
 0x479   :  { %5348 = vmatprep.subr.bf16.mxu0 %v5858_v13  ;;  %v5381_v26 = vpack.c.bf16 %v4415_v22, %v4413_v21  ;;  %5407 = vmatprep.subr.bf16.mxu1 %v5858_v13 }
 0x47c   :  { %5350 = vmatpush3.bf16.msra.mxu0 %v5349_v24  ;;  %v4428_v24 = vld [vmem:[%s8446_s1 + $0xd8] sm:$0xff] }
 0x47d   :  { %5351 = vmatprep.subr.bf16.mxu0 %v5858_v13 }
 0x480   :  { %5353 = vmatpush3.bf16.msra.mxu0 %v5352_v27  ;;  %v5384_v27 = vpack.c.bf16 %v4428_v24, %v4426_v23  ;;  %v2698_v23 = vld [vmem:[%s8448_s3 + $0x40] sm:$0xff]  ;;  %v2699_v24 = vld [vmem:[%s8448_s3 + $0x48] sm:$0xff] }
 0x481   :  { %4831 = vmatprep.subr.mxu0 %v5856_v7 }
 0x484   :  { %4832 = vmatpush3.msk.msra.mxu0 %vm2026_vm10, %v2020_v30  ;;  %v4427_v30 = vld [vmem:[%s8446_s1 + $0xd0] sm:$0xff] }
 0x485   :  { %5355 = vmatprep.subr.bf16.mxu0 %v5354_v31  ;;  %v4430_v31 = vld [vmem:[%s8446_s1 + $0xe8] sm:$0xff] }
 0x535   :  { %v1758_v32 = vpop.f32.mrb[16].mxu0 }
 0x536   :  { %v1831_v33 = vpop.f32.mrb[8].mxu1  ;;  %v4749_v34 = vpop.f32.mrb[17].mxu0 }
 0x537   :  { %v1832_v35 = vadd.f32 %v1831_v33, %v1758_v32  ;;  %v4772_v36 = vpop.f32.mrb[9].mxu1  ;;  %v4432_v32 = vld [vmem:[%s8446_s1 + $0xf8] sm:$0xf]  ;;  %v4406_v33 = vld [vmem:[%s8445_s0 + $0x22] sm:$0xff]  ;;  %v5386_v34 = vpack.c.bf16 %v4427_v30, %v4425_v29  ;;  %v2700_v29 = vld [vmem:[%s8448_s3 + $0x50] sm:$0xff] }
 0x538   :  { %v4429_v36 = vld [vmem:[%s8446_s1 + $0xe0] sm:$0xff]  ;;  %v2701_v30 = vld [vmem:[%s8448_s3 + $0x58] sm:$0xff] }
 0x549   :  { %v1918_v37 = vpop.f32.mrb[18].mxu0 }
 0x54a   :  { %v1922_v38 = vadd.f32 %v1918_v37, %v1832_v35  ;;  %v2006_v39 = vpop.f32.mrb[10].mxu1  ;;  %v4795_v40 = vpop.f32.mrb[19].mxu0  ;;  %v5388_v35 = vpack.c.bf16 %v4432_v32, %v4430_v31  ;;  %v4431_v37 = vld [vmem:[%s8446_s1 + $0xf0] sm:$0xf]  ;;  %v2820_v32 = vld [vmem:[%s8449_s4 + $0x58] sm:$0xff] }
 0x54b   :  { %v4818_v42 = vpop.f32.mrb[11].mxu1  ;;  %v4407_v40 = vld [vmem:[%s8445_s0 + $0x2a] sm:$0xff] }
 0x54c   :  { %v2010_v43 = vadd.f32 %v2006_v39, %v1922_v38  ;;  %v4442_v38 = vld [vmem:[%s8446_s1 + $0x108] sm:$0xff]  ;;  %v4444_v39 = vld [vmem:[%s8446_s1 + $0x118] sm:$0xff]  ;;  %v2819_v31 = vld [vmem:[%s8449_s4 + $0x50] sm:$0xff] }
 0x54d   :  { %v5394_v42 = vpack.c.bf16 %v4444_v39, %v4442_v38  ;;  %v2822_v38 = vld [vmem:[%s8449_s4 + $0x68] sm:$0xff] }
 0x54e   :  { %v2012_v48 = vadd.f32 %v2011_v41, %v2010_v43  ;;  %v5391_v41 = vpack.c.bf16 %v4431_v37, %v4429_v36  ;;  %v4408_v43 = vld [vmem:[%s8445_s0 + $0x32] sm:$0xff]  ;;  %v2703_v36 = vld [vmem:[%s8448_s3 + $0x68] sm:$0xff]  ;;  %v2821_v37 = vld [vmem:[%s8449_s4 + $0x60] sm:$0xff] }
 0x550   :  { %v2013_v50 = vmax.f32 %v2012_v48, 0.0  ;;  %v4422_v48 = vld [vmem:[%s8445_s0 + $0x23] sm:$0xff] }
 0x552   :  { %4834 = vmatmul.mubr.msk.f32.vlgmr.msra.gmra.mrb[20].mxu0 %vm2022_vm11, %v2013_v50  ;;  %v5398_v50 = vpack.c.bf16 %v4448_v47, %v4446_v46  ;;  %v2706_v47 = vld [vmem:[%s8448_s3 + $0x80] sm:$0xff] }
 0x553   :  { %5357 = vmatpush1.bf16.msra.mxu0 %v5356_v49  ;;  %2204 = vmatprep.mubr.f32.mxu0 %v5856_v7  ;;  %v5396_v49 = vpack.c.bf16 %v4443_v45, %v4441_v44  ;;  %v2824_v44 = vld [vmem:[%s8449_s4 + $0x78] sm:$0xff] }
 0x554   :  { %5360 = vmatprep.subr.msk.bf16.mxu0 %vm5950_vm2, %v5358_v52  ;;  %v4445_v52 = vld [vmem:[%s8446_s1 + $0x120] sm:$0xff] }
 0x555   :  { %v5401_v56 = vpack.c.bf16 %v4447_v54, %v4445_v52 }
 0x557   :  { %5363 = vmatpush1.bf16.msk.msra.mxu0 %vm5950_vm2, %v5361_v58  ;;  %v4438_v58 = vld [vmem:[%s8445_s0 + $0x24] sm:$0xff] }
 0x558   :  { %5365 = vmatprep.subr.bf16.mxu0 %v5364_v59  ;;  %v4440_v59 = vld [vmem:[%s8445_s0 + $0x34] sm:$0xff] }
 0x55a   :  { %4398 = vmatmul.mubr.msk.f32.vlgmr.msra.gmra.mrb[22].mxu0 %vm68_vm3, %v4385_v0  ;;  %v2810_v0 = vld [vmem:[%s8449_s4 + $0x8] sm:$0xff] }
 0x55b   :  { %5367 = vmatpush1.bf16.msra.mxu0 %v5366_v1  ;;  %2210 = vmatprep.mubr.f32.mxu0 %v5856_v7  ;;  %v5450_v1 = vpack.c.bf16 %v2810_v0, %v2809_v62  ;;  %v2829_v62 = vld [vmem:[%s8449_s4 + $0xa0] sm:$0xff]  ;;  %v5435_v0 = vpack.c.bf16 %v2711_v61, %v2710_v60  ;;  %v4465_v61 = vld [vmem:[%s8450_s5 + $0x118] sm:$0xff] }
 0x55c   :  { %5370 = vmatprep.subr.msk.bf16.mxu0 %vm5950_vm2, %v5368_v2  ;;  %v2692_v2 = vld [vmem:[%s8448_s3 + $0x10] sm:$0xff] }
 0x55d   :  { %v5408_v5 = vpack.c.bf16 %v2693_v3, %v2692_v2  ;;  %v2712_v2 = vld [vmem:[%s8448_s3 + $0xb0] sm:$0xff]  ;;  %v2713_v3 = vld [vmem:[%s8448_s3 + $0xb8] sm:$0xff] }
 0x55e   :  { %4399 = vmatmul.mubr.msk.f32.gmra.mrb[24].mxu0 %vm68_vm3, %v4386_v8  ;;  %v5453_v8 = vpack.c.bf16 %v2812_v6, %v2811_v4  ;;  %v2831_v4 = vld [vmem:[%s8449_s4 + $0xb0] sm:$0xff]  ;;  %v5438_v6 = vpack.c.bf16 %v2713_v3, %v2712_v2  ;;  %v4469_v3 = vld [vmem:[%s8450_s5 + $0x138] sm:$0xff] }
 0x55f   :  { %2216 = vmatprep.mubr.f32.mxu0 %v5856_v7  ;;  %5373 = vmatpush1.bf16.msk.msra.mxu0 %vm5950_vm2, %v5371_v9  ;;  %v2694_v9 = vld [vmem:[%s8448_s3 + $0x20] sm:$0xff] }
 0x560   :  { %5375 = vmatprep.subr.bf16.mxu0 %v5374_v11  ;;  %v2695_v11 = vld [vmem:[%s8448_s3 + $0x28] sm:$0xff]  ;;  %5409 = vmatpush1.bf16.msra.mxu1 %v5408_v5  ;;  %v2832_v5 = vld [vmem:[%s8449_s4 + $0xb8] sm:$0xff] }
 0x561   :  { %v5411_v15 = vpack.c.bf16 %v2695_v11, %v2694_v9  ;;  %5410 = vmatprep.subr.bf16.mxu1 %v5858_v13  ;;  %v2714_v9 = vld [vmem:[%s8448_s3 + $0xc0] sm:$0xff]  ;;  %v2715_v11 = vld [vmem:[%s8448_s3 + $0xc8] sm:$0xff] }
 0x562   :  { %4400 = vmatmul.mubr.msk.f32.gmra.mrb[26].mxu0 %vm68_vm3, %v4387_v12  ;;  %v2813_v12 = vld [vmem:[%s8449_s4 + $0x20] sm:$0xff] }
 0x563   :  { %2302 = vmatprep.mubr.f32.mxu0 %v5856_v7  ;;  %v5456_v16 = vpack.c.bf16 %v2814_v14, %v2813_v12  ;;  %v2833_v12 = vld [vmem:[%s8449_s4 + $0xc0] sm:$0xff]  ;;  %v2834_v14 = vld [vmem:[%s8449_s4 + $0xc8] sm:$0xff] }
 0x564   :  { %5412 = vmatpush1.bf16.msra.mxu1 %v5411_v15  ;;  %v5441_v15 = vpack.c.bf16 %v2715_v11, %v2714_v9  ;;  %v4473_v11 = vld [vmem:[%s8450_s5 + $0x158] sm:$0xff] }
 0x565   :  { %5413 = vmatprep.subr.bf16.mxu1 %v5858_v13 }
 0x566   :  { %4403 = vmatmul.mubr.msk.f32.vlgmr.msra.gmra.mrb[22].mxu0 %vm68_vm3, %v4382_v18  ;;  %v2697_v18 = vld [vmem:[%s8448_s3 + $0x38] sm:$0xff] }
 0x567   :  { %5377 = vmatpush1.bf16.msra.mxu0 %v5376_v19  ;;  %2308 = vmatprep.mubr.f32.mxu0 %v5856_v7  ;;  %v2815_v19 = vld [vmem:[%s8449_s4 + $0x30] sm:$0xff]  ;;  %v5414_v21 = vpack.c.bf16 %v2697_v18, %v2696_v17  ;;  %v2717_v18 = vld [vmem:[%s8448_s3 + $0xd8] sm:$0xff] }
 0x568   :  { %5380 = vmatprep.subr.msk.bf16.mxu0 %vm5950_vm2, %v5378_v20  ;;  %v2816_v20 = vld [vmem:[%s8449_s4 + $0x38] sm:$0xff]  ;;  %v2716_v17 = vld [vmem:[%s8448_s3 + $0xd0] sm:$0xff] }
 0x569   :  { %v5459_v22 = vpack.c.bf16 %v2816_v20, %v2815_v19  ;;  %5415 = vmatpush1.bf16.msra.mxu1 %v5414_v21  ;;  %v2835_v19 = vld [vmem:[%s8449_s4 + $0xd0] sm:$0xff]  ;;  %v5444_v20 = vpack.c.bf16 %v2717_v18, %v2716_v17  ;;  %v2836_v21 = vld [vmem:[%s8449_s4 + $0xd8] sm:$0xff] }
 0x56a   :  { %4404 = vmatmul.mubr.msk.f32.gmra.mrb[24].mxu0 %vm68_vm3, %v4383_v25  ;;  %v2817_v25 = vld [vmem:[%s8449_s4 + $0x40] sm:$0xff]  ;;  %5416 = vmatprep.subr.bf16.mxu1 %v5858_v13  ;;  %v4477_v18 = vld [vmem:[%s8450_s5 + $0x178] sm:$0xff] }
 0x56b   :  { %2314 = vmatprep.mubr.f32.mxu0 %v5856_v7  ;;  %5383 = vmatpush1.bf16.msk.msra.mxu0 %vm5950_vm2, %v5381_v26  ;;  %v2818_v26 = vld [vmem:[%s8449_s4 + $0x48] sm:$0xff] }
 0x56c   :  { %5385 = vmatprep.subr.bf16.mxu0 %v5384_v27  ;;  %v5417_v27 = vpack.c.bf16 %v2699_v24, %v2698_v23  ;;  %v2718_v23 = vld [vmem:[%s8448_s3 + $0xe0] sm:$0xff]  ;;  %v2719_v24 = vld [vmem:[%s8448_s3 + $0xe8] sm:$0xff] }
 0x56e   :  { %4405 = vmatmul.mubr.msk.f32.gmra.mrb[26].mxu0 %vm68_vm3, %v4384_v28  ;;  %v5462_v28 = vpack.c.bf16 %v2818_v26, %v2817_v25  ;;  %5418 = vmatpush1.bf16.msra.mxu1 %v5417_v27  ;;  %v2837_v25 = vld [vmem:[%s8449_s4 + $0xe0] sm:$0xff]  ;;  %v5447_v26 = vpack.c.bf16 %v2719_v24, %v2718_v23  ;;  %v2838_v27 = vld [vmem:[%s8449_s4 + $0xe8] sm:$0xff]  ;;  %v4481_v24 = vld [vmem:[%s8450_s5 + $0x198] sm:$0xff] }
 0x56f   :  { %2411 = vmatprep.mubr.f32.mxu0 %v5856_v7  ;;  %5419 = vmatprep.subr.bf16.mxu1 %v5858_v13 }
 0x572   :  { %4419 = vmatmul.mubr.msk.f32.vlgmr.msra.gmra.mrb[22].mxu0 %vm68_vm3, %v4406_v33  ;;  %v5420_v33 = vpack.c.bf16 %v2701_v30, %v2700_v29  ;;  %v4461_v29 = vld [vmem:[%s8450_s5 + $0xf8] sm:$0xff]  ;;  %v4463_v30 = vld [vmem:[%s8450_s5 + $0x108] sm:$0xff] }
 0x573   :  { %5387 = vmatpush1.bf16.msra.mxu0 %v5386_v34  ;;  %2417 = vmatprep.mubr.f32.mxu0 %v5856_v7  ;;  %v5465_v34 = vpack.c.bf16 %v2820_v32, %v2819_v31  ;;  %v5494_v31 = vpack.c.bf16 %v4463_v30, %v4461_v29  ;;  %v2021_v32 = vld [vmem:[%s8457_s12] sm:$0x1]  ;;  %v4485_v30 = vld [vmem:[%s8450_s5 + $0x1b8] sm:$0xff] }
 0x574   :  { %5390 = vmatprep.subr.msk.bf16.mxu0 %vm5950_vm2, %v5388_v35  ;;  %v2702_v35 = vld [vmem:[%s8448_s3 + $0x60] sm:$0xff]  ;;  %5421 = vmatpush1.bf16.msra.mxu1 %v5420_v33 }
 0x575   :  { %v5423_v39 = vpack.c.bf16 %v2703_v36, %v2702_v35  ;;  %5422 = vmatprep.subr.bf16.mxu1 %v5858_v13  ;;  %v2666_v36 = vld [vmem:[%s8447_s2] sm:$0x3] }
 0x576   :  { %4420 = vmatmul.mubr.msk.f32.gmra.mrb[24].mxu0 %vm68_vm3, %v4407_v40  ;;  %v5468_v40 = vpack.c.bf16 %v2822_v38, %v2821_v37  ;;  %v2671_v37 = vrot.slane %v2666_v36, %v6367_v51  ;;  %v2675_v38 = vrot.slane %v2666_v36, %v6372_v53  ;;  %v4489_v36 = vld [vmem:[%s8450_s5 + $0x1d8] sm:$0xff] }
 0x577   :  { %2423 = vmatprep.mubr.f32.mxu0 %v5856_v7  ;;  %5393 = vmatpush1.bf16.msk.msra.mxu0 %vm5950_vm2, %v5391_v41  ;;  %v2704_v41 = vld [vmem:[%s8448_s3 + $0x70] sm:$0xff] }
 0x578   :  { %5395 = vmatprep.subr.bf16.mxu0 %v5394_v42  ;;  %v2705_v42 = vld [vmem:[%s8448_s3 + $0x78] sm:$0xff]  ;;  %5424 = vmatpush1.bf16.msra.mxu1 %v5423_v39 }
 0x579   :  { %v5426_v45 = vpack.c.bf16 %v2705_v42, %v2704_v41  ;;  %5425 = vmatprep.subr.bf16.mxu1 %v5858_v13  ;;  %v4460_v42 = vld [vmem:[%s8450_s5 + $0xf0] sm:$0xff] }
 0x57a   :  { %4421 = vmatmul.mubr.msk.f32.gmra.mrb[26].mxu0 %vm68_vm3, %v4408_v43  ;;  %v2823_v43 = vld [vmem:[%s8449_s4 + $0x70] sm:$0xff] }
 0x57b   :  { %2526 = vmatprep.mubr.f32.mxu0 %v5856_v7  ;;  %v5471_v46 = vpack.c.bf16 %v2824_v44, %v2823_v43  ;;  %v4462_v43 = vld [vmem:[%s8450_s5 + $0x100] sm:$0xff] }
 0x57c   :  { %5427 = vmatpush1.bf16.msra.mxu1 %v5426_v45 }
 0x57d   :  { %5428 = vmatprep.subr.bf16.mxu1 %v5858_v13 }
 0x57e   :  { %4435 = vmatmul.mubr.msk.f32.vlgmr.msra.gmra.mrb[22].mxu0 %vm68_vm3, %v4422_v48  ;;  %v2707_v48 = vld [vmem:[%s8448_s3 + $0x88] sm:$0xff] }
 0x57f   :  { %5397 = vmatpush1.bf16.msra.mxu0 %v5396_v49  ;;  %2532 = vmatprep.mubr.f32.mxu0 %v5856_v7  ;;  %v2825_v49 = vld [vmem:[%s8449_s4 + $0x80] sm:$0xff]  ;;  %v5429_v52 = vpack.c.bf16 %v2707_v48, %v2706_v47  ;;  %v5496_v47 = vpack.c.bf16 %v4462_v43, %v4460_v42 }
 0x580   :  { %5400 = vmatprep.subr.msk.bf16.mxu0 %vm5950_vm2, %v5398_v50  ;;  %v2826_v50 = vld [vmem:[%s8449_s4 + $0x88] sm:$0xff] }
 0x581   :  { %v5474_v54 = vpack.c.bf16 %v2826_v50, %v2825_v49  ;;  %5430 = vmatpush1.bf16.msra.mxu1 %v5429_v52 }
 0x582   :  { %4436 = vmatmul.mubr.msk.f32.gmra.mrb[24].mxu0 %vm68_vm3, %v4423_v55  ;;  %v2708_v55 = vld [vmem:[%s8448_s3 + $0x90] sm:$0xff]  ;;  %5431 = vmatprep.subr.bf16.mxu1 %v5858_v13 }
 0x583   :  { %2538 = vmatprep.mubr.f32.mxu0 %v5856_v7  ;;  %5403 = vmatpush1.bf16.msk.msra.mxu0 %vm5950_vm2, %v5401_v56  ;;  %v2709_v56 = vld [vmem:[%s8448_s3 + $0x98] sm:$0xff] }
 0x584   :  { %5449 = vmatprep.subr.bf16.mxu0 %v5858_v13 }
 0x586   :  { %4437 = vmatmul.mubr.msk.f32.gmra.mrb[26].mxu0 %vm68_vm3, %v4424_v57  ;;  %v2827_v57 = vld [vmem:[%s8449_s4 + $0x90] sm:$0xff] }
 0x587   :  { %2641 = vmatprep.mubr.f32.mxu0 %v5856_v7 }
 0x58a   :  { %4451 = vmatmul.mubr.msk.f32.vlgmr.msra.gmra.mrb[22].mxu0 %vm68_vm3, %v4438_v58  ;;  %v2828_v58 = vld [vmem:[%s8449_s4 + $0x98] sm:$0xff] }
 0x58b   :  { %2647 = vmatprep.mubr.f32.mxu0 %v5856_v7  ;;  %5451 = vmatpush1.bf16.msra.mxu0 %v5450_v1  ;;  %v5480_v1 = vpack.c.bf16 %v2830_v63, %v2829_v62  ;;  %v4467_v62 = vld [vmem:[%s8450_s5 + $0x128] sm:$0xff] }
 0x58c   :  { %5452 = vmatprep.subr.bf16.mxu0 %v5858_v13  ;;  %v5498_v63 = vpack.c.bf16 %v4467_v62, %v4465_v61 }
 0x58e   :  { %4452 = vmatmul.mubr.msk.f32.gmra.mrb[24].mxu0 %vm68_vm3, %v4439_v10  ;;  %v5432_v10 = vpack.c.bf16 %v2709_v56, %v2708_v55 }
 0x58f   :  { %2653 = vmatprep.mubr.f32.mxu0 %v5856_v7  ;;  %5454 = vmatpush1.bf16.msra.mxu0 %v5453_v8  ;;  %v5483_v8 = vpack.c.bf16 %v2832_v5, %v2831_v4  ;;  %v4471_v4 = vld [vmem:[%s8450_s5 + $0x148] sm:$0xff] }
 0x590   :  { %5455 = vmatprep.subr.bf16.mxu0 %v5858_v13  ;;  %5433 = vmatpush1.bf16.msra.mxu1 %v5432_v10  ;;  %v5502_v5 = vpack.c.bf16 %v4471_v4, %v4469_v3 }
 0x591   :  { %5434 = vmatprep.subr.bf16.mxu1 %v5858_v13 }
 0x592   :  { %4453 = vmatmul.mubr.msk.f32.gmra.mrb[26].mxu0 %vm68_vm3, %v4440_v59  ;;  %v5477_v59 = vpack.c.bf16 %v2828_v58, %v2827_v57 }
 0x593   :  { %5457 = vmatpush1.bf16.msra.mxu0 %v5456_v16  ;;  %v5486_v16 = vpack.c.bf16 %v2834_v14, %v2833_v12  ;;  %v4475_v12 = vld [vmem:[%s8450_s5 + $0x168] sm:$0xff] }
 0x594   :  { %5458 = vmatprep.subr.bf16.mxu0 %v5858_v13  ;;  %5436 = vmatpush1.bf16.msra.mxu1 %v5435_v0  ;;  %v4464_v0 = vld [vmem:[%s8450_s5 + $0x110] sm:$0xff]  ;;  %v5506_v14 = vpack.c.bf16 %v4475_v12, %v4473_v11 }
 0x595   :  { %5437 = vmatprep.subr.bf16.mxu1 %v5858_v13 }
 0x597   :  { %5460 = vmatpush1.bf16.msra.mxu0 %v5459_v22  ;;  %v5489_v22 = vpack.c.bf16 %v2836_v21, %v2835_v19  ;;  %v4479_v19 = vld [vmem:[%s8450_s5 + $0x188] sm:$0xff]  ;;  %v4476_v21 = vld [vmem:[%s8450_s5 + $0x170] sm:$0xff] }
 0x598   :  { %5461 = vmatprep.subr.bf16.mxu0 %v5858_v13  ;;  %5439 = vmatpush1.bf16.msra.mxu1 %v5438_v6  ;;  %v4468_v6 = vld [vmem:[%s8450_s5 + $0x130] sm:$0xff] }
 0x599   :  { %5440 = vmatprep.subr.bf16.mxu1 %v5858_v13 }
 0x59b   :  { %5463 = vmatpush1.bf16.msra.mxu0 %v5462_v28  ;;  %v5492_v28 = vpack.c.bf16 %v2838_v27, %v2837_v25  ;;  %v4483_v25 = vld [vmem:[%s8450_s5 + $0x1a8] sm:$0xff]  ;;  %v4480_v27 = vld [vmem:[%s8450_s5 + $0x190] sm:$0xff] }
 0x59c   :  { %5464 = vmatprep.subr.bf16.mxu0 %v5858_v13  ;;  %5442 = vmatpush1.bf16.msra.mxu1 %v5441_v15  ;;  %v4472_v15 = vld [vmem:[%s8450_s5 + $0x150] sm:$0xff] }
 0x59d   :  { %5443 = vmatprep.subr.bf16.mxu1 %v5858_v13 }
 0x59f   :  { %5466 = vmatpush1.bf16.msra.mxu0 %v5465_v34 }
 0x5a0   :  { %5467 = vmatprep.subr.bf16.mxu0 %v5858_v13  ;;  %5445 = vmatpush1.bf16.msra.mxu1 %v5444_v20  ;;  %v5510_v20 = vpack.c.bf16 %v4479_v19, %v4477_v18 }
 0x5a1   :  { %5446 = vmatprep.subr.bf16.mxu1 %v5858_v13 }
 0x5a3   :  { %5469 = vmatpush1.bf16.msra.mxu0 %v5468_v40 }
 0x5a4   :  { %5470 = vmatprep.subr.bf16.mxu0 %v5858_v13  ;;  %5448 = vmatpush1.bf16.msra.mxu1 %v5447_v26  ;;  %v5514_v26 = vpack.c.bf16 %v4483_v25, %v4481_v24 }
 0x5a5   :  { %5495 = vmatprep.subr.bf16.mxu1 %v5494_v31  ;;  %v4487_v31 = vld [vmem:[%s8450_s5 + $0x1c8] sm:$0xff] }
 0x5a7   :  { %5472 = vmatpush1.bf16.msra.mxu0 %v5471_v46 }
 0x5a8   :  { %5473 = vmatprep.subr.bf16.mxu0 %v5858_v13 }
 0x5ab   :  { %5475 = vmatpush1.bf16.msra.mxu0 %v5474_v54 }
 0x5ac   :  { %5476 = vmatprep.subr.bf16.mxu0 %v5858_v13 }
 0x5af   :  { %5478 = vmatpush1.bf16.msra.mxu0 %v5477_v59 }
 0x5b0   :  { %5479 = vmatprep.subr.bf16.mxu0 %v5858_v13 }
 0x5b3   :  { %5481 = vmatpush1.bf16.msra.mxu0 %v5480_v1  ;;  %v4466_v1 = vld [vmem:[%s8450_s5 + $0x120] sm:$0xff] }
 0x5b4   :  { %5482 = vmatprep.subr.bf16.mxu0 %v5858_v13  ;;  %v5500_v2 = vpack.c.bf16 %v4466_v1, %v4464_v0 }
 0x5b7   :  { %5484 = vmatpush1.bf16.msra.mxu0 %v5483_v8  ;;  %v4470_v8 = vld [vmem:[%s8450_s5 + $0x140] sm:$0xff] }
 0x5b8   :  { %5485 = vmatprep.subr.bf16.mxu0 %v5858_v13  ;;  %v5504_v9 = vpack.c.bf16 %v4470_v8, %v4468_v6 }
 0x5bb   :  { %5487 = vmatpush1.bf16.msra.mxu0 %v5486_v16  ;;  %v4474_v16 = vld [vmem:[%s8450_s5 + $0x160] sm:$0xff] }
 0x5bc   :  { %5488 = vmatprep.subr.bf16.mxu0 %v5858_v13  ;;  %v5508_v17 = vpack.c.bf16 %v4474_v16, %v4472_v15 }
 0x5bf   :  { %5490 = vmatpush1.bf16.msra.mxu0 %v5489_v22  ;;  %v4478_v22 = vld [vmem:[%s8450_s5 + $0x180] sm:$0xff] }
 0x5c0   :  { %5491 = vmatprep.subr.bf16.mxu0 %v5858_v13  ;;  %v5512_v23 = vpack.c.bf16 %v4478_v22, %v4476_v21 }
 0x5c3   :  { %5493 = vmatpush1.bf16.msra.mxu0 %v5492_v28  ;;  %v4482_v28 = vld [vmem:[%s8450_s5 + $0x1a0] sm:$0xff] }
 0x5c4   :  { %5634 = vmatprep.subr.bf16.mxu0 %v5858_v13  ;;  %v5516_v29 = vpack.c.bf16 %v4482_v28, %v4480_v27 }
 0x625   :  { %v2096_v33 = vpop.f32.mrb[20].mxu0 }
 0x626   :  { %v2097_v34 = vadd.f32 %v2096_v33, %v2021_v32  ;;  %v4835_v35 = vpop.f32.mrb[21].mxu0  ;;  %v5518_v32 = vpack.c.bf16 %v4487_v31, %v4485_v30  ;;  %v4484_v33 = vld [vmem:[%s8450_s5 + $0x1b0] sm:$0xff] }
 0x628   :  { %2101 = vst.msk [vmem:[#allocation5] sm:$0x1] %vm2100_vm12, %v2097_v34  ;;  %v4486_v34 = vld [vmem:[%s8450_s5 + $0x1c0] sm:$0xff] }
 0x629   :  { %v5520_v35 = vpack.c.bf16 %v4486_v34, %v4484_v33  ;;  %v3523_v33 = vld [vmem:[%s8452_s7 + $0x8] sm:$0xff]  ;;  %v3524_v34 = vld [vmem:[%s8452_s7 + $0x10] sm:$0xff] }
 0x65d   :  { %v2643_v39 = vpop.f32.mrb[22].mxu0 }
 0x65e   :  { %v2678_v40 = vadd.f32 %v2671_v37, %v2643_v39  ;;  %v2645_v41 = vpop.f32.mrb[23].mxu0  ;;  %v4488_v39 = vld [vmem:[%s8450_s5 + $0x1d0] sm:$0xff] }
 0x65f   :  { %v2679_v44 = vadd.f32 %v2675_v38, %v2645_v41 }
 0x660   :  { %v2684_v48 = vmax.f32 %v2678_v40, 0.0 }
 0x661   :  { %v2685_v45 = vmax.f32 %v2679_v44, 0.0  ;;  %v2649_v46 = vpop.f32.mrb[24].mxu0 }
 0x662   :  { %v2680_v49 = vadd.f32 %v2671_v37, %v2649_v46  ;;  %v2651_v50 = vpop.f32.mrb[25].mxu0 }
 0x663   :  { %v2681_v52 = vadd.f32 %v2675_v38, %v2651_v50  ;;  %4454 = vmatprep.mubr.msk.f32.mxu1 %vm668_vm4, %v2685_v45  ;;  %4457 = vmatprep.mubr.msk.f32.mxu0 %vm668_vm4, %v2685_v45 }
 0x664   :  { %2794 = vmatmul.mubr.f32.vlgmr.msra.gmra.mrb[12].mxu1 %v2684_v48  ;;  %2904 = vmatmul.mubr.f32.vlgmr.msra.gmra.mrb[28].mxu0 %v2684_v48  ;;  %v2686_v56 = vmax.f32 %v2680_v49, 0.0 }
 0x665   :  { %v2687_v54 = vmax.f32 %v2681_v52, 0.0  ;;  %v2655_v55 = vpop.f32.mrb[26].mxu0  ;;  %5497 = vmatpush1.bf16.msra.mxu1 %v5496_v47 }
 0x666   :  { %v2682_v57 = vadd.f32 %v2671_v37, %v2655_v55  ;;  %v2657_v58 = vpop.f32.mrb[27].mxu0  ;;  %5499 = vmatprep.subr.bf16.mxu1 %v5498_v63  ;;  %v2977_v37 = vld [vmem:[%s8450_s5 + $0x8] sm:$0xff] }
 0x667   :  { %v2683_v10 = vadd.f32 %v2675_v38, %v2657_v58  ;;  %4455 = vmatprep.mubr.msk.f32.mxu1 %vm668_vm4, %v2687_v54  ;;  %4458 = vmatprep.mubr.msk.f32.mxu0 %vm668_vm4, %v2687_v54  ;;  %v2979_v38 = vld [vmem:[%s8450_s5 + $0x18] sm:$0xff] }
 0x668   :  { %2799 = vmatmul.mubr.f32.gmra.mrb[14].mxu1 %v2686_v56  ;;  %2909 = vmatmul.mubr.f32.gmra.mrb[30].mxu0 %v2686_v56  ;;  %v2688_v60 = vmax.f32 %v2682_v57, 0.0  ;;  %v5522_v40 = vpack.c.bf16 %v2979_v38, %v2977_v37  ;;  %v2976_v37 = vld [vmem:[%s8450_s5] sm:$0xff]  ;;  %v2978_v38 = vld [vmem:[%s8450_s5 + $0x10] sm:$0xff] }
 0x669   :  { %v2689_v59 = vmax.f32 %v2683_v10, 0.0  ;;  %5501 = vmatpush1.bf16.msra.mxu1 %v5500_v2 }
 0x66a   :  { %5503 = vmatprep.subr.bf16.mxu1 %v5502_v5 }
 0x66b   :  { %4456 = vmatprep.mubr.msk.f32.mxu1 %vm668_vm4, %v2689_v59  ;;  %4459 = vmatprep.mubr.msk.f32.mxu0 %vm668_vm4, %v2689_v59 }
 0x66c   :  { %2804 = vmatmul.mubr.f32.gmra.mrb[16].mxu1 %v2688_v60  ;;  %2914 = vmatmul.mubr.f32.gmra.mrb[32].mxu0 %v2688_v60 }
 0x66d   :  { %3104 = vmatprep.mubr.f32.mxu1 %v5856_v7  ;;  %5505 = vmatpush1.bf16.msra.mxu1 %v5504_v9 }
 0x66e   :  { %5507 = vmatprep.subr.bf16.mxu1 %v5506_v14 }
 0x671   :  { %5509 = vmatpush1.bf16.msra.mxu1 %v5508_v17 }
 0x672   :  { %5511 = vmatprep.subr.bf16.mxu1 %v5510_v20 }
 0x675   :  { %5513 = vmatpush1.bf16.msra.mxu1 %v5512_v23 }
 0x676   :  { %5515 = vmatprep.subr.bf16.mxu1 %v5514_v26 }
 0x679   :  { %5517 = vmatpush1.bf16.msra.mxu1 %v5516_v29 }
 0x67a   :  { %5519 = vmatprep.subr.bf16.mxu1 %v5518_v32  ;;  %v3522_v32 = vld [vmem:[%s8452_s7] sm:$0xff] }
 0x67d   :  { %5521 = vmatpush1.bf16.msra.mxu1 %v5520_v35  ;;  %v5635_v35 = vpack.c.bf16 %v3523_v33, %v3522_v32  ;;  %v3000_v32 = vld [vmem:[%s8450_s5 + $0xc0] sm:$0xff]  ;;  %v3002_v33 = vld [vmem:[%s8450_s5 + $0xd0] sm:$0xff] }
 0x67e   :  { %3068 = vmatprep.subr.mxu1 %v4489_v36  ;;  %v3525_v36 = vld [vmem:[%s8452_s7 + $0x18] sm:$0xff] }
 0x67f   :  { %5636 = vmatpush1.bf16.msra.mxu0 %v5635_v35  ;;  %v3538_v35 = vld [vmem:[%s8452_s7 + $0x80] sm:$0xff] }
 0x680   :  { %5637 = vmatprep.subr.bf16.mxu0 %v5858_v13 }
 0x681   :  { %3069 = vmatpush1.msra.mxu1 %v4488_v39  ;;  %v2981_v39 = vld [vmem:[%s8450_s5 + $0x28] sm:$0xff] }
 0x682   :  { %5523 = vmatprep.subr.bf16.mxu1 %v5522_v40  ;;  %v2983_v40 = vld [vmem:[%s8450_s5 + $0x38] sm:$0xff] }
 0x737   :  { %v2795_v41 = vpop.f32.mrb[12].mxu1  ;;  %v2905_v42 = vpop.f32.mrb[28].mxu0 }
 0x738   :  { %v2919_v43 = vmax.f32 %v2795_v41, %v2905_v42  ;;  %v2797_v44 = vpop.f32.mrb[13].mxu1  ;;  %v2907_v45 = vpop.f32.mrb[29].mxu0  ;;  %v5638_v41 = vpack.c.bf16 %v3525_v36, %v3524_v34  ;;  %v3526_v42 = vld [vmem:[%s8452_s7 + $0x20] sm:$0xff]  ;;  %v3539_v36 = vld [vmem:[%s8452_s7 + $0x88] sm:$0xff] }
 0x739   :  { %v5524_v44 = vpack.c.bf16 %v2978_v38, %v2976_v37  ;;  %v5526_v45 = vpack.c.bf16 %v2983_v40, %v2981_v39  ;;  %v5548_v37 = vpack.c.bf16 %v3002_v33, %v3000_v32  ;;  %v3005_v38 = vld [vmem:[%s8450_s5 + $0xe8] sm:$0xff]  ;;  %v4495_v40 = vld [vmem:[%s8450_s5 + $0x1f8] sm:$0xff] }
 0x73a   :  { %2923 = vst.msk [vmem:[#allocation2 + $0x18] sm:$0xff] %vm871_vm5, %v2919_v43  ;;  %v3527_v43 = vld [vmem:[%s8452_s7 + $0x28] sm:$0xff]  ;;  %5639 = vmatpush1.bf16.msra.mxu0 %v5638_v41  ;;  %v5659_v41 = vpack.c.bf16 %v3539_v36, %v3538_v35  ;;  %v4527_v35 = vld [vmem:[%s8450_s5 + $0x2f0] sm:$0xff]  ;;  %v4529_v36 = vld [vmem:[%s8450_s5 + $0x300] sm:$0xff] }
 0x73b   :  { %v2800_v46 = vpop.f32.mrb[14].mxu1  ;;  %v2910_v47 = vpop.f32.mrb[30].mxu0  ;;  %5640 = vmatprep.subr.bf16.mxu0 %v5858_v13  ;;  %v4493_v39 = vld [vmem:[%s8450_s5 + $0x1e8] sm:$0xff] }
 0x73c   :  { %v2920_v48 = vmax.f32 %v2800_v46, %v2910_v47  ;;  %v2802_v49 = vpop.f32.mrb[15].mxu1  ;;  %v2912_v50 = vpop.f32.mrb[31].mxu0  ;;  %v2980_v46 = vld [vmem:[%s8450_s5 + $0x20] sm:$0xff]  ;;  %v2982_v47 = vld [vmem:[%s8450_s5 + $0x30] sm:$0xff] }
 0x73d   :  { %v2985_v49 = vld [vmem:[%s8450_s5 + $0x48] sm:$0xff]  ;;  %v2987_v50 = vld [vmem:[%s8450_s5 + $0x58] sm:$0xff] }
 0x73e   :  { %2924 = vst.msk [vmem:[#allocation2 + $0x20] sm:$0xff] %vm871_vm5, %v2920_v48 }
 0x73f   :  { %v2805_v52 = vpop.f32.mrb[16].mxu1  ;;  %v2915_v54 = vpop.f32.mrb[32].mxu0 }
 0x740   :  { %v2921_v55 = vmax.f32 %v2805_v52, %v2915_v54  ;;  %v2807_v56 = vpop.f32.mrb[17].mxu1  ;;  %v2917_v57 = vpop.f32.mrb[33].mxu0  ;;  %v5641_v52 = vpack.c.bf16 %v3527_v43, %v3526_v42  ;;  %v3528_v54 = vld [vmem:[%s8452_s7 + $0x30] sm:$0xff]  ;;  %v4492_v42 = vld [vmem:[%s8450_s5 + $0x1e0] sm:$0xff] }
 0x741   :  { %v2926_v58 = vld [vmem:[#allocation2 + $0x18] sm:$0x1]  ;;  %v2927_v10 = vld [vmem:[#allocation2 + $0x19] sm:$0x1]  ;;  %v2931_v59 = vld [vmem:[#allocation2 + $0x1a] sm:$0x1]  ;;  %v5528_v56 = vpack.c.bf16 %v2982_v47, %v2980_v46  ;;  %v5530_v57 = vpack.c.bf16 %v2987_v50, %v2985_v49  ;;  %v5550_v47 = vpack.c.bf16 %v4495_v40, %v4493_v39  ;;  %v5584_v40 = vpack.c.bf16 %v4529_v36, %v4527_v35 }
 0x742   :  { %v2928_v60 = vmax.f32 %v2926_v58, %v2927_v10  ;;  %v2932_v61 = vld [vmem:[#allocation2 + $0x1b] sm:$0x1]  ;;  %v2935_v62 = vld [vmem:[#allocation2 + $0x1c] sm:$0x1]  ;;  %v2936_v63 = vld [vmem:[#allocation2 + $0x1d] sm:$0x1]  ;;  %5642 = vmatpush1.bf16.msra.mxu0 %v5641_v52 }
 0x743   :  { %2925 = vst.msk [vmem:[#allocation2 + $0x28] sm:$0xff] %vm871_vm5, %v2921_v55  ;;  %v2933_v0 = vmax.f32 %v2931_v59, %v2932_v61  ;;  %v2937_v1 = vmax.f32 %v2935_v62, %v2936_v63  ;;  %v2939_v2 = vld [vmem:[#allocation2 + $0x1e] sm:$0x1]  ;;  %v2940_v3 = vld [vmem:[#allocation2 + $0x1f] sm:$0x1]  ;;  %v2984_v58 = vld [vmem:[%s8450_s5 + $0x40] sm:$0xff]  ;;  %5643 = vmatprep.subr.bf16.mxu0 %v5858_v13 }
 0x744   :  { %2930 = vst.msk [vmem:[#allocation3 + $0x10] sm:$0x1] %vm878_vm6, %v2928_v60  ;;  %v2941_v4 = vmax.f32 %v2939_v2, %v2940_v3  ;;  %v3529_v55 = vld [vmem:[%s8452_s7 + $0x38] sm:$0xff]  ;;  %v2986_v10 = vld [vmem:[%s8450_s5 + $0x50] sm:$0xff]  ;;  %v2989_v59 = vld [vmem:[%s8450_s5 + $0x68] sm:$0xff] }
 0x745   :  { %2934 = vst.msk [vmem:[#allocation3 + $0x11] sm:$0x1] %vm878_vm6, %v2933_v0  ;;  %2938 = vst.msk [vmem:[#allocation3 + $0x12] sm:$0x1] %vm878_vm6, %v2937_v1  ;;  %v2943_v5 = vld [vmem:[#allocation2 + $0x20] sm:$0x1]  ;;  %v5644_v61 = vpack.c.bf16 %v3529_v55, %v3528_v54  ;;  %v5532_v0 = vpack.c.bf16 %v2986_v10, %v2984_v58 }
 0x746   :  { %v2944_v6 = vld [vmem:[#allocation2 + $0x21] sm:$0x1]  ;;  %v2947_v8 = vld [vmem:[#allocation2 + $0x22] sm:$0x1]  ;;  %2942 = vst.msk [vmem:[#allocation3 + $0x13] sm:$0x1] %vm878_vm6, %v2941_v4 }
 0x747   :  { %v2945_v9 = vmax.f32 %v2943_v5, %v2944_v6  ;;  %v2948_v11 = vld [vmem:[#allocation2 + $0x23] sm:$0x1]  ;;  %v2951_v12 = vld [vmem:[#allocation2 + $0x24] sm:$0x1]  ;;  %v2952_v14 = vld [vmem:[#allocation2 + $0x25] sm:$0x1]  ;;  %5645 = vmatpush1.bf16.msra.mxu0 %v5644_v61 }
 0x748   :  { %v2949_v15 = vmax.f32 %v2947_v8, %v2948_v11  ;;  %v2953_v16 = vmax.f32 %v2951_v12, %v2952_v14  ;;  %v2955_v17 = vld [vmem:[#allocation2 + $0x26] sm:$0x1]  ;;  %v2956_v18 = vld [vmem:[#allocation2 + $0x27] sm:$0x1]  ;;  %v2991_v60 = vld [vmem:[%s8450_s5 + $0x78] sm:$0xff]  ;;  %5646 = vmatprep.subr.bf16.mxu0 %v5858_v13 }
 0x749   :  { %2946 = vst.msk [vmem:[#allocation3 + $0x14] sm:$0x1] %vm878_vm6, %v2945_v9  ;;  %v2957_v19 = vmax.f32 %v2955_v17, %v2956_v18  ;;  %v3530_v62 = vld [vmem:[%s8452_s7 + $0x40] sm:$0xff]  ;;  %v3531_v63 = vld [vmem:[%s8452_s7 + $0x48] sm:$0xff]  ;;  %v5534_v1 = vpack.c.bf16 %v2991_v60, %v2989_v59  ;;  %v2990_v3 = vld [vmem:[%s8450_s5 + $0x70] sm:$0xff] }
 0x74a   :  { %2950 = vst.msk [vmem:[#allocation3 + $0x15] sm:$0x1] %vm878_vm6, %v2949_v15  ;;  %2954 = vst.msk [vmem:[#allocation3 + $0x16] sm:$0x1] %vm878_vm6, %v2953_v16  ;;  %v2959_v20 = vld [vmem:[#allocation2 + $0x28] sm:$0x1]  ;;  %v5647_v6 = vpack.c.bf16 %v3531_v63, %v3530_v62 }
 0x74b   :  { %v2960_v21 = vld [vmem:[#allocation2 + $0x29] sm:$0x1]  ;;  %v2963_v22 = vld [vmem:[#allocation2 + $0x2a] sm:$0x1]  ;;  %2958 = vst.msk [vmem:[#allocation3 + $0x17] sm:$0x1] %vm878_vm6, %v2957_v19 }
 0x74c   :  { %v2961_v23 = vmax.f32 %v2959_v20, %v2960_v21  ;;  %v2964_v24 = vld [vmem:[#allocation2 + $0x2b] sm:$0x1]  ;;  %v2967_v25 = vld [vmem:[#allocation2 + $0x2c] sm:$0x1]  ;;  %v2968_v26 = vld [vmem:[#allocation2 + $0x2d] sm:$0x1]  ;;  %5648 = vmatpush1.bf16.msra.mxu0 %v5647_v6 }
 0x74d   :  { %v2965_v27 = vmax.f32 %v2963_v22, %v2964_v24  ;;  %v2969_v28 = vmax.f32 %v2967_v25, %v2968_v26  ;;  %v2971_v29 = vld [vmem:[#allocation2 + $0x2e] sm:$0x1]  ;;  %v2972_v30 = vld [vmem:[#allocation2 + $0x2f] sm:$0x1]  ;;  %v2988_v2 = vld [vmem:[%s8450_s5 + $0x60] sm:$0xff]  ;;  %5649 = vmatprep.subr.bf16.mxu0 %v5858_v13 }
 0x74e   :  { %2962 = vst.msk [vmem:[#allocation3 + $0x18] sm:$0x1] %vm878_vm6, %v2961_v23  ;;  %v2973_v31 = vmax.f32 %v2971_v29, %v2972_v30  ;;  %v2993_v4 = vld [vmem:[%s8450_s5 + $0x88] sm:$0xff]  ;;  %v2995_v5 = vld [vmem:[%s8450_s5 + $0x98] sm:$0xff]  ;;  %v3532_v8 = vld [vmem:[%s8452_s7 + $0x50] sm:$0xff]  ;;  %v5536_v11 = vpack.c.bf16 %v2990_v3, %v2988_v2 }
 0x74f   :  { %2966 = vst.msk [vmem:[#allocation3 + $0x19] sm:$0x1] %vm878_vm6, %v2965_v27  ;;  %2970 = vst.msk [vmem:[#allocation3 + $0x1a] sm:$0x1] %vm878_vm6, %v2969_v28  ;;  %v3533_v9 = vld [vmem:[%s8452_s7 + $0x58] sm:$0xff]  ;;  %v5538_v12 = vpack.c.bf16 %v2995_v5, %v2993_v4  ;;  %v2992_v14 = vld [vmem:[%s8450_s5 + $0x80] sm:$0xff] }
 0x750   :  { %2974 = vst.msk [vmem:[#allocation3 + $0x1b] sm:$0x1] %vm878_vm6, %v2973_v31  ;;  %v2994_v15 = vld [vmem:[%s8450_s5 + $0x90] sm:$0xff]  ;;  %v2997_v16 = vld [vmem:[%s8450_s5 + $0xa8] sm:$0xff]  ;;  %v2999_v17 = vld [vmem:[%s8450_s5 + $0xb8] sm:$0xff]  ;;  %v5650_v18 = vpack.c.bf16 %v3533_v9, %v3532_v8 }
 0x751   :  { %v3534_v19 = vld [vmem:[%s8452_s7 + $0x60] sm:$0xff]  ;;  %v3535_v20 = vld [vmem:[%s8452_s7 + $0x68] sm:$0xff]  ;;  %v5540_v21 = vpack.c.bf16 %v2994_v15, %v2992_v14  ;;  %v5542_v22 = vpack.c.bf16 %v2999_v17, %v2997_v16  ;;  %v2998_v24 = vld [vmem:[%s8450_s5 + $0xb0] sm:$0xff] }
 0x752   :  { %v2996_v23 = vld [vmem:[%s8450_s5 + $0xa0] sm:$0xff]  ;;  %v3001_v25 = vld [vmem:[%s8450_s5 + $0xc8] sm:$0xff]  ;;  %v3003_v26 = vld [vmem:[%s8450_s5 + $0xd8] sm:$0xff]  ;;  %5651 = vmatpush1.bf16.msra.mxu0 %v5650_v18  ;;  %v5653_v27 = vpack.c.bf16 %v3535_v20, %v3534_v19 }
 0x753   :  { %5652 = vmatprep.subr.bf16.mxu0 %v5858_v13  ;;  %v3536_v28 = vld [vmem:[%s8452_s7 + $0x70] sm:$0xff]  ;;  %v3537_v29 = vld [vmem:[%s8452_s7 + $0x78] sm:$0xff]  ;;  %v5544_v30 = vpack.c.bf16 %v2998_v24, %v2996_v23  ;;  %v5546_v31 = vpack.c.bf16 %v3003_v26, %v3001_v25  ;;  %v3004_v46 = vld [vmem:[%s8450_s5 + $0xe0] sm:$0xff] }
 0x754   :  { %v5656_v34 = vpack.c.bf16 %v3537_v29, %v3536_v28  ;;  %v4494_v43 = vld [vmem:[%s8450_s5 + $0x1f0] sm:$0xff]  ;;  %v4496_v50 = vld [vmem:[%s8450_s5 + $0x200] sm:$0xff]  ;;  %v4501_v55 = vld [vmem:[%s8450_s5 + $0x228] sm:$0xff] }
 0x755   :  { %v3006_v48 = vld [vmem:[#allocation3 + $0x11] sm:$0xff]  ;;  %v4498_v52 = vld [vmem:[%s8450_s5 + $0x210] sm:$0xff]  ;;  %v4507_v61 = vld [vmem:[%s8450_s5 + $0x258] sm:$0xff] }
 0x756   :  { %4490 = vmatmul.mubr.msk.f32.vlgmr.msra.gmra.mrb[18].mxu1 %vm871_vm5, %v3006_v48  ;;  %5654 = vmatpush1.bf16.msra.mxu0 %v5653_v27  ;;  %v5552_v48 = vpack.c.bf16 %v4494_v43, %v4492_v42  ;;  %v2975_v54 = vld [vmem:[#allocation3 + $0x10] sm:$0xff]  ;;  %v4502_v59 = vld [vmem:[%s8450_s5 + $0x230] sm:$0xff]  ;;  %v4505_v60 = vld [vmem:[%s8450_s5 + $0x248] sm:$0xff] }
 0x757   :  { %5525 = vmatpush1.bf16.msra.mxu1 %v5524_v44  ;;  %3178 = vmatprep.mubr.f32.mxu1 %v5856_v7  ;;  %v4497_v44 = vld [vmem:[%s8450_s5 + $0x208] sm:$0xff]  ;;  %v4500_v10 = vld [vmem:[%s8450_s5 + $0x220] sm:$0xff]  ;;  %v5562_v63 = vpack.c.bf16 %v4507_v61, %v4505_v60  ;;  %v4511_v3 = vld [vmem:[%s8450_s5 + $0x278] sm:$0xff] }
 0x758   :  { %5527 = vmatprep.subr.bf16.mxu1 %v5526_v45  ;;  %5655 = vmatprep.subr.bf16.mxu0 %v5858_v13  ;;  %v4499_v45 = vld [vmem:[%s8450_s5 + $0x218] sm:$0xff]  ;;  %v5560_v62 = vpack.c.bf16 %v4502_v59, %v4500_v10  ;;  %v4509_v2 = vld [vmem:[%s8450_s5 + $0x268] sm:$0xff]  ;;  %v4508_v6 = vld [vmem:[%s8450_s5 + $0x260] sm:$0xff] }
 0x759   :  { %v5554_v49 = vpack.c.bf16 %v4499_v45, %v4497_v44  ;;  %v5566_v5 = vpack.c.bf16 %v4511_v3, %v4509_v2  ;;  %v4510_v8 = vld [vmem:[%s8450_s5 + $0x270] sm:$0xff]  ;;  %v4513_v9 = vld [vmem:[%s8450_s5 + $0x288] sm:$0xff]  ;;  %v4512_v15 = vld [vmem:[%s8450_s5 + $0x280] sm:$0xff] }
 0x75a   :  { %5657 = vmatpush1.bf16.msra.mxu0 %v5656_v34  ;;  %v4514_v16 = vld [vmem:[%s8450_s5 + $0x290] sm:$0xff]  ;;  %v4517_v17 = vld [vmem:[%s8450_s5 + $0x2a8] sm:$0xff]  ;;  %v4519_v18 = vld [vmem:[%s8450_s5 + $0x2b8] sm:$0xff] }
 0x75b   :  { %5529 = vmatpush1.bf16.msra.mxu1 %v5528_v56  ;;  %5658 = vmatprep.subr.bf16.mxu0 %v5858_v13  ;;  %v4503_v56 = vld [vmem:[%s8450_s5 + $0x238] sm:$0xff]  ;;  %v5572_v19 = vpack.c.bf16 %v4514_v16, %v4512_v15  ;;  %v5574_v20 = vpack.c.bf16 %v4519_v18, %v4517_v17  ;;  %v4521_v24 = vld [vmem:[%s8450_s5 + $0x2c8] sm:$0xff]  ;;  %v4523_v27 = vld [vmem:[%s8450_s5 + $0x2d0] sm:$0xff] }
 0x75c   :  { %5531 = vmatprep.subr.bf16.mxu1 %v5530_v57  ;;  %v5556_v57 = vpack.c.bf16 %v4498_v52, %v4496_v50  ;;  %v5558_v58 = vpack.c.bf16 %v4503_v56, %v4501_v55  ;;  %v4524_v25 = vld [vmem:[%s8450_s5 + $0x2d8] sm:$0xff]  ;;  %v4526_v26 = vld [vmem:[%s8450_s5 + $0x2e8] sm:$0xff]  ;;  %v4525_v28 = vld [vmem:[%s8450_s5 + $0x2e0] sm:$0xff] }
 0x75d   :  { %v4528_v29 = vld [vmem:[%s8450_s5 + $0x2f8] sm:$0xff]  ;;  %v5578_v32 = vpack.c.bf16 %v4526_v26, %v4524_v25  ;;  %v5580_v33 = vpack.c.bf16 %v4525_v28, %v4523_v27  ;;  %v4534_v39 = vld [vmem:[%s8450_s5 + $0x328] sm:$0xff]  ;;  %v4531_v42 = vld [vmem:[%s8450_s5 + $0x310] sm:$0xff] }
 0x75e   :  { %5660 = vmatpush1.bf16.msra.mxu0 %v5659_v41  ;;  %v4533_v43 = vld [vmem:[%s8450_s5 + $0x320] sm:$0xff]  ;;  %v4536_v44 = vld [vmem:[%s8450_s5 + $0x338] sm:$0xff]  ;;  %v4538_v45 = vld [vmem:[%s8450_s5 + $0x348] sm:$0xff] }
 0x75f   :  { %5533 = vmatpush1.bf16.msra.mxu1 %v5532_v0  ;;  %5661 = vmatprep.subr.bf16.mxu0 %v5858_v13  ;;  %v4504_v0 = vld [vmem:[%s8450_s5 + $0x240] sm:$0xff]  ;;  %v4540_v50 = vld [vmem:[%s8450_s5 + $0x358] sm:$0xff]  ;;  %v4542_v52 = vld [vmem:[%s8450_s5 + $0x368] sm:$0xff] }
 0x760   :  { %5535 = vmatprep.subr.bf16.mxu1 %v5534_v1  ;;  %v4506_v1 = vld [vmem:[%s8450_s5 + $0x250] sm:$0xff]  ;;  %v5594_v55 = vpack.c.bf16 %v4542_v52, %v4540_v50  ;;  %v4546_v10 = vld [vmem:[%s8450_s5 + $0x388] sm:$0xff]  ;;  %v4561_v15 = vld [vmem:[%s8450_s5 + $0x3f8] sm:$0xff] }
 0x761   :  { %v5564_v4 = vpack.c.bf16 %v4506_v1, %v4504_v0  ;;  %v4539_v56 = vld [vmem:[%s8450_s5 + $0x350] sm:$0xff]  ;;  %v4550_v0 = vld [vmem:[%s8450_s5 + $0x3a8] sm:$0xff]  ;;  %v4562_v27 = vld [vmem:[%s8450_s5 + $0x400] sm:$0xff] }
 0x762   :  { %v4543_v61 = vld [vmem:[%s8450_s5 + $0x370] sm:$0xff]  ;;  %v4571_v35 = vld [vmem:[%s8450_s5 + $0x448] sm:$0xff]  ;;  %v4573_v36 = vld [vmem:[%s8450_s5 + $0x458] sm:$0xff] }
 0x763   :  { %5537 = vmatpush1.bf16.msra.mxu1 %v5536_v11  ;;  %v4515_v11 = vld [vmem:[%s8450_s5 + $0x298] sm:$0xff]  ;;  %v4547_v3 = vld [vmem:[%s8450_s5 + $0x390] sm:$0xff]  ;;  %v4578_v52 = vld [vmem:[%s8450_s5 + $0x480] sm:$0xff] }
 0x764   :  { %5539 = vmatprep.subr.bf16.mxu1 %v5538_v12  ;;  %v5568_v12 = vpack.c.bf16 %v4510_v8, %v4508_v6  ;;  %v5570_v14 = vpack.c.bf16 %v4515_v11, %v4513_v9  ;;  %v4552_v6 = vld [vmem:[%s8450_s5 + $0x3b8] sm:$0xff]  ;;  %v4555_v8 = vld [vmem:[%s8450_s5 + $0x3c8] sm:$0xff]  ;;  %v4554_v11 = vld [vmem:[%s8450_s5 + $0x3c0] sm:$0xff] }
 0x765   :  { %v4557_v9 = vld [vmem:[%s8450_s5 + $0x3d8] sm:$0xff]  ;;  %v4551_v16 = vld [vmem:[%s8450_s5 + $0x3b0] sm:$0xff] }
 0x766   :  { %v5606_v17 = vpack.c.bf16 %v4557_v9, %v4555_v8  ;;  %v4564_v28 = vld [vmem:[%s8450_s5 + $0x410] sm:$0xff] }
 0x767   :  { %5541 = vmatpush1.bf16.msra.mxu1 %v5540_v21  ;;  %v4516_v21 = vld [vmem:[%s8450_s5 + $0x2a0] sm:$0xff] }
 0x768   :  { %5543 = vmatprep.subr.bf16.mxu1 %v5542_v22  ;;  %v4518_v22 = vld [vmem:[%s8450_s5 + $0x2b0] sm:$0xff] }
 0x769   :  { %v5576_v23 = vpack.c.bf16 %v4518_v22, %v4516_v21  ;;  %v4560_v21 = vld [vmem:[%s8450_s5 + $0x3f0] sm:$0xff]  ;;  %v3292_v22 = vld [vmem:[#allocation3 + $0x13] sm:$0xff] }
 0x76b   :  { %5545 = vmatpush1.bf16.msra.mxu1 %v5544_v30  ;;  %v4530_v30 = vld [vmem:[%s8450_s5 + $0x308] sm:$0xff] }
 0x76c   :  { %5547 = vmatprep.subr.bf16.mxu1 %v5546_v31  ;;  %v4520_v31 = vld [vmem:[%s8450_s5 + $0x2c0] sm:$0xff]  ;;  %v5582_v34 = vpack.c.bf16 %v4530_v30, %v4528_v29  ;;  %v4567_v29 = vld [vmem:[%s8450_s5 + $0x428] sm:$0xff]  ;;  %v4569_v30 = vld [vmem:[%s8450_s5 + $0x438] sm:$0xff] }
 0x76f   :  { %5549 = vmatpush1.bf16.msra.mxu1 %v5548_v37  ;;  %v3185_v37 = vld [vmem:[#allocation3 + $0x12] sm:$0xff] }
 0x770   :  { %3142 = vmatprep.subr.mxu1 %v3005_v38  ;;  %v4532_v38 = vld [vmem:[%s8450_s5 + $0x318] sm:$0xff] }
 0x771   :  { %v5586_v41 = vpack.c.bf16 %v4534_v39, %v4532_v38  ;;  %v5622_v38 = vpack.c.bf16 %v4573_v36, %v4571_v35  ;;  %v4570_v39 = vld [vmem:[%s8450_s5 + $0x440] sm:$0xff]  ;;  %v3634_v35 = vld [vmem:[%s8453_s8 + $0x98] sm:$0xff] }
 0x773   :  { %3143 = vmatpush1.msra.mxu1 %v3004_v46  ;;  %v5588_v46 = vpack.c.bf16 %v4533_v43, %v4531_v42  ;;  %v4577_v42 = vld [vmem:[%s8450_s5 + $0x478] sm:$0xff] }
 0x774   :  { %4491 = vmatmul.mubr.msk.f32.vlgmr.msra.gmra.mrb[18].mxu1 %vm871_vm5, %v2975_v54  ;;  %5551 = vmatprep.subr.bf16.mxu1 %v5550_v47  ;;  %v5590_v47 = vpack.c.bf16 %v4538_v45, %v4536_v44  ;;  %v4574_v45 = vld [vmem:[%s8450_s5 + $0x460] sm:$0xff] }
 0x775   :  { %5553 = vmatpush1.bf16.msra.mxu1 %v5552_v48  ;;  %3283 = vmatprep.mubr.f32.mxu1 %v5856_v7  ;;  %v4535_v48 = vld [vmem:[%s8450_s5 + $0x330] sm:$0xff] }
 0x776   :  { %5555 = vmatprep.subr.bf16.mxu1 %v5554_v49  ;;  %v4537_v49 = vld [vmem:[%s8450_s5 + $0x340] sm:$0xff] }
 0x777   :  { %v5592_v54 = vpack.c.bf16 %v4537_v49, %v4535_v48  ;;  %v4581_v48 = vld [vmem:[%s8450_s5 + $0x498] sm:$0xff] }
 0x779   :  { %5557 = vmatpush1.bf16.msra.mxu1 %v5556_v57  ;;  %v4541_v57 = vld [vmem:[%s8450_s5 + $0x360] sm:$0xff] }
 0x77a   :  { %5559 = vmatprep.subr.bf16.mxu1 %v5558_v58  ;;  %v4544_v58 = vld [vmem:[%s8450_s5 + $0x378] sm:$0xff]  ;;  %v5596_v59 = vpack.c.bf16 %v4541_v57, %v4539_v56  ;;  %v4583_v56 = vld [vmem:[%s8450_s5 + $0x4a8] sm:$0xff]  ;;  %v4582_v57 = vld [vmem:[%s8450_s5 + $0x4a0] sm:$0xff] }
 0x77b   :  { %v5598_v60 = vpack.c.bf16 %v4546_v10, %v4544_v58  ;;  %v3399_v58 = vld [vmem:[#allocation3 + $0x14] sm:$0xff]  ;;  %v3540_v10 = vld [vmem:[%s8452_s7 + $0x90] sm:$0xff] }
 0x77d   :  { %5561 = vmatpush1.bf16.msra.mxu1 %v5560_v62  ;;  %v4545_v62 = vld [vmem:[%s8450_s5 + $0x380] sm:$0xff] }
 0x77e   :  { %5563 = vmatprep.subr.bf16.mxu1 %v5562_v63  ;;  %v4548_v63 = vld [vmem:[%s8450_s5 + $0x398] sm:$0xff]  ;;  %v5600_v1 = vpack.c.bf16 %v4545_v62, %v4543_v61  ;;  %v3506_v61 = vld [vmem:[%s8451_s6] sm:$0x3] }
 0x77f   :  { %v5602_v2 = vpack.c.bf16 %v4550_v0, %v4548_v63  ;;  %v3511_v62 = vrot.slane %v3506_v61, %v6367_v51  ;;  %v3515_v63 = vrot.slane %v3506_v61, %v6372_v53  ;;  %v3617_v51 = vld [vmem:[%s8453_s8 + $0x10] sm:$0xff]  ;;  %v3618_v53 = vld [vmem:[%s8453_s8 + $0x18] sm:$0xff] }
 0x780   :  { %v4595_v61 = vld [vmem:[%s8454_s9 + $0x90] sm:$0xff] }
 0x781   :  { %5565 = vmatpush1.bf16.msra.mxu1 %v5564_v4  ;;  %v4549_v4 = vld [vmem:[%s8450_s5 + $0x3a0] sm:$0xff] }
 0x782   :  { %5567 = vmatprep.subr.bf16.mxu1 %v5566_v5  ;;  %v5604_v5 = vpack.c.bf16 %v4549_v4, %v4547_v3  ;;  %v3615_v3 = vld [vmem:[%s8453_s8] sm:$0xff]  ;;  %v3616_v4 = vld [vmem:[%s8453_s8 + $0x8] sm:$0xff] }
 0x783   :  { %v5665_v8 = vpack.c.bf16 %v3616_v4, %v3615_v3 }
 0x785   :  { %5569 = vmatpush1.bf16.msra.mxu1 %v5568_v12  ;;  %v4556_v12 = vld [vmem:[%s8450_s5 + $0x3d0] sm:$0xff] }
 0x786   :  { %5571 = vmatprep.subr.bf16.mxu1 %v5570_v14  ;;  %v4559_v14 = vld [vmem:[%s8450_s5 + $0x3e8] sm:$0xff]  ;;  %v5608_v18 = vpack.c.bf16 %v4556_v12, %v4554_v11  ;;  %v5668_v11 = vpack.c.bf16 %v3618_v53, %v3617_v51  ;;  %v3619_v12 = vld [vmem:[%s8453_s8 + $0x20] sm:$0xff] }
 0x787   :  { %v4599_v51 = vld [vmem:[%s8454_s9 + $0xa0] sm:$0xff]  ;;  %v4600_v53 = vld [vmem:[%s8454_s9 + $0xa8] sm:$0xff] }
 0x789   :  { %5573 = vmatpush1.bf16.msra.mxu1 %v5572_v19  ;;  %v5610_v19 = vpack.c.bf16 %v4561_v15, %v4559_v14  ;;  %v3620_v14 = vld [vmem:[%s8453_s8 + $0x28] sm:$0xff] }
 0x78a   :  { %5575 = vmatprep.subr.bf16.mxu1 %v5574_v20  ;;  %v4558_v20 = vld [vmem:[%s8450_s5 + $0x3e0] sm:$0xff]  ;;  %v5671_v15 = vpack.c.bf16 %v3620_v14, %v3619_v12  ;;  %v4611_v12 = vld [vmem:[%s8454_s9 + $0xf8] sm:$0xff] }
 0x78b   :  { %v5612_v25 = vpack.c.bf16 %v4560_v21, %v4558_v20  ;;  %v3624_v20 = vld [vmem:[%s8453_s8 + $0x48] sm:$0xff] }
 0x78d   :  { %5577 = vmatpush1.bf16.msra.mxu1 %v5576_v23  ;;  %v4563_v23 = vld [vmem:[%s8450_s5 + $0x408] sm:$0xff] }
 0x78e   :  { %3247 = vmatprep.subr.mxu1 %v4521_v24  ;;  %v4565_v24 = vld [vmem:[%s8450_s5 + $0x418] sm:$0xff] }
 0x78f   :  { %v5614_v26 = vpack.c.bf16 %v4565_v24, %v4563_v23  ;;  %v3626_v23 = vld [vmem:[%s8453_s8 + $0x58] sm:$0xff] }
 0x791   :  { %3248 = vmatpush1.msra.mxu1 %v4520_v31  ;;  %v5616_v31 = vpack.c.bf16 %v4564_v28, %v4562_v27  ;;  %v3629_v28 = vld [vmem:[%s8453_s8 + $0x70] sm:$0xff] }
 0x792   :  { %4522 = vmatmul.mubr.msk.f32.vlgmr.msra.gmra.mrb[18].mxu1 %vm871_vm5, %v3185_v37  ;;  %5579 = vmatprep.subr.bf16.mxu1 %v5578_v32  ;;  %v5618_v32 = vpack.c.bf16 %v4569_v30, %v4567_v29  ;;  %v3630_v29 = vld [vmem:[%s8453_s8 + $0x78] sm:$0xff] }
 0x793   :  { %5581 = vmatpush1.bf16.msra.mxu1 %v5580_v33  ;;  %3390 = vmatprep.mubr.f32.mxu1 %v5856_v7  ;;  %v4566_v33 = vld [vmem:[%s8450_s5 + $0x420] sm:$0xff]  ;;  %v5686_v30 = vpack.c.bf16 %v3630_v29, %v3629_v28  ;;  %v4604_v29 = vld [vmem:[%s8454_s9 + $0xc8] sm:$0xff] }
 0x794   :  { %5583 = vmatprep.subr.bf16.mxu1 %v5582_v34  ;;  %v4568_v34 = vld [vmem:[%s8450_s5 + $0x430] sm:$0xff]  ;;  %v4603_v28 = vld [vmem:[%s8454_s9 + $0xc0] sm:$0xff] }
 0x795   :  { %v5620_v37 = vpack.c.bf16 %v4568_v34, %v4566_v33  ;;  %v3633_v34 = vld [vmem:[%s8453_s8 + $0x90] sm:$0xff] }
 0x796   :  { %v5692_v36 = vpack.c.bf16 %v3634_v35, %v3633_v34  ;;  %v4605_v34 = vld [vmem:[%s8454_s9 + $0xd0] sm:$0xff]  ;;  %v4606_v35 = vld [vmem:[%s8454_s9 + $0xd8] sm:$0xff] }
 0x797   :  { %5585 = vmatpush1.bf16.msra.mxu1 %v5584_v40  ;;  %v4572_v40 = vld [vmem:[%s8450_s5 + $0x450] sm:$0xff] }
 0x798   :  { %5587 = vmatprep.subr.bf16.mxu1 %v5586_v41  ;;  %v4575_v41 = vld [vmem:[%s8450_s5 + $0x468] sm:$0xff]  ;;  %v5624_v43 = vpack.c.bf16 %v4572_v40, %v4570_v39  ;;  %v3711_v39 = vld [vmem:[%s8454_s9] sm:$0xff] }
 0x799   :  { %v5626_v44 = vpack.c.bf16 %v4577_v42, %v4575_v41  ;;  %v3712_v41 = vld [vmem:[%s8454_s9 + $0x8] sm:$0xff]  ;;  %v4589_v42 = vld [vmem:[%s8454_s9 + $0x60] sm:$0xff] }
 0x79b   :  { %5589 = vmatpush1.bf16.msra.mxu1 %v5588_v46  ;;  %v4576_v46 = vld [vmem:[%s8450_s5 + $0x470] sm:$0xff] }
 0x79c   :  { %5591 = vmatprep.subr.bf16.mxu1 %v5590_v47  ;;  %v4579_v47 = vld [vmem:[%s8450_s5 + $0x488] sm:$0xff]  ;;  %v5628_v49 = vpack.c.bf16 %v4576_v46, %v4574_v45  ;;  %v3713_v45 = vld [vmem:[%s8454_s9 + $0x10] sm:$0xff]  ;;  %v3714_v46 = vld [vmem:[%s8454_s9 + $0x18] sm:$0xff] }
 0x79d   :  { %v5630_v50 = vpack.c.bf16 %v4581_v48, %v4579_v47  ;;  %v5713_v48 = vpack.c.bf16 %v3714_v46, %v3713_v45 }
 0x79f   :  { %5593 = vmatpush1.bf16.msra.mxu1 %v5592_v54  ;;  %v4580_v54 = vld [vmem:[%s8450_s5 + $0x490] sm:$0xff] }
 0x7a0   :  { %5595 = vmatprep.subr.bf16.mxu1 %v5594_v55  ;;  %v5632_v55 = vpack.c.bf16 %v4580_v54, %v4578_v52  ;;  %v3715_v52 = vld [vmem:[%s8454_s9 + $0x20] sm:$0xff] }
 0x7a3   :  { %5597 = vmatpush1.bf16.msra.mxu1 %v5596_v59  ;;  %v3541_v59 = vld [vmem:[%s8452_s7 + $0x98] sm:$0xff] }
 0x7a4   :  { %5599 = vmatprep.subr.bf16.mxu1 %v5598_v60  ;;  %v5662_v60 = vpack.c.bf16 %v3541_v59, %v3540_v10  ;;  %v3717_v10 = vld [vmem:[%s8454_s9 + $0x30] sm:$0xff] }
 0x7a6   :  { %5663 = vmatpush1.bf16.msra.mxu0 %v5662_v60  ;;  %v3718_v60 = vld [vmem:[%s8454_s9 + $0x38] sm:$0xff] }
 0x7a7   :  { %5601 = vmatpush1.bf16.msra.mxu1 %v5600_v1  ;;  %5664 = vmatprep.subr.bf16.mxu0 %v5858_v13 }
 0x7a8   :  { %5603 = vmatprep.subr.bf16.mxu1 %v5602_v2 }
 0x7ab   :  { %5605 = vmatpush1.bf16.msra.mxu1 %v5604_v5 }
 0x7ac   :  { %3354 = vmatprep.subr.mxu1 %v4552_v6 }
 0x7af   :  { %3355 = vmatpush1.msra.mxu1 %v4551_v16  ;;  %v3621_v16 = vld [vmem:[%s8453_s8 + $0x30] sm:$0xff] }
 0x7b0   :  { %4553 = vmatmul.mubr.msk.f32.vlgmr.msra.gmra.mrb[18].mxu1 %vm871_vm5, %v3292_v22  ;;  %5607 = vmatprep.subr.bf16.mxu1 %v5606_v17  ;;  %v3622_v17 = vld [vmem:[%s8453_s8 + $0x38] sm:$0xff]  ;;  %v3625_v22 = vld [vmem:[%s8453_s8 + $0x50] sm:$0xff] }
 0x7b1   :  { %5609 = vmatpush1.bf16.msra.mxu1 %v5608_v18  ;;  %3497 = vmatprep.mubr.f32.mxu1 %v5856_v7  ;;  %v5674_v18 = vpack.c.bf16 %v3622_v17, %v3621_v16  ;;  %v5680_v24 = vpack.c.bf16 %v3626_v23, %v3625_v22  ;;  %v5725_v17 = vpack.c.bf16 %v4600_v53, %v4599_v51  ;;  %v4602_v22 = vld [vmem:[%s8454_s9 + $0xb8] sm:$0xff] }
 0x7b2   :  { %5611 = vmatprep.subr.bf16.mxu1 %v5610_v19  ;;  %v3623_v19 = vld [vmem:[%s8453_s8 + $0x40] sm:$0xff] }
 0x7b3   :  { %v5677_v21 = vpack.c.bf16 %v3624_v20, %v3623_v19 }
 0x7b5   :  { %5613 = vmatpush1.bf16.msra.mxu1 %v5612_v25  ;;  %v3627_v25 = vld [vmem:[%s8453_s8 + $0x60] sm:$0xff] }
 0x7b6   :  { %5615 = vmatprep.subr.bf16.mxu1 %v5614_v26  ;;  %v3628_v26 = vld [vmem:[%s8453_s8 + $0x68] sm:$0xff] }
 0x7b7   :  { %v5683_v27 = vpack.c.bf16 %v3628_v26, %v3627_v25  ;;  %v4613_v25 = vld [vmem:[%s8454_s9 + $0x108] sm:$0xff] }
 0x7b9   :  { %5617 = vmatpush1.bf16.msra.mxu1 %v5616_v31  ;;  %v3631_v31 = vld [vmem:[%s8453_s8 + $0x80] sm:$0xff] }
 0x7ba   :  { %5619 = vmatprep.subr.bf16.mxu1 %v5618_v32  ;;  %v3632_v32 = vld [vmem:[%s8453_s8 + $0x88] sm:$0xff] }
 0x7bb   :  { %v5689_v33 = vpack.c.bf16 %v3632_v32, %v3631_v31  ;;  %v4615_v31 = vld [vmem:[%s8454_s9 + $0x118] sm:$0xff]  ;;  %v5731_v32 = vpack.c.bf16 %v4604_v29, %v4603_v28 }
 0x7bd   :  { %5621 = vmatpush1.bf16.msra.mxu1 %v5620_v37  ;;  %v4587_v37 = vld [vmem:[%s8454_s9 + $0x50] sm:$0xff] }
 0x7be   :  { %5623 = vmatprep.subr.bf16.mxu1 %v5622_v38  ;;  %v4588_v38 = vld [vmem:[%s8454_s9 + $0x58] sm:$0xff] }
 0x7bf   :  { %v5695_v40 = vpack.c.bf16 %v4588_v38, %v4587_v37  ;;  %v4617_v37 = vld [vmem:[%s8454_s9 + $0x128] sm:$0xff]  ;;  %v5734_v38 = vpack.c.bf16 %v4606_v35, %v4605_v34 }
 0x7c1   :  { %5625 = vmatpush1.bf16.msra.mxu1 %v5624_v43  ;;  %v4590_v43 = vld [vmem:[%s8454_s9 + $0x68] sm:$0xff] }
 0x7c2   :  { %5627 = vmatprep.subr.bf16.mxu1 %v5626_v44  ;;  %v5710_v44 = vpack.c.bf16 %v3712_v41, %v3711_v39  ;;  %v5698_v47 = vpack.c.bf16 %v4590_v43, %v4589_v42  ;;  %v4608_v41 = vld [vmem:[%s8454_s9 + $0xe8] sm:$0xff]  ;;  %v4618_v42 = vld [vmem:[%s8454_s9 + $0x130] sm:$0xff]  ;;  %v4619_v43 = vld [vmem:[%s8454_s9 + $0x138] sm:$0xff] }
 0x7c3   :  { %v5752_v45 = vpack.c.bf16 %v4619_v43, %v4618_v42 }
 0x7c5   :  { %5629 = vmatpush1.bf16.msra.mxu1 %v5628_v49  ;;  %v4591_v49 = vld [vmem:[%s8454_s9 + $0x70] sm:$0xff] }
 0x7c6   :  { %5631 = vmatprep.subr.bf16.mxu1 %v5630_v50  ;;  %v4592_v50 = vld [vmem:[%s8454_s9 + $0x78] sm:$0xff] }
 0x7c7   :  { %v5701_v54 = vpack.c.bf16 %v4592_v50, %v4591_v49 }
 0x7c9   :  { %5633 = vmatpush1.bf16.msra.mxu1 %v5632_v55  ;;  %v3716_v55 = vld [vmem:[%s8454_s9 + $0x28] sm:$0xff] }
 0x7ca   :  { %3461 = vmatprep.subr.mxu1 %v4583_v56  ;;  %v5716_v56 = vpack.c.bf16 %v3716_v55, %v3715_v52  ;;  %v4058_v55 = vld [vmem:[%s8456_s11 + $0x8] sm:$0xff] }
 0x7cd   :  { %3462 = vmatpush1.msra.mxu1 %v4582_v57  ;;  %v4593_v57 = vld [vmem:[%s8454_s9 + $0x80] sm:$0xff] }
 0x7ce   :  { %4584 = vmatmul.mubr.msk.f32.vlgmr.msra.gmra.mrb[18].mxu1 %vm871_vm5, %v3399_v58  ;;  %5709 = vmatprep.subr.bf16.mxu1 %v5858_v13  ;;  %v4594_v58 = vld [vmem:[%s8454_s9 + $0x88] sm:$0xff] }
 0x7cf   :  { %4879 = vmatprep.mubr.msk.f32.mxu1 %vm5859_vm8, %v5856_v7  ;;  %5711 = vmatpush3.bf16.msra.mxu1 %v5710_v44  ;;  %v5704_v59 = vpack.c.bf16 %v4594_v58, %v4593_v57  ;;  %v4059_v57 = vld [vmem:[%s8456_s11 + $0x10] sm:$0xff]  ;;  %v4060_v58 = vld [vmem:[%s8456_s11 + $0x18] sm:$0xff] }
 0x7d0   :  { %5712 = vmatprep.subr.bf16.mxu1 %v5858_v13 }
 0x7d3   :  { %5714 = vmatpush3.bf16.msra.mxu1 %v5713_v48 }
 0x7d4   :  { %5715 = vmatprep.subr.bf16.mxu1 %v5858_v13 }
 0x7d7   :  { %5717 = vmatpush3.bf16.msra.mxu1 %v5716_v56 }
 0x7d8   :  { %5718 = vmatprep.subr.bf16.mxu1 %v5858_v13 }
 0x8a1   :  { %v3499_v0 = vpop.f32.mrb[18].mxu1 }
 0x8a2   :  { %v3518_v1 = vadd.f32 %v3511_v62, %v3499_v0  ;;  %v3501_v2 = vpop.f32.mrb[19].mxu1  ;;  %v4596_v62 = vld [vmem:[%s8454_s9 + $0x98] sm:$0xff]  ;;  %v3719_v0 = vld [vmem:[%s8454_s9 + $0x40] sm:$0xff] }
 0x8a3   :  { %v3519_v5 = vadd.f32 %v3515_v63, %v3501_v2  ;;  %v5719_v63 = vpack.c.bf16 %v3718_v60, %v3717_v10  ;;  %v5707_v2 = vpack.c.bf16 %v4596_v62, %v4595_v61  ;;  %v5758_v10 = vpack.c.bf16 %v4060_v58, %v4059_v57  ;;  %v4062_v60 = vld [vmem:[%s8456_s11 + $0x28] sm:$0xff]  ;;  %v4063_v62 = vld [vmem:[%s8456_s11 + $0x30] sm:$0x3] }
 0x8a4   :  { %v3520_v9 = vmax.f32 %v3518_v1, 0.0  ;;  %v3720_v1 = vld [vmem:[%s8454_s9 + $0x48] sm:$0xff] }
 0x8a5   :  { %v3521_v6 = vmax.f32 %v3519_v5, 0.0  ;;  %5720 = vmatpush3.bf16.msra.mxu1 %v5719_v63  ;;  %v5722_v3 = vpack.c.bf16 %v3720_v1, %v3719_v0 }
 0x8a6   :  { %5721 = vmatprep.subr.bf16.mxu1 %v5858_v13 }
 0x8a7   :  { %4585 = vmatprep.mubr.msk.f32.mxu0 %vm1495_vm7, %v3521_v6 }
 0x8a8   :  { %3610 = vmatmul.mubr.f32.vlgmr.msra.gmra.mrb[34].mxu0 %v3520_v9 }
 0x8a9   :  { %5666 = vmatpush1.bf16.msra.mxu0 %v5665_v8  ;;  %4586 = vmatprep.mubr.msk.f32.mxu0 %vm1495_vm7, %v3521_v6 }
 0x8aa   :  { %5667 = vmatprep.subr.bf16.mxu0 %v5858_v13  ;;  %5723 = vmatpush3.bf16.msra.mxu1 %v5722_v3 }
 0x8ab   :  { %5739 = vmatprep.subr.bf16.mxu1 %v5858_v13 }
 0x8ad   :  { %5669 = vmatpush1.bf16.msra.mxu0 %v5668_v11  ;;  %v4610_v11 = vld [vmem:[%s8454_s9 + $0xf0] sm:$0xff] }
 0x8ae   :  { %5670 = vmatprep.subr.bf16.mxu0 %v5858_v13  ;;  %v5740_v20 = vpack.c.bf16 %v4611_v12, %v4610_v11  ;;  %v4064_v11 = vld [vmem:[%s8457_s12] sm:$0x1] }
 0x8b1   :  { %5672 = vmatpush1.bf16.msra.mxu0 %v5671_v15 }
 0x8b2   :  { %5673 = vmatprep.subr.bf16.mxu0 %v5858_v13 }
 0x8b5   :  { %5675 = vmatpush1.bf16.msra.mxu0 %v5674_v18 }
 0x8b6   :  { %5676 = vmatprep.subr.bf16.mxu0 %v5858_v13 }
 0x8b9   :  { %5678 = vmatpush1.bf16.msra.mxu0 %v5677_v21  ;;  %v4601_v21 = vld [vmem:[%s8454_s9 + $0xb0] sm:$0xff] }
 0x8ba   :  { %5679 = vmatprep.subr.bf16.mxu0 %v5858_v13  ;;  %v5728_v26 = vpack.c.bf16 %v4602_v22, %v4601_v21 }
 0x8bd   :  { %5681 = vmatpush1.bf16.msra.mxu0 %v5680_v24  ;;  %v4612_v24 = vld [vmem:[%s8454_s9 + $0x100] sm:$0xff] }
 0x8be   :  { %5682 = vmatprep.subr.bf16.mxu0 %v5858_v13 }
 0x8c1   :  { %5684 = vmatpush1.bf16.msra.mxu0 %v5683_v27  ;;  %v5743_v27 = vpack.c.bf16 %v4613_v25, %v4612_v24 }
 0x8c2   :  { %5685 = vmatprep.subr.bf16.mxu0 %v5858_v13 }
 0x8c5   :  { %5687 = vmatpush1.bf16.msra.mxu0 %v5686_v30  ;;  %v4614_v30 = vld [vmem:[%s8454_s9 + $0x110] sm:$0xff] }
 0x8c6   :  { %5688 = vmatprep.subr.bf16.mxu0 %v5858_v13 }
 0x8c9   :  { %5690 = vmatpush1.bf16.msra.mxu0 %v5689_v33  ;;  %v5746_v33 = vpack.c.bf16 %v4615_v31, %v4614_v30 }
 0x8ca   :  { %5691 = vmatprep.subr.bf16.mxu0 %v5858_v13 }
 0x8cd   :  { %5693 = vmatpush1.bf16.msra.mxu0 %v5692_v36  ;;  %v4616_v36 = vld [vmem:[%s8454_s9 + $0x120] sm:$0xff] }
 0x8ce   :  { %5694 = vmatprep.subr.bf16.mxu0 %v5858_v13  ;;  %v5749_v39 = vpack.c.bf16 %v4617_v37, %v4616_v36 }
 0x8d0   :  { %3700 = vmatmul.mubr.f32.vlgmr.msra.gmra.mrb[36].mxu0 %v3520_v9 }
 0x8d1   :  { %4856 = vmatprep.mubr.msk.f32.mxu0 %vm5859_vm8, %v5856_v7  ;;  %5696 = vmatpush3.bf16.msra.mxu0 %v5695_v40  ;;  %v4607_v40 = vld [vmem:[%s8454_s9 + $0xe0] sm:$0xff] }
 0x8d2   :  { %5697 = vmatprep.subr.bf16.mxu0 %v5858_v13  ;;  %v5737_v44 = vpack.c.bf16 %v4608_v41, %v4607_v40 }
 0x8d5   :  { %5699 = vmatpush3.bf16.msra.mxu0 %v5698_v47 }
 0x8d6   :  { %5700 = vmatprep.subr.bf16.mxu0 %v5858_v13 }
 0x8d9   :  { %5702 = vmatpush3.bf16.msra.mxu0 %v5701_v54  ;;  %v4057_v54 = vld [vmem:[%s8456_s11] sm:$0xff] }
 0x8da   :  { %5703 = vmatprep.subr.bf16.mxu0 %v5858_v13  ;;  %v5755_v56 = vpack.c.bf16 %v4058_v55, %v4057_v54 }
 0x8dd   :  { %5705 = vmatpush3.bf16.msra.mxu0 %v5704_v59  ;;  %v4061_v59 = vld [vmem:[%s8456_s11 + $0x20] sm:$0xff] }
 0x8de   :  { %5706 = vmatprep.subr.bf16.mxu0 %v5858_v13  ;;  %v5761_v61 = vpack.c.bf16 %v4062_v60, %v4061_v59 }
 0x8e1   :  { %5708 = vmatpush3.bf16.msra.mxu0 %v5707_v2 }
 0x8e2   :  { %5724 = vmatprep.subr.bf16.mxu0 %v5858_v13 }
 0x97b   :  { %v3611_v4 = vpop.f32.mrb[34].mxu0 }
 0x97c   :  { %v3613_v5 = vpop.f32.mrb[35].mxu0 }
 0x9a3   :  { %v3701_v6 = vpop.f32.mrb[36].mxu0 }
 0x9a4   :  { %v3705_v8 = vmax.f32 %v3611_v4, %v3701_v6  ;;  %v3703_v9 = vpop.f32.mrb[37].mxu0 }
 0x9a6   :  { %3707 = vst.msk [vmem:[#allocation4 + $0x8] sm:$0xff] %vm1660_vm9, %v3705_v8  ;;  %v4054_v8 = vld [vmem:[%s8455_s10] sm:$0x1] }
 0x9ad   :  { %v3721_v14 = vld [vmem:[#allocation4 + $0xa] sm:$0x1]  ;;  %v3722_v15 = vld [vmem:[#allocation4 + $0xb] sm:$0x1]  ;;  %v3708_v16 = vld [vmem:[#allocation4 + $0x8] sm:$0x1] }
 0x9ae   :  { %v3723_v18 = vmax.f32 %v3721_v14, %v3722_v15  ;;  %v3709_v19 = vld [vmem:[#allocation4 + $0x9] sm:$0x1]  ;;  %v3880_v46 = vld [vmem:[#allocation4 + $0xc] sm:$0x1]  ;;  %v3881_v47 = vld [vmem:[#allocation4 + $0xd] sm:$0x1] }
 0x9af   :  { %v3710_v23 = vmax.f32 %v3708_v16, %v3709_v19  ;;  %v3967_v48 = vld [vmem:[#allocation4 + $0xe] sm:$0x1]  ;;  %v3968_v49 = vld [vmem:[#allocation4 + $0xf] sm:$0x1]  ;;  %v3882_v50 = vmax.f32 %v3880_v46, %v3881_v47 }
 0x9b0   :  { %4857 = vmatmul.mubr.msk.f32.vlgmr.msra.gmra.mrb[38].mxu0 %vm1660_vm9, %v3723_v18  ;;  %v3969_v52 = vmax.f32 %v3967_v48, %v3968_v49 }
 0x9b1   :  { %4880 = vmatmul.mubr.msk.f32.vlgmr.msra.gmra.mrb[20].mxu1 %vm1660_vm9, %v3710_v23  ;;  %5726 = vmatpush3.bf16.msra.mxu0 %v5725_v17 }
 0x9b2   :  { %5741 = vmatpush3.bf16.msra.mxu1 %v5740_v20  ;;  %5727 = vmatprep.subr.bf16.mxu0 %v5858_v13 }
 0x9b3   :  { %5742 = vmatprep.subr.bf16.mxu1 %v5858_v13  ;;  %4902 = vmatprep.mubr.msk.f32.mxu0 %vm5859_vm8, %v5856_v7 }
 0x9b4   :  { %4925 = vmatprep.mubr.msk.f32.mxu1 %vm5859_vm8, %v5856_v7 }
 0x9b5   :  { %5729 = vmatpush3.bf16.msra.mxu0 %v5728_v26 }
 0x9b6   :  { %5744 = vmatpush3.bf16.msra.mxu1 %v5743_v27  ;;  %5730 = vmatprep.subr.bf16.mxu0 %v5858_v13 }
 0x9b7   :  { %5745 = vmatprep.subr.bf16.mxu1 %v5858_v13 }
 0x9b9   :  { %5732 = vmatpush3.bf16.msra.mxu0 %v5731_v32 }
 0x9ba   :  { %5747 = vmatpush3.bf16.msra.mxu1 %v5746_v33  ;;  %5733 = vmatprep.subr.bf16.mxu0 %v5858_v13 }
 0x9bb   :  { %5748 = vmatprep.subr.bf16.mxu1 %v5858_v13 }
 0x9bd   :  { %5735 = vmatpush3.bf16.msra.mxu0 %v5734_v38 }
 0x9be   :  { %5750 = vmatpush3.bf16.msra.mxu1 %v5749_v39  ;;  %5736 = vmatprep.subr.bf16.mxu0 %v5858_v13 }
 0x9bf   :  { %5751 = vmatprep.subr.bf16.mxu1 %v5858_v13 }
 0x9c1   :  { %5738 = vmatpush3.bf16.msra.mxu0 %v5737_v44 }
 0x9c2   :  { %5753 = vmatpush3.bf16.msra.mxu1 %v5752_v45  ;;  %5754 = vmatprep.subr.bf16.mxu0 %v5858_v13 }
 0x9c4   :  { %4903 = vmatmul.mubr.msk.f32.vlgmr.msra.gmra.mrb[40].mxu0 %vm1660_vm9, %v3882_v50 }
 0x9c5   :  { %4926 = vmatmul.mubr.msk.f32.vlgmr.msra.gmra.mrb[22].mxu1 %vm1660_vm9, %v3969_v52  ;;  %4942 = vmatprep.mubr.msk.f32.mxu0 %vm5859_vm8, %v5856_v7 }
 0x9c6   :  { %5756 = vmatpush3.bf16.msra.mxu0 %v5755_v56 }
 0x9c7   :  { %5757 = vmatprep.subr.bf16.mxu0 %v5858_v13 }
 0x9ca   :  { %5759 = vmatpush3.bf16.msra.mxu0 %v5758_v10 }
 0x9cb   :  { %5760 = vmatprep.subr.bf16.mxu0 %v5858_v13 }
 0x9ce   :  { %5762 = vmatpush3.bf16.msra.mxu0 %v5761_v61 }
 0x9cf   :  { %4940 = vmatprep.subr.mxu0 %v5856_v7 }
 0x9d2   :  { %4941 = vmatpush3.msk.msra.mxu0 %vm2026_vm10, %v4063_v62 }
 0xa83   :  { %v3803_v63 = vpop.f32.mrb[38].mxu0 }
 0xa84   :  { %v3876_v13 = vpop.f32.mrb[20].mxu1  ;;  %v4858_v0 = vpop.f32.mrb[39].mxu0 }
 0xa85   :  { %v3877_v1 = vadd.f32 %v3876_v13, %v3803_v63  ;;  %v4881_v2 = vpop.f32.mrb[21].mxu1 }
 0xa97   :  { %v3962_v3 = vpop.f32.mrb[40].mxu0 }
 0xa98   :  { %v3966_v4 = vadd.f32 %v3962_v3, %v3877_v1  ;;  %v4049_v5 = vpop.f32.mrb[22].mxu1  ;;  %v4904_v6 = vpop.f32.mrb[41].mxu0 }
 0xa99   :  { %v4927_v7 = vpop.f32.mrb[23].mxu1 }
 0xa9a   :  { %v4053_v9 = vadd.f32 %v4049_v5, %v3966_v4 }
 0xa9c   :  { %v4055_v51 = vadd.f32 %v4054_v8, %v4053_v9 }
 0xa9e   :  { %v4056_v53 = vmax.f32 %v4055_v51, 0.0 }
 0xaa0   :  { %4943 = vmatmul.mubr.msk.f32.vlgmr.msra.gmra.mrb[42].mxu0 %vm2022_vm11, %v4056_v53 }
 0xb73   :  { %v4137_v12 = vpop.f32.mrb[42].mxu0 }
 0xb74   :  { %v4138_v14 = vadd.f32 %v4137_v12, %v4064_v11  ;;  %v4944_v15 = vpop.f32.mrb[43].mxu0 }
 0xb76   :  { %4141 = vst.msk [vmem:[#allocation5 + $0x1] sm:$0x1] %vm2100_vm12, %v4138_v14 }
 0xb77   :  { %5843 = shalt.err (!%p5840_p4)
}
 0xb78   :  { %s5844_s3 = scalar_lea.hbm %s8458_s13, 32 }
 0xb79   :  { %p5845_p5 = scmp.ne.s32.totalorder %s8458_s13, %s5844_s3  ;;  %p5848_p6 = scmp.lt.u32.totalorder %s5844_s3, %s8458_s13 }
 0xb7b   :  { %p5850_p7 = pnand %p5848_p6, %p5845_p5 }
 0xb7d   :  { %5853 = shalt.err (!%p5850_p7)
}
 0xb7e   :  { %4151 = dma.vmem_to_hbm [thread:$0]  %s4149_s16, 32, %s8458_s13, [#allocation6]  }
 0xb7f   :  { %5854 = dma.done.wait [#allocation6], 32  }
 0xb80   :  { %5855 = vsyncadd [#allocation6], 4294967264 }
 0xb81   :  { %4155 = vsyncpa [#allocation6], 1 }

</bundles_post_ra>
